<compile_context>
chip_gen: v7x
topology: tpu7x:2x2x1
jax: 0.10.0
libtpu: 0.0.40
codegen_flags: <defaults>
</compile_context>

<pallas_src>
import functools

import numpy as np
import jax
import jax.numpy as jnp
from jax import lax
from jax.experimental import pallas as pl
from jax.experimental.pallas import tpu as pltpu

# ----------------------------------------------------------------------------
# sym5 decomposition filters (PyWavelets values) and the banded DWT matrices
# that reproduce pytorch_wavelets DWTForward(J=1, mode='zero', wave='sym5').
# ----------------------------------------------------------------------------
_SYM5_DEC_LO = np.array([
    0.027333068345077982, 0.029519490925774643, -0.039134249302383094,
    0.1993975339773936, 0.7234076904024206, 0.6339789634582119,
    0.01660210576452232, -0.17532808990845047, -0.021101834024758855,
    0.019538882735286728], dtype=np.float64)
_SYM5_DEC_HI = np.array(
    [(-1.0) ** (k + 1) * _SYM5_DEC_LO[9 - k] for k in range(10)], dtype=np.float64)


def _dwt_matrix(n):
    """Banded matrix M of shape (2*out, n): rows [0, out) are the low-pass
    outputs, rows [out, 2*out) the high-pass outputs, for a length-n signal
    with zero padding and stride 2 (pytorch_wavelets afb1d, mode='zero')."""
    flen = 10
    out = (n + flen - 1) // 2
    m = np.zeros((2 * out, n), dtype=np.float32)
    for o in range(out):
        for w in range(n):
            j = 2 * o + 1 - w
            if 0 <= j < flen:
                m[o, w] = _SYM5_DEC_LO[j]
                m[out + o, w] = _SYM5_DEC_HI[j]
    return m


# ----------------------------------------------------------------------------
# Static gather indices turning conv_w (4C, 4C, 5, 5) into ten banded matrices
# G_k of shape (C*2Wp, 4C*Wo).  Per-batch DWT output y is (2Hp, C*2Wp) with
# per-channel column blocks [c*2Wp + q]; row slab k = 2*ky + s (s=0: rows
# ky..ky+Ho = low-pass bands, s=1: rows Hp+ky.. = high-pass bands).  Then
#   conv_out[:, o*Wo + ox] = sum_k  y_slab_k @ G_k   (+ bias)
# reproduces Conv2d(4C, 4C, 5, VALID) over feat = cat([LL, HL, LH, HH], ch).
# ----------------------------------------------------------------------------
def _conv_gather_index(C, Wp, Wo):
    F4 = 4 * C
    C2W = C * 2 * Wp
    r = np.arange(10 * C2W)
    blk = r // C2W                      # 2*ky + s
    ky = blk // 2
    s = blk % 2
    rem = r % C2W
    c = rem // (2 * Wp)
    w = rem % (2 * Wp)
    half = (w >= Wp).astype(np.int64)   # 0: left half (low-pass cols), 1: right half
    wp_ = w - half * Wp                 # column inside the (Hp, Wp) band plane
    band = s + 2 * half                 # 0:Yl  1:Yh[...,0]  2:Yh[...,1]  3:Yh[...,2]
    f = band * C + c                    # feature channel after the torch.cat

    col = np.arange(F4 * Wo)
    o = col // Wo                       # conv output channel (channel-major lanes)
    ox = col % Wo

    kx = wp_[:, None] - ox[None, :]                       # (10*C2W, F4*Wo)
    valid = (kx >= 0) & (kx < 5)
    flat = ((o[None, :] * F4 + f[:, None]) * 5 + ky[:, None]) * 5 + np.clip(kx, 0, 4)
    zero_slot = F4 * F4 * 25            # extra zero appended to the flat weights
    idx = np.where(valid, flat, zero_slot)
    return idx.reshape(10, C2W, F4 * Wo)


def _round_up(n, m):
    return ((n + m - 1) // m) * m


def _pad2(a, shape):
    out = np.zeros(shape, a.dtype)
    out[:a.shape[0], :a.shape[1]] = a
    return out


def _pick_batch_tile(B, H):
    """Bt | B, width-pass matmul M = Bt*H ~ 256, and >=2 grid steps when possible
    (so the 'parallel' batch axis still feeds both v7x TensorCores)."""
    target = max(1, 256 // max(H, 1))
    divisors = [d for d in range(1, B + 1) if B % d == 0]
    cands = [d for d in divisors if d <= target and B // d >= 2]
    if not cands:
        cands = [d for d in divisors if d <= target] or [1]
    return max(cands)


# ----------------------------------------------------------------------------
# One-time host-side parameter packing (hoisted out of the per-forward jit).
# ----------------------------------------------------------------------------
def prepack_wt_patch_merging(params, input_resolution, batch_tile,
                             compute_dtype=jnp.bfloat16):
    H, W = input_resolution
    C = int(params["ln_w"].shape[0]) // 4
    assert 4 * C == 12, "formsize Conv2d has 12 channels => dim must be 3"
    Hp, Wp = (H + 9) // 2, (W + 9) // 2
    Ho, Wo = Hp - 4, Wp - 4
    F4, C2W = 4 * C, C * 2 * Wp
    NCOL, NOUT = F4 * Wo, Wo * 2 * C
    LANE = 128
    C2Wp, NCOLp, MUp = _round_up(C2W, LANE), _round_up(NCOL, LANE), _round_up(Wo, LANE)
    Bt = batch_tile

    conv_w = np.asarray(params["conv_w"], np.float32)
    conv_b = np.asarray(params["conv_b"], np.float32)
    ln_w = np.asarray(params["ln_w"], np.float32)
    ln_b = np.asarray(params["ln_b"], np.float32)
    red_w = np.asarray(params["red_w"], np.float32)

    mh = _dwt_matrix(H)                       # (2Hp, H)  column (height) DWT pass
    mw = _dwt_matrix(W).T                     # (W, 2Wp)  row (width) DWT pass

    # Width pass with the (w, c) de-interleave of the raw input folded in.
    m2 = np.einsum("wq,ce->wceq", mw, np.eye(C, dtype=np.float32)).reshape(W * C, C2W)
    m2 = _pad2(m2, (W * C, C2Wp))

    # Height pass, block-diagonal over the batch tile -> one big-M matmul.
    mhb = np.kron(np.eye(Bt, dtype=np.float32), mh)          # (Bt*2Hp, Bt*H)

    # Ten banded conv matrices fused into one long-K slab, lane padded per slab.
    idx = _conv_gather_index(C, Wp, Wo)                       # (10, C2W, NCOL)
    wflat = np.concatenate([conv_w.reshape(-1), np.zeros((1,), np.float32)])
    g = wflat[idx]
    gbig = np.zeros((10, C2Wp, NCOLp), np.float32)
    gbig[:, :C2W, :NCOL] = g
    gbig = gbig.reshape(10 * C2Wp, NCOLp)

    brow = np.zeros((1, NCOLp), np.float32)
    brow[0, :NCOL] = np.repeat(conv_b, Wo)                    # affects LN stats

    # LayerNorm group-sum / broadcast matrices (1/F4 folded into the sum); f32.
    eye_w = np.eye(Wo, dtype=np.float32)
    smat = _pad2(np.tile(eye_w, (F4, 1)) / F4, (NCOLp, MUp))
    stmat = _pad2(np.tile(eye_w, (1, F4)), (MUp, NCOLp))

    # 4C -> 2C reduction + token-major relayout, LN gamma folded in; LN beta
    # becomes a post-matmul bias row (reduction is linear).
    rmat = np.einsum("jo,xy->oxyj", red_w * ln_w[None, :], eye_w).reshape(NCOL, NOUT)
    rmat = _pad2(rmat, (NCOLp, NOUT))
    obias = np.tile(red_w @ ln_b, Wo)[None, :]                # (1, NOUT)

    cd = compute_dtype
    return dict(
        mhb=jnp.asarray(mhb, cd), m2=jnp.asarray(m2, cd),
        gbig=jnp.asarray(gbig, cd), brow=jnp.asarray(brow, jnp.float32),
        smat=jnp.asarray(smat, jnp.float32), stmat=jnp.asarray(stmat, jnp.float32),
        rmat=jnp.asarray(rmat, cd), obias=jnp.asarray(obias, jnp.float32),
    )


# ----------------------------------------------------------------------------
# Fused forward: sym5 DWT -> sub-band split -> 5x5 conv -> LayerNorm -> 4C->2C.
# ----------------------------------------------------------------------------
@functools.partial(jax.jit, static_argnums=(2, 3, 4))
def wt_patch_merging(x, packed, input_resolution, batch_tile, single_buffer=True):
    H, W = input_resolution
    B, L, C = x.shape
    assert L == H * W, "input feature has wrong size"
    assert H % 2 == 0 and W % 2 == 0, f"x size ({H}*{W}) are not even."
    assert 4 * C == 12, "formsize Conv2d has 12 channels => dim must be 3"
    Bt = batch_tile
    assert B % Bt == 0, "batch_tile must divide the batch"

    Hp, Wp = (H + 9) // 2, (W + 9) // 2      # sym5 (len 10), zero mode: N/2 + 4
    Ho, Wo = Hp - 4, Wp - 4                  # after 5x5 VALID conv -> H/2, W/2
    C2W = C * 2 * Wp
    NOUT = Wo * 2 * C
    LANE = 128
    C2Wp, NCOLp, MUp = _round_up(C2W, LANE), _round_up(4 * C * Wo, LANE), _round_up(Wo, LANE)
    f32 = jnp.float32
    cdt = packed["m2"].dtype                 # bf16 MXU operands, f32 accumulate

    # Row offsets (within one batch element's 2Hp DWT rows) for slab k = 2*ky + s.
    slab_off = tuple(s * Hp + ky for ky in range(5) for s in range(2))

    def kernel(x_ref, mhb_ref, m2_ref, g_ref, brow_ref, smat_ref, stmat_ref,
               rmat_ref, obias_ref, o_ref):
        # (Bt, H, W*C) -> (Bt*H, W*C): free leading-dim collapse (H % 8 == 0).
        xb = x_ref[...].reshape(Bt * H, W * C).astype(cdt)

        # Separable sym5 DWT: width pass (channel de-interleave folded into m2),
        # then height pass as one block-diagonal big-M matmul over the batch tile.
        t = jnp.dot(xb, m2_ref[...], preferred_element_type=f32)       # (Bt*H, C2Wp)
        y = jnp.dot(mhb_ref[...], t.astype(cdt),
                    preferred_element_type=f32)                        # (Bt*2Hp, C2Wp)

        # 5x5 conv over the 4 sub-bands: lane-concatenate the ten (ky, band-half)
        # row slabs and contract once against the fused (10*C2Wp, NCOLp) weights.
        y3 = y.reshape(Bt, 2 * Hp, C2Wp)
        ybig = jnp.concatenate([y3[:, off:off + Ho, :] for off in slab_off], axis=-1)
        ybig = ybig.reshape(Bt * Ho, 10 * C2Wp).astype(cdt)
        z = jnp.dot(ybig, g_ref[...], preferred_element_type=f32) + brow_ref[...]

        # LayerNorm over the 4C conv channels (channel-major lanes; matmul-based
        # group mean/var with 1/F4 folded into smat; eps = 1e-5).  Kept in f32.
        mu = jnp.dot(z, smat_ref[...], preferred_element_type=f32)     # (M, MUp)
        d = z - jnp.dot(mu, stmat_ref[...], preferred_element_type=f32)
        var = jnp.dot(d * d, smat_ref[...], preferred_element_type=f32)
        rstd = lax.rsqrt(var + 1e-5)
        zn = d * jnp.dot(rstd, stmat_ref[...], preferred_element_type=f32)

        # 4C -> 2C reduction (LN gamma folded into rmat, LN beta into obias),
        # token-major output: (Bt*Ho, Wo*2C) -> (Bt, Ho, Wo*2C).
        out = jnp.dot(zn.astype(cdt), rmat_ref[...],
                      preferred_element_type=f32) + obias_ref[...]
        o_ref[...] = out.reshape(Bt, Ho, NOUT)

    def const_spec(shape):
        index_map = lambda b, _s=len(shape): (0,) * _s
        if single_buffer:
            # Grid-invariant operands: fetched once, no double-buffer reservation.
            return pl.BlockSpec(shape, index_map, pipeline_mode=pl.Buffered(1))
        return pl.BlockSpec(shape, index_map)

    # (B, H*W, C) -> (B, H, W*C) is a contiguous reshape; DMA in the original dtype.
    xi = x.reshape(B, H, W * C)

    out = pl.pallas_call(
        kernel,
        out_shape=jax.ShapeDtypeStruct((B, Ho, NOUT), f32),
        grid=(B // Bt,),
        in_specs=[
            pl.BlockSpec((Bt, H, W * C), lambda b: (b, 0, 0)),
            const_spec((Bt * 2 * Hp, Bt * H)),     # mhb
            const_spec((W * C, C2Wp)),             # m2
            const_spec((10 * C2Wp, NCOLp)),        # fused conv slab
            const_spec((1, NCOLp)),                # conv bias row
            const_spec((NCOLp, MUp)),              # LN group-sum (incl. 1/F4)
            const_spec((MUp, NCOLp)),              # LN broadcast
            const_spec((NCOLp, NOUT)),             # reduction (+ gamma)
            const_spec((1, NOUT)),                 # beta @ reduction
        ],
        out_specs=pl.BlockSpec((Bt, Ho, NOUT), lambda b: (b, 0, 0)),
        compiler_params=pltpu.CompilerParams(
            dimension_semantics=("parallel",),     # feeds both v7x TensorCores
            vmem_limit_bytes=64 * 1024 * 1024,
        ),
    )(xi, packed["mhb"], packed["m2"], packed["gbig"], packed["brow"],
      packed["smat"], packed["stmat"], packed["rmat"], packed["obias"])

    # (B, Ho, Wo*2C) -> (B, Ho*Wo, 2C): contiguous reshape only.
    return out.reshape(B, Ho * Wo, 2 * C)


# ----------------------------------------------------------------------------
# Pure-JAX high-precision reference (same math, no Pallas) for a self-check.
# ----------------------------------------------------------------------------
def _reference(x, params, input_resolution):
    H, W = input_resolution
    B, L, C = x.shape
    Hp, Wp = (H + 9) // 2, (W + 9) // 2
    Ho, Wo = Hp - 4, Wp - 4
    mh = jnp.asarray(_dwt_matrix(H))
    mw = jnp.asarray(_dwt_matrix(W).T)
    xi = x.reshape(B, H, W, C).transpose(0, 3, 1, 2)
    y = jnp.einsum("ph,bchw,wq->bcpq", mh, xi, mw, precision=lax.Precision.HIGHEST)
    feat = jnp.concatenate(
        [y[:, :, :Hp, :Wp], y[:, :, Hp:, :Wp], y[:, :, :Hp, Wp:], y[:, :, Hp:, Wp:]],
        axis=1)
    z = lax.conv_general_dilated(feat, params["conv_w"], (1, 1), "VALID",
                                 dimension_numbers=("NCHW", "OIHW", "NCHW"),
                                 precision=lax.Precision.HIGHEST)
    z = z + params["conv_b"].reshape(1, -1, 1, 1)
    z = z.transpose(0, 2, 3, 1).reshape(B, Ho * Wo, 4 * C)
    mu = z.mean(-1, keepdims=True)
    var = ((z - mu) ** 2).mean(-1, keepdims=True)
    z = (z - mu) / jnp.sqrt(var + 1e-5) * params["ln_w"] + params["ln_b"]
    return jnp.einsum("btk,ok->bto", z, params["red_w"],
                      precision=lax.Precision.HIGHEST)


if __name__ == "__main__":
    H = W = 16
    dim = 3          # 4*dim == 12 == formsize Conv2d channel count
    B = 8

    key = jax.random.PRNGKey(0)
    kx, k1, k2, k3, k4, k5 = jax.random.split(key, 6)
    x = jax.random.normal(kx, (B, H * W, dim), jnp.float32)

    params = dict(
        conv_w=0.05 * jax.random.normal(k1, (4 * dim, 4 * dim, 5, 5), jnp.float32),
        conv_b=0.05 * jax.random.normal(k2, (4 * dim,), jnp.float32),
        ln_w=1.0 + 0.1 * jax.random.normal(k4, (4 * dim,), jnp.float32),
        ln_b=0.1 * jax.random.normal(k5, (4 * dim,), jnp.float32),
        red_w=(1.0 / np.sqrt(4 * dim))
        * jax.random.normal(k3, (2 * dim, 4 * dim), jnp.float32),
    )

    bt = _pick_batch_tile(B, H)                 # B=8, H=16 -> Bt=4, grid=(2,)
    packed = prepack_wt_patch_merging(params, (H, W), bt)

    try:
        out = jax.block_until_ready(wt_patch_merging(x, packed, (H, W), bt, True))
    except Exception:
        # Fallback for jax versions without BlockSpec(pipeline_mode=pl.Buffered(1));
        # identical math, just default double-buffered weight operands.
        out = jax.block_until_ready(wt_patch_merging(x, packed, (H, W), bt, False))

    assert out.shape == (B, (H // 2) * (W // 2), 2 * dim), out.shape
    ref = _reference(x, params, (H, W))
    err = float(jnp.max(jnp.abs(out - ref)))
    # bf16 MXU operands (f32 accumulate) vs the f32-HIGHEST reference: the
    # tolerance below is re-validated for the DWT -> conv -> LN -> reduce chain.
    assert jnp.allclose(out, ref, atol=5e-2, rtol=5e-2), err
    assert bool(jnp.all(jnp.isfinite(out)))
    print("KERNEL_OK")
</pallas_src>

<mosaic_0001>
module attributes {stable_mosaic.version = 11 : i64} {
  func.func @kernel(%arg0: i32, %arg1: memref<4x16x48xf32, #tpu.memory_space<vmem>>, %arg2: memref<96x64xbf16, #tpu.memory_space<vmem>>, %arg3: memref<48x128xbf16, #tpu.memory_space<vmem>>, %arg4: memref<1280x128xbf16, #tpu.memory_space<vmem>>, %arg5: memref<1x128xf32, #tpu.memory_space<vmem>>, %arg6: memref<128x128xf32, #tpu.memory_space<vmem>>, %arg7: memref<128x128xf32, #tpu.memory_space<vmem>>, %arg8: memref<128x48xbf16, #tpu.memory_space<vmem>>, %arg9: memref<1x48xf32, #tpu.memory_space<vmem>>, %arg10: memref<4x8x48xf32, #tpu.memory_space<vmem>>) attributes {dimension_semantics = [#tpu.dimension_semantics<parallel>], iteration_bounds = array<i64: 2>, scalar_prefetch = 0 : i64, scratch_operands = 0 : i64, tpu.core_type = #tpu.core_type<tc>, window_params = [{transform_indices = @transform_0, window_bounds = array<i64: 4, 16, 48>}, {pipeline_mode = #tpu.pipeline_mode<synchronous>, transform_indices = @transform_1, window_bounds = array<i64: 96, 64>}, {pipeline_mode = #tpu.pipeline_mode<synchronous>, transform_indices = @transform_2, window_bounds = array<i64: 48, 128>}, {pipeline_mode = #tpu.pipeline_mode<synchronous>, transform_indices = @transform_3, window_bounds = array<i64: 1280, 128>}, {pipeline_mode = #tpu.pipeline_mode<synchronous>, transform_indices = @transform_4, window_bounds = array<i64: 1, 128>}, {pipeline_mode = #tpu.pipeline_mode<synchronous>, transform_indices = @transform_5, window_bounds = array<i64: 128, 128>}, {pipeline_mode = #tpu.pipeline_mode<synchronous>, transform_indices = @transform_6, window_bounds = array<i64: 128, 128>}, {pipeline_mode = #tpu.pipeline_mode<synchronous>, transform_indices = @transform_7, window_bounds = array<i64: 128, 48>}, {pipeline_mode = #tpu.pipeline_mode<synchronous>, transform_indices = @transform_8, window_bounds = array<i64: 1, 48>}, {transform_indices = @transform_9, window_bounds = array<i64: 4, 8, 48>}]} {
    %c0 = arith.constant 0 : index
    %c0_0 = arith.constant 0 : index
    %c0_1 = arith.constant 0 : index
    %0 = vector.load %arg1[%c0, %c0_0, %c0_1] : memref<4x16x48xf32, #tpu.memory_space<vmem>>, vector<4x16x48xf32>
    %1 = vector.shape_cast %0 : vector<4x16x48xf32> to vector<64x48xf32>
    %2 = arith.truncf %1 : vector<64x48xf32> to vector<64x48xbf16>
    %c0_2 = arith.constant 0 : index
    %c0_3 = arith.constant 0 : index
    %3 = vector.load %arg3[%c0_2, %c0_3] : memref<48x128xbf16, #tpu.memory_space<vmem>>, vector<48x128xbf16>
    %cst = arith.constant dense<0.000000e+00> : vector<64x128xf32>
    %4 = tpu.matmul %2, %3, %cst {dimension_numbers = #tpu.dot_dimension_numbers<[1], [0], [0], [1], [0, 0, 1, 1], [], []>} : vector<64x48xbf16>, vector<48x128xbf16>, vector<64x128xf32> -> vector<64x128xf32>
    %c0_4 = arith.constant 0 : index
    %c0_5 = arith.constant 0 : index
    %5 = vector.load %arg2[%c0_4, %c0_5] : memref<96x64xbf16, #tpu.memory_space<vmem>>, vector<96x64xbf16>
    %6 = arith.truncf %4 : vector<64x128xf32> to vector<64x128xbf16>
    %cst_6 = arith.constant dense<0.000000e+00> : vector<96x128xf32>
    %7 = tpu.matmul %5, %6, %cst_6 {dimension_numbers = #tpu.dot_dimension_numbers<[1], [0], [0], [1], [0, 0, 1, 1], [], []>} : vector<96x64xbf16>, vector<64x128xbf16>, vector<96x128xf32> -> vector<96x128xf32>
    %8 = vector.shape_cast %7 : vector<96x128xf32> to vector<4x24x128xf32>
    %9 = vector.extract_strided_slice %8 {offsets = [0, 0, 0], sizes = [4, 8, 128], strides = [1, 1, 1]} : vector<4x24x128xf32> to vector<4x8x128xf32>
    %10 = vector.extract_strided_slice %8 {offsets = [0, 12, 0], sizes = [4, 8, 128], strides = [1, 1, 1]} : vector<4x24x128xf32> to vector<4x8x128xf32>
    %11 = vector.extract_strided_slice %8 {offsets = [0, 1, 0], sizes = [4, 8, 128], strides = [1, 1, 1]} : vector<4x24x128xf32> to vector<4x8x128xf32>
    %12 = vector.extract_strided_slice %8 {offsets = [0, 13, 0], sizes = [4, 8, 128], strides = [1, 1, 1]} : vector<4x24x128xf32> to vector<4x8x128xf32>
    %13 = vector.extract_strided_slice %8 {offsets = [0, 2, 0], sizes = [4, 8, 128], strides = [1, 1, 1]} : vector<4x24x128xf32> to vector<4x8x128xf32>
    %14 = vector.extract_strided_slice %8 {offsets = [0, 14, 0], sizes = [4, 8, 128], strides = [1, 1, 1]} : vector<4x24x128xf32> to vector<4x8x128xf32>
    %15 = vector.extract_strided_slice %8 {offsets = [0, 3, 0], sizes = [4, 8, 128], strides = [1, 1, 1]} : vector<4x24x128xf32> to vector<4x8x128xf32>
    %16 = vector.extract_strided_slice %8 {offsets = [0, 15, 0], sizes = [4, 8, 128], strides = [1, 1, 1]} : vector<4x24x128xf32> to vector<4x8x128xf32>
    %17 = vector.extract_strided_slice %8 {offsets = [0, 4, 0], sizes = [4, 8, 128], strides = [1, 1, 1]} : vector<4x24x128xf32> to vector<4x8x128xf32>
    %18 = vector.extract_strided_slice %8 {offsets = [0, 16, 0], sizes = [4, 8, 128], strides = [1, 1, 1]} : vector<4x24x128xf32> to vector<4x8x128xf32>
    %19 = tpu.concatenate %9, %10, %11, %12, %13, %14, %15, %16, %17, %18 in 2 : vector<4x8x128xf32>, vector<4x8x128xf32>, vector<4x8x128xf32>, vector<4x8x128xf32>, vector<4x8x128xf32>, vector<4x8x128xf32>, vector<4x8x128xf32>, vector<4x8x128xf32>, vector<4x8x128xf32>, vector<4x8x128xf32> -> vector<4x8x1280xf32>
    %20 = vector.shape_cast %19 : vector<4x8x1280xf32> to vector<32x1280xf32>
    %21 = arith.truncf %20 : vector<32x1280xf32> to vector<32x1280xbf16>
    %c0_7 = arith.constant 0 : index
    %c0_8 = arith.constant 0 : index
    %22 = vector.load %arg4[%c0_7, %c0_8] : memref<1280x128xbf16, #tpu.memory_space<vmem>>, vector<1280x128xbf16>
    %cst_9 = arith.constant dense<0.000000e+00> : vector<32x128xf32>
    %23 = tpu.matmul %21, %22, %cst_9 {dimension_numbers = #tpu.dot_dimension_numbers<[1], [0], [0], [1], [0, 0, 1, 1], [], []>} : vector<32x1280xbf16>, vector<1280x128xbf16>, vector<32x128xf32> -> vector<32x128xf32>
    %c0_10 = arith.constant 0 : index
    %c0_11 = arith.constant 0 : index
    %24 = vector.load %arg5[%c0_10, %c0_11] : memref<1x128xf32, #tpu.memory_space<vmem>>, vector<1x128xf32>
    %25 = vector.broadcast %24 : vector<1x128xf32> to vector<32x128xf32>
    %26 = arith.addf %23, %25 : vector<32x128xf32>
    %c0_12 = arith.constant 0 : index
    %c0_13 = arith.constant 0 : index
    %27 = vector.load %arg6[%c0_12, %c0_13] : memref<128x128xf32, #tpu.memory_space<vmem>>, vector<128x128xf32>
    %cst_14 = arith.constant dense<0.000000e+00> : vector<32x128xf32>
    %28 = tpu.matmul %26, %27, %cst_14 {dimension_numbers = #tpu.dot_dimension_numbers<[1], [0], [0], [1], [0, 0, 1, 1], [], []>} : vector<32x128xf32>, vector<128x128xf32>, vector<32x128xf32> -> vector<32x128xf32>
    %c0_15 = arith.constant 0 : index
    %c0_16 = arith.constant 0 : index
    %29 = vector.load %arg7[%c0_15, %c0_16] : memref<128x128xf32, #tpu.memory_space<vmem>>, vector<128x128xf32>
    %cst_17 = arith.constant dense<0.000000e+00> : vector<32x128xf32>
    %30 = tpu.matmul %28, %29, %cst_17 {dimension_numbers = #tpu.dot_dimension_numbers<[1], [0], [0], [1], [0, 0, 1, 1], [], []>} : vector<32x128xf32>, vector<128x128xf32>, vector<32x128xf32> -> vector<32x128xf32>
    %31 = arith.subf %26, %30 : vector<32x128xf32>
    %32 = arith.mulf %31, %31 : vector<32x128xf32>
    %c0_18 = arith.constant 0 : index
    %c0_19 = arith.constant 0 : index
    %33 = vector.load %arg6[%c0_18, %c0_19] : memref<128x128xf32, #tpu.memory_space<vmem>>, vector<128x128xf32>
    %cst_20 = arith.constant dense<0.000000e+00> : vector<32x128xf32>
    %34 = tpu.matmul %32, %33, %cst_20 {dimension_numbers = #tpu.dot_dimension_numbers<[1], [0], [0], [1], [0, 0, 1, 1], [], []>} : vector<32x128xf32>, vector<128x128xf32>, vector<32x128xf32> -> vector<32x128xf32>
    %cst_21 = arith.constant 9.99999974E-6 : f32
    %35 = vector.broadcast %cst_21 : f32 to vector<32x128xf32>
    %36 = arith.addf %34, %35 : vector<32x128xf32>
    %37 = math.rsqrt %36 : vector<32x128xf32>
    %c0_22 = arith.constant 0 : index
    %c0_23 = arith.constant 0 : index
    %38 = vector.load %arg7[%c0_22, %c0_23] : memref<128x128xf32, #tpu.memory_space<vmem>>, vector<128x128xf32>
    %cst_24 = arith.constant dense<0.000000e+00> : vector<32x128xf32>
    %39 = tpu.matmul %37, %38, %cst_24 {dimension_numbers = #tpu.dot_dimension_numbers<[1], [0], [0], [1], [0, 0, 1, 1], [], []>} : vector<32x128xf32>, vector<128x128xf32>, vector<32x128xf32> -> vector<32x128xf32>
    %40 = arith.mulf %31, %39 : vector<32x128xf32>
    %41 = arith.truncf %40 : vector<32x128xf32> to vector<32x128xbf16>
    %c0_25 = arith.constant 0 : index
    %c0_26 = arith.constant 0 : index
    %42 = vector.load %arg8[%c0_25, %c0_26] : memref<128x48xbf16, #tpu.memory_space<vmem>>, vector<128x48xbf16>
    %cst_27 = arith.constant dense<0.000000e+00> : vector<32x48xf32>
    %43 = tpu.matmul %41, %42, %cst_27 {dimension_numbers = #tpu.dot_dimension_numbers<[1], [0], [0], [1], [0, 0, 1, 1], [], []>} : vector<32x128xbf16>, vector<128x48xbf16>, vector<32x48xf32> -> vector<32x48xf32>
    %c0_28 = arith.constant 0 : index
    %c0_29 = arith.constant 0 : index
    %44 = vector.load %arg9[%c0_28, %c0_29] : memref<1x48xf32, #tpu.memory_space<vmem>>, vector<1x48xf32>
    %45 = vector.broadcast %44 : vector<1x48xf32> to vector<32x48xf32>
    %46 = arith.addf %43, %45 : vector<32x48xf32>
    %47 = vector.shape_cast %46 : vector<32x48xf32> to vector<4x8x48xf32>
    %c0_30 = arith.constant 0 : index
    %c0_31 = arith.constant 0 : index
    %c0_32 = arith.constant 0 : index
    %48 = vector.load %arg10[%c0_30, %c0_31, %c0_32] : memref<4x8x48xf32, #tpu.memory_space<vmem>>, vector<4x8x48xf32>
    tpu.vector_store %arg10[%c0_30, %c0_31, %c0_32], %47 {strides = array<i32>} : memref<4x8x48xf32, #tpu.memory_space<vmem>>, vector<4x8x48xf32>,
    return
  }
  func.func @transform_0(%arg0: i32) -> (i32, i32, i32) {
    %c0_i32 = arith.constant 0 : i32
    %c0_i32_0 = arith.constant 0 : i32
    %c0_i32_1 = arith.constant 0 : i32
    return %arg0, %c0_i32, %c0_i32_0 : i32, i32, i32
  }
  func.func @transform_1(%arg0: i32) -> (i32, i32) {
    %c0_i32 = arith.constant 0 : i32
    %c0_i32_0 = arith.constant 0 : i32
    %c0_i32_1 = arith.constant 0 : i32
    return %c0_i32, %c0_i32_0 : i32, i32
  }
  func.func @transform_2(%arg0: i32) -> (i32, i32) {
    %c0_i32 = arith.constant 0 : i32
    %c0_i32_0 = arith.constant 0 : i32
    %c0_i32_1 = arith.constant 0 : i32
    return %c0_i32, %c0_i32_0 : i32, i32
  }
  func.func @transform_3(%arg0: i32) -> (i32, i32) {
    %c0_i32 = arith.constant 0 : i32
    %c0_i32_0 = arith.constant 0 : i32
    %c0_i32_1 = arith.constant 0 : i32
    return %c0_i32, %c0_i32_0 : i32, i32
  }
  func.func @transform_4(%arg0: i32) -> (i32, i32) {
    %c0_i32 = arith.constant 0 : i32
    %c0_i32_0 = arith.constant 0 : i32
    %c0_i32_1 = arith.constant 0 : i32
    return %c0_i32, %c0_i32_0 : i32, i32
  }
  func.func @transform_5(%arg0: i32) -> (i32, i32) {
    %c0_i32 = arith.constant 0 : i32
    %c0_i32_0 = arith.constant 0 : i32
    %c0_i32_1 = arith.constant 0 : i32
    return %c0_i32, %c0_i32_0 : i32, i32
  }
  func.func @transform_6(%arg0: i32) -> (i32, i32) {
    %c0_i32 = arith.constant 0 : i32
    %c0_i32_0 = arith.constant 0 : i32
    %c0_i32_1 = arith.constant 0 : i32
    return %c0_i32, %c0_i32_0 : i32, i32
  }
  func.func @transform_7(%arg0: i32) -> (i32, i32) {
    %c0_i32 = arith.constant 0 : i32
    %c0_i32_0 = arith.constant 0 : i32
    %c0_i32_1 = arith.constant 0 : i32
    return %c0_i32, %c0_i32_0 : i32, i32
  }
  func.func @transform_8(%arg0: i32) -> (i32, i32) {
    %c0_i32 = arith.constant 0 : i32
    %c0_i32_0 = arith.constant 0 : i32
    %c0_i32_1 = arith.constant 0 : i32
    return %c0_i32, %c0_i32_0 : i32, i32
  }
  func.func @transform_9(%arg0: i32) -> (i32, i32, i32) {
    %c0_i32 = arith.constant 0 : i32
    %c0_i32_0 = arith.constant 0 : i32
    %c0_i32_1 = arith.constant 0 : i32
    return %arg0, %c0_i32, %c0_i32_0 : i32, i32, i32
  }
}

module attributes {stable_mosaic.version = 11 : i64} {
  func.func @kernel(%arg0: i32, %arg1: memref<4x16x48xf32, #tpu.memory_space<vmem>>, %arg2: memref<96x64xbf16, #tpu.memory_space<vmem>>, %arg3: memref<48x128xbf16, #tpu.memory_space<vmem>>, %arg4: memref<1280x128xbf16, #tpu.memory_space<vmem>>, %arg5: memref<1x128xf32, #tpu.memory_space<vmem>>, %arg6: memref<128x128xf32, #tpu.memory_space<vmem>>, %arg7: memref<128x128xf32, #tpu.memory_space<vmem>>, %arg8: memref<128x48xbf16, #tpu.memory_space<vmem>>, %arg9: memref<1x48xf32, #tpu.memory_space<vmem>>, %arg10: memref<4x8x48xf32, #tpu.memory_space<vmem>>) attributes {dimension_semantics = [#tpu.dimension_semantics<parallel>], iteration_bounds = array<i64: 2>, scalar_prefetch = 0 : i64, scratch_operands = 0 : i64, tpu.core_type = #tpu.core_type<tc>, window_params = [{transform_indices = @transform_0, window_bounds = array<i64: 4, 16, 48>}, {pipeline_mode = #tpu.pipeline_mode<synchronous>, transform_indices = @transform_1, window_bounds = array<i64: 96, 64>}, {pipeline_mode = #tpu.pipeline_mode<synchronous>, transform_indices = @transform_2, window_bounds = array<i64: 48, 128>}, {pipeline_mode = #tpu.pipeline_mode<synchronous>, transform_indices = @transform_3, window_bounds = array<i64: 1280, 128>}, {pipeline_mode = #tpu.pipeline_mode<synchronous>, transform_indices = @transform_4, window_bounds = array<i64: 1, 128>}, {pipeline_mode = #tpu.pipeline_mode<synchronous>, transform_indices = @transform_5, window_bounds = array<i64: 128, 128>}, {pipeline_mode = #tpu.pipeline_mode<synchronous>, transform_indices = @transform_6, window_bounds = array<i64: 128, 128>}, {pipeline_mode = #tpu.pipeline_mode<synchronous>, transform_indices = @transform_7, window_bounds = array<i64: 128, 48>}, {pipeline_mode = #tpu.pipeline_mode<synchronous>, transform_indices = @transform_8, window_bounds = array<i64: 1, 48>}, {transform_indices = @transform_9, window_bounds = array<i64: 4, 8, 48>}]} {
    %c0 = arith.constant 0 : index
    %c0_0 = arith.constant 0 : index
    %c0_1 = arith.constant 0 : index
    %0 = vector.load %arg1[%c0, %c0_0, %c0_1] : memref<4x16x48xf32, #tpu.memory_space<vmem>>, vector<4x16x48xf32>
    %1 = vector.shape_cast %0 : vector<4x16x48xf32> to vector<64x48xf32>
    %2 = arith.truncf %1 : vector<64x48xf32> to vector<64x48xbf16>
    %c0_2 = arith.constant 0 : index
    %c0_3 = arith.constant 0 : index
    %3 = vector.load %arg3[%c0_2, %c0_3] : memref<48x128xbf16, #tpu.memory_space<vmem>>, vector<48x128xbf16>
    %cst = arith.constant dense<0.000000e+00> : vector<64x128xf32>
    %4 = tpu.matmul %2, %3, %cst {dimension_numbers = #tpu.dot_dimension_numbers<[1], [0], [0], [1], [0, 0, 1, 1], [], []>} : vector<64x48xbf16>, vector<48x128xbf16>, vector<64x128xf32> -> vector<64x128xf32>
    %c0_4 = arith.constant 0 : index
    %c0_5 = arith.constant 0 : index
    %5 = vector.load %arg2[%c0_4, %c0_5] : memref<96x64xbf16, #tpu.memory_space<vmem>>, vector<96x64xbf16>
    %6 = arith.truncf %4 : vector<64x128xf32> to vector<64x128xbf16>
    %cst_6 = arith.constant dense<0.000000e+00> : vector<96x128xf32>
    %7 = tpu.matmul %5, %6, %cst_6 {dimension_numbers = #tpu.dot_dimension_numbers<[1], [0], [0], [1], [0, 0, 1, 1], [], []>} : vector<96x64xbf16>, vector<64x128xbf16>, vector<96x128xf32> -> vector<96x128xf32>
    %8 = vector.shape_cast %7 : vector<96x128xf32> to vector<4x24x128xf32>
    %9 = vector.extract_strided_slice %8 {offsets = [0, 0, 0], sizes = [4, 8, 128], strides = [1, 1, 1]} : vector<4x24x128xf32> to vector<4x8x128xf32>
    %10 = vector.extract_strided_slice %8 {offsets = [0, 12, 0], sizes = [4, 8, 128], strides = [1, 1, 1]} : vector<4x24x128xf32> to vector<4x8x128xf32>
    %11 = vector.extract_strided_slice %8 {offsets = [0, 1, 0], sizes = [4, 8, 128], strides = [1, 1, 1]} : vector<4x24x128xf32> to vector<4x8x128xf32>
    %12 = vector.extract_strided_slice %8 {offsets = [0, 13, 0], sizes = [4, 8, 128], strides = [1, 1, 1]} : vector<4x24x128xf32> to vector<4x8x128xf32>
    %13 = vector.extract_strided_slice %8 {offsets = [0, 2, 0], sizes = [4, 8, 128], strides = [1, 1, 1]} : vector<4x24x128xf32> to vector<4x8x128xf32>
    %14 = vector.extract_strided_slice %8 {offsets = [0, 14, 0], sizes = [4, 8, 128], strides = [1, 1, 1]} : vector<4x24x128xf32> to vector<4x8x128xf32>
    %15 = vector.extract_strided_slice %8 {offsets = [0, 3, 0], sizes = [4, 8, 128], strides = [1, 1, 1]} : vector<4x24x128xf32> to vector<4x8x128xf32>
    %16 = vector.extract_strided_slice %8 {offsets = [0, 15, 0], sizes = [4, 8, 128], strides = [1, 1, 1]} : vector<4x24x128xf32> to vector<4x8x128xf32>
    %17 = vector.extract_strided_slice %8 {offsets = [0, 4, 0], sizes = [4, 8, 128], strides = [1, 1, 1]} : vector<4x24x128xf32> to vector<4x8x128xf32>
    %18 = vector.extract_strided_slice %8 {offsets = [0, 16, 0], sizes = [4, 8, 128], strides = [1, 1, 1]} : vector<4x24x128xf32> to vector<4x8x128xf32>
    %19 = tpu.concatenate %9, %10, %11, %12, %13, %14, %15, %16, %17, %18 in 2 : vector<4x8x128xf32>, vector<4x8x128xf32>, vector<4x8x128xf32>, vector<4x8x128xf32>, vector<4x8x128xf32>, vector<4x8x128xf32>, vector<4x8x128xf32>, vector<4x8x128xf32>, vector<4x8x128xf32>, vector<4x8x128xf32> -> vector<4x8x1280xf32>
    %20 = vector.shape_cast %19 : vector<4x8x1280xf32> to vector<32x1280xf32>
    %21 = arith.truncf %20 : vector<32x1280xf32> to vector<32x1280xbf16>
    %c0_7 = arith.constant 0 : index
    %c0_8 = arith.constant 0 : index
    %22 = vector.load %arg4[%c0_7, %c0_8] : memref<1280x128xbf16, #tpu.memory_space<vmem>>, vector<1280x128xbf16>
    %cst_9 = arith.constant dense<0.000000e+00> : vector<32x128xf32>
    %23 = tpu.matmul %21, %22, %cst_9 {dimension_numbers = #tpu.dot_dimension_numbers<[1], [0], [0], [1], [0, 0, 1, 1], [], []>} : vector<32x1280xbf16>, vector<1280x128xbf16>, vector<32x128xf32> -> vector<32x128xf32>
    %c0_10 = arith.constant 0 : index
    %c0_11 = arith.constant 0 : index
    %24 = vector.load %arg5[%c0_10, %c0_11] : memref<1x128xf32, #tpu.memory_space<vmem>>, vector<1x128xf32>
    %25 = vector.broadcast %24 : vector<1x128xf32> to vector<32x128xf32>
    %26 = arith.addf %23, %25 : vector<32x128xf32>
    %c0_12 = arith.constant 0 : index
    %c0_13 = arith.constant 0 : index
    %27 = vector.load %arg6[%c0_12, %c0_13] : memref<128x128xf32, #tpu.memory_space<vmem>>, vector<128x128xf32>
    %cst_14 = arith.constant dense<0.000000e+00> : vector<32x128xf32>
    %28 = tpu.matmul %26, %27, %cst_14 {dimension_numbers = #tpu.dot_dimension_numbers<[1], [0], [0], [1], [0, 0, 1, 1], [], []>} : vector<32x128xf32>, vector<128x128xf32>, vector<32x128xf32> -> vector<32x128xf32>
    %c0_15 = arith.constant 0 : index
    %c0_16 = arith.constant 0 : index
    %29 = vector.load %arg7[%c0_15, %c0_16] : memref<128x128xf32, #tpu.memory_space<vmem>>, vector<128x128xf32>
    %cst_17 = arith.constant dense<0.000000e+00> : vector<32x128xf32>
    %30 = tpu.matmul %28, %29, %cst_17 {dimension_numbers = #tpu.dot_dimension_numbers<[1], [0], [0], [1], [0, 0, 1, 1], [], []>} : vector<32x128xf32>, vector<128x128xf32>, vector<32x128xf32> -> vector<32x128xf32>
    %31 = arith.subf %26, %30 : vector<32x128xf32>
    %32 = arith.mulf %31, %31 : vector<32x128xf32>
    %c0_18 = arith.constant 0 : index
    %c0_19 = arith.constant 0 : index
    %33 = vector.load %arg6[%c0_18, %c0_19] : memref<128x128xf32, #tpu.memory_space<vmem>>, vector<128x128xf32>
    %cst_20 = arith.constant dense<0.000000e+00> : vector<32x128xf32>
    %34 = tpu.matmul %32, %33, %cst_20 {dimension_numbers = #tpu.dot_dimension_numbers<[1], [0], [0], [1], [0, 0, 1, 1], [], []>} : vector<32x128xf32>, vector<128x128xf32>, vector<32x128xf32> -> vector<32x128xf32>
    %cst_21 = arith.constant 9.99999974E-6 : f32
    %35 = vector.broadcast %cst_21 : f32 to vector<32x128xf32>
    %36 = arith.addf %34, %35 : vector<32x128xf32>
    %37 = math.rsqrt %36 : vector<32x128xf32>
    %c0_22 = arith.constant 0 : index
    %c0_23 = arith.constant 0 : index
    %38 = vector.load %arg7[%c0_22, %c0_23] : memref<128x128xf32, #tpu.memory_space<vmem>>, vector<128x128xf32>
    %cst_24 = arith.constant dense<0.000000e+00> : vector<32x128xf32>
    %39 = tpu.matmul %37, %38, %cst_24 {dimension_numbers = #tpu.dot_dimension_numbers<[1], [0], [0], [1], [0, 0, 1, 1], [], []>} : vector<32x128xf32>, vector<128x128xf32>, vector<32x128xf32> -> vector<32x128xf32>
    %40 = arith.mulf %31, %39 : vector<32x128xf32>
    %41 = arith.truncf %40 : vector<32x128xf32> to vector<32x128xbf16>
    %c0_25 = arith.constant 0 : index
    %c0_26 = arith.constant 0 : index
    %42 = vector.load %arg8[%c0_25, %c0_26] : memref<128x48xbf16, #tpu.memory_space<vmem>>, vector<128x48xbf16>
    %cst_27 = arith.constant dense<0.000000e+00> : vector<32x48xf32>
    %43 = tpu.matmul %41, %42, %cst_27 {dimension_numbers = #tpu.dot_dimension_numbers<[1], [0], [0], [1], [0, 0, 1, 1], [], []>} : vector<32x128xbf16>, vector<128x48xbf16>, vector<32x48xf32> -> vector<32x48xf32>
    %c0_28 = arith.constant 0 : index
    %c0_29 = arith.constant 0 : index
    %44 = vector.load %arg9[%c0_28, %c0_29] : memref<1x48xf32, #tpu.memory_space<vmem>>, vector<1x48xf32>
    %45 = vector.broadcast %44 : vector<1x48xf32> to vector<32x48xf32>
    %46 = arith.addf %43, %45 : vector<32x48xf32>
    %47 = vector.shape_cast %46 : vector<32x48xf32> to vector<4x8x48xf32>
    %c0_30 = arith.constant 0 : index
    %c0_31 = arith.constant 0 : index
    %c0_32 = arith.constant 0 : index
    %48 = vector.load %arg10[%c0_30, %c0_31, %c0_32] : memref<4x8x48xf32, #tpu.memory_space<vmem>>, vector<4x8x48xf32>
    tpu.vector_store %arg10[%c0_30, %c0_31, %c0_32], %47 {strides = array<i32>} : memref<4x8x48xf32, #tpu.memory_space<vmem>>, vector<4x8x48xf32>,
    return
  }
  func.func @transform_0(%arg0: i32) -> (i32, i32, i32) {
    %c0_i32 = arith.constant 0 : i32
    %c0_i32_0 = arith.constant 0 : i32
    %c0_i32_1 = arith.constant 0 : i32
    return %arg0, %c0_i32, %c0_i32_0 : i32, i32, i32
  }
  func.func @transform_1(%arg0: i32) -> (i32, i32) {
    %c0_i32 = arith.constant 0 : i32
    %c0_i32_0 = arith.constant 0 : i32
    %c0_i32_1 = arith.constant 0 : i32
    return %c0_i32, %c0_i32_0 : i32, i32
  }
  func.func @transform_2(%arg0: i32) -> (i32, i32) {
    %c0_i32 = arith.constant 0 : i32
    %c0_i32_0 = arith.constant 0 : i32
    %c0_i32_1 = arith.constant 0 : i32
    return %c0_i32, %c0_i32_0 : i32, i32
  }
  func.func @transform_3(%arg0: i32) -> (i32, i32) {
    %c0_i32 = arith.constant 0 : i32
    %c0_i32_0 = arith.constant 0 : i32
    %c0_i32_1 = arith.constant 0 : i32
    return %c0_i32, %c0_i32_0 : i32, i32
  }
  func.func @transform_4(%arg0: i32) -> (i32, i32) {
    %c0_i32 = arith.constant 0 : i32
    %c0_i32_0 = arith.constant 0 : i32
    %c0_i32_1 = arith.constant 0 : i32
    return %c0_i32, %c0_i32_0 : i32, i32
  }
  func.func @transform_5(%arg0: i32) -> (i32, i32) {
    %c0_i32 = arith.constant 0 : i32
    %c0_i32_0 = arith.constant 0 : i32
    %c0_i32_1 = arith.constant 0 : i32
    return %c0_i32, %c0_i32_0 : i32, i32
  }
  func.func @transform_6(%arg0: i32) -> (i32, i32) {
    %c0_i32 = arith.constant 0 : i32
    %c0_i32_0 = arith.constant 0 : i32
    %c0_i32_1 = arith.constant 0 : i32
    return %c0_i32, %c0_i32_0 : i32, i32
  }
  func.func @transform_7(%arg0: i32) -> (i32, i32) {
    %c0_i32 = arith.constant 0 : i32
    %c0_i32_0 = arith.constant 0 : i32
    %c0_i32_1 = arith.constant 0 : i32
    return %c0_i32, %c0_i32_0 : i32, i32
  }
  func.func @transform_8(%arg0: i32) -> (i32, i32) {
    %c0_i32 = arith.constant 0 : i32
    %c0_i32_0 = arith.constant 0 : i32
    %c0_i32_1 = arith.constant 0 : i32
    return %c0_i32, %c0_i32_0 : i32, i32
  }
  func.func @transform_9(%arg0: i32) -> (i32, i32, i32) {
    %c0_i32 = arith.constant 0 : i32
    %c0_i32_0 = arith.constant 0 : i32
    %c0_i32_1 = arith.constant 0 : i32
    return %arg0, %c0_i32, %c0_i32_0 : i32, i32, i32
  }
}

</mosaic_0001>

<bundles_post_ra>
// kernel: wt_patch_merging.1
= control target key start
LH: loop header
LB: loop body
LE: loop exit
PB: predicated region body
PF: predicated region fallthrough
CT: control target
= control target key end

     0   :  { %s4550_s0 = inlined_call_operand.hbm [shape: f32[8,16,48], index: 0, kind: input, shape index: {}]   ;;  %s4551_s1 = inlined_call_operand.hbm [shape: bf16[96,64], index: 1, kind: input, shape index: {}]   ;;  %s4552_s2 = inlined_call_operand.hbm [shape: bf16[48,128], index: 2, kind: input, shape index: {}]   ;;  %s4553_s3 = inlined_call_operand.hbm [shape: bf16[1280,128], index: 3, kind: input, shape index: {}]   ;;  %s4554_s4 = inlined_call_operand.hbm [shape: f32[1,128], index: 4, kind: input, shape index: {}]   ;;  %s4555_s5 = inlined_call_operand.hbm [shape: f32[128,128], index: 5, kind: input, shape index: {}]   ;;  %s4556_s6 = inlined_call_operand.hbm [shape: f32[128,128], index: 6, kind: input, shape index: {}]   ;;  %s4557_s7 = inlined_call_operand.hbm [shape: bf16[128,48], index: 7, kind: input, shape index: {}]   ;;  %s4558_s8 = inlined_call_operand.hbm [shape: f32[1,48], index: 8, kind: input, shape index: {}]   ;;  %s4559_s9 = inlined_call_operand.hbm [shape: f32[8,8,48], index: 9, kind: output, shape index: {}]  }
   0x1   :  { %4570 = sst [smem:[#allocation24_spill]] %s4551_s1 }
   0x2   :  { %4571 = sst [smem:[#allocation25_spill]] %s4553_s3 }
   0x3   :  { %4572 = sst [smem:[#allocation26_spill]] %s4559_s9 }
   0x4   :  { %14 = vsyncpa [#allocation3], 0 }
   0x5   :  { %16 = vsyncpa [#allocation3 + $0x1], 0 }
   0x6   :  { %17 = vsyncpa [#allocation6], 0 }
   0x7   :  { %18 = vsyncpa [#allocation9], 0 }
   0x8   :  { %19 = vsyncpa [#allocation12], 0 }
   0x9   :  { %20 = vsyncpa [#allocation15], 0 }
   0xa   :  { %21 = vsyncpa [#allocation4], 0 }
   0xb   :  { %23 = vsyncpa [#allocation4 + $0x1], 0  ;;  %s3825_s30 = smov 0   ;;  %s3827_s10 = smov 0  }
   0xc   :  { %s3829_s11 = smov 0   ;;  %s3831_s12 = smov 0  }
   0xd LB: > { %s3759_s13 = smov [#allocation5]   ;;  %s3846_s15 = sadd.s32 4294967295, %s3757_s12   ;;  %s3757_s12 = sphi %s3831_s12, %s4603_s12   ;;  %s3753_s11 = sphi %s3829_s11, %s4602_s11   ;;  %s3749_s10 = sphi %s3827_s10, %s4601_s10   ;;  %s3745_s30 = sphi %s3825_s30, %s4600_s30  }
   0xe   : > { %s266_s14 = sshll.u32 %s3759_s13, 4  ;;  %p2460_p0 = scmp.ge.s32.totalorder %s3757_s12, 1  ;;  %s3851_s14 = int_to_ptr.vmem [resolvable:$true] %s266_s14 }
   0xf   : > { %p4565_p1 = scmp.eq.s32.totalorder %s3846_s15, 0  ;;  %p254_p2 = scmp.lt.s32.totalorder %s3757_s12, 3 }
  0x10   : > { %s3760_s17 = smov [#allocation8]   ;;  %s3761_s20 = smov [#allocation11]  }
  0x11   : > { %p3853_p3 = pnand %p2460_p0, %p254_p2  ;;  %s292_s18 = sshll.u32 %s3760_s17, 4  ;;  %s3866_s18 = int_to_ptr.vmem [resolvable:$true] %s292_s18 }
  0x12   : > { %s316_s21 = sshll.u32 %s3761_s20, 4  ;;  %s4575_s1 = sld [smem:[#allocation24_spill]]  ;;  %s3868_s21 = int_to_ptr.vmem [resolvable:$true] %s316_s21 }
  0x13   : > { %s4573_s16 = scalar_select %p3853_p3, 1, 0 }
  0x14   : > { %p3219_p5 = pneg %p3853_p3 }
  0x16   : > { %p3862_p6 = pnand %p3219_p5, %p4565_p1 }
  0x18   : > { %s3421_s24 = scalar_lea.hbm %s4575_s1, 768  ;;  %p3878_p8 = pneg %p3862_p6 }
  0x19   : > { %p3422_p7 = scmp.ne.s32.totalorder %s4575_s1, %s3421_s24  ;;  %p3428_p11 = scmp.lt.u32.totalorder %s3421_s24, %s4575_s1 }
  0x1b   : > { %p3424_p9 = pnand %p3878_p8, %p3422_p7 }
  0x1d   : > { %p3425_p10 = pneg %p3424_p9 }
  0x1f   : > { %p3430_p12 = pnand %p3428_p11, %p3425_p10 }
  0x21   : > { %3433 = shalt.err (!%p3430_p12)
}
  0x22   : > { %s3434_s13 = scalar_lea.vmem %s3851_s14, 768  ;;  %p3442_p5 = scmp.lt.s32.totalorder %s3851_s14, %s3851_s14 }
  0x23   : > { %p3435_p13 = scmp.ne.s32.totalorder %s3851_s14, %s3434_s13  ;;  %p3443_p4 = scmp.lt.s32.totalorder %s3434_s13, %s3434_s13 }
  0x25   : > { %p3437_p0 = pnand %p3435_p13, %p3878_p8  ;;  %p3444_p7 = por %p3443_p4, %p3442_p5 }
  0x27   : > { %p3438_p2 = pneg %p3437_p0 }
  0x29   : > { %p3445_p9 = pnand %p3444_p7, %p3438_p2 }
  0x2b   : > { %3448 = shalt.err (!%p3445_p9)
}
  0x2c   : > { %s4561_s17 = smov 64   ;;  %s4563_s20 = smov 4  }
  0x2d   : > { %3222 = dma.hbm_to_vmem [thread:$0]  (!%p3862_p6), %s4575_s1, 768, %s3851_s14, [#allocation6], %s4561_s17, %s4561_s17, %s4563_s20  }
  0x2e   : > { %s4577_s3 = sld [smem:[#allocation25_spill]] }
  0x34   : > { %s3449_s26 = scalar_lea.hbm %s4577_s3, 10240 }
  0x35   : > { %p3450_p4 = scmp.ne.s32.totalorder %s4577_s3, %s3449_s26  ;;  %p3456_p12 = scmp.lt.u32.totalorder %s3449_s26, %s4577_s3 }
  0x37   : > { %p3452_p10 = pnand %p3450_p4, %p3878_p8 }
  0x39   : > { %p3453_p11 = pneg %p3452_p10 }
  0x3b   : > { %p3458_p13 = pnand %p3456_p12, %p3453_p11 }
  0x3d   : > { %3461 = shalt.err (!%p3458_p13)
}
  0x3e   : > { %s3462_s14 = scalar_lea.vmem %s3866_s18, 10240  ;;  %p3470_p7 = scmp.lt.s32.totalorder %s3866_s18, %s3866_s18 }
  0x3f   : > { %p3463_p0 = scmp.ne.s32.totalorder %s3866_s18, %s3462_s14  ;;  %p3471_p9 = scmp.lt.s32.totalorder %s3462_s14, %s3462_s14 }
  0x41   : > { %p3465_p2 = pnand %p3463_p0, %p3878_p8  ;;  %p3472_p4 = por %p3471_p9, %p3470_p7 }
  0x43   : > { %p3466_p5 = pneg %p3465_p2 }
  0x45   : > { %p3473_p10 = pnand %p3472_p4, %p3466_p5 }
  0x47   : > { %3476 = shalt.err (!%p3473_p10)
}
  0x48   : > { %3228 = dma.hbm_to_vmem [thread:$0]  (!%p3862_p6), %s4577_s3, 10240, %s3866_s18, [#allocation9], %s4561_s17, %s4561_s17, %s4563_s20  }
  0x49   : > { %s3477_s25 = scalar_lea.hbm %s4555_s5, 2048 }
  0x4a   : > { %p3478_p11 = scmp.ne.s32.totalorder %s4555_s5, %s3477_s25  ;;  %p3484_p0 = scmp.lt.u32.totalorder %s3477_s25, %s4555_s5 }
  0x4c   : > { %p3480_p12 = pnand %p3478_p11, %p3878_p8 }
  0x4e   : > { %p3481_p13 = pneg %p3480_p12 }
  0x50   : > { %p3486_p2 = pnand %p3484_p0, %p3481_p13 }
  0x52   : > { %3489 = shalt.err (!%p3486_p2)
}
  0x53   : > { %s3490_s18 = scalar_lea.vmem %s3868_s21, 2048  ;;  %p3498_p4 = scmp.lt.s32.totalorder %s3868_s21, %s3868_s21 }
  0x54   : > { %p3491_p5 = scmp.ne.s32.totalorder %s3868_s21, %s3490_s18  ;;  %p3499_p10 = scmp.lt.s32.totalorder %s3490_s18, %s3490_s18 }
  0x56   : > { %p3493_p7 = pnand %p3491_p5, %p3878_p8  ;;  %p3500_p11 = por %p3499_p10, %p3498_p4 }
  0x58   : > { %p3494_p9 = pneg %p3493_p7 }
  0x5a   : > { %p3501_p12 = pnand %p3500_p11, %p3494_p9 }
  0x5c   : > { %3504 = shalt.err (!%p3501_p12)
}
  0x5d   : > { %s4567_s14 = smov 128   ;;  %s3765_s9 = smov 8  }
  0x5e   : > { %3234 = dma.hbm_to_vmem [thread:$0]  (!%p3862_p6), %s4555_s5, 2048, %s3868_s21, [#allocation12], %s4567_s14, %s4567_s14, %s3765_s9  }
  0x5f   : > { %s3766_s24 = smov [#allocation14]   ;;  %s3767_s26 = smov [#allocation7]  }
  0x60   : > { %s342_s25 = sshll.u32 %s3766_s24, 4  ;;  %s279_s28 = sshll.u32 %s3767_s26, 4  ;;  %s343_s25 = int_to_ptr.vmem [resolvable:$true] %s342_s25  ;;  %s280_s28 = int_to_ptr.vmem [resolvable:$true] %s279_s28 }
  0x61   : > { %s3505_s18 = scalar_lea.hbm %s4557_s7, 1024 }
  0x62   : > { %p3506_p13 = scmp.ne.s32.totalorder %s4557_s7, %s3505_s18  ;;  %p3512_p5 = scmp.lt.u32.totalorder %s3505_s18, %s4557_s7 }
  0x64   : > { %p3508_p0 = pnand %p3506_p13, %p3878_p8 }
  0x66   : > { %p3509_p2 = pneg %p3508_p0 }
  0x68   : > { %p3514_p7 = pnand %p3512_p5, %p3509_p2 }
  0x6a   : > { %3517 = shalt.err (!%p3514_p7)
}
  0x6b   : > { %s3518_s21 = scalar_lea.vmem %s343_s25, 1024  ;;  %p3526_p11 = scmp.lt.s32.totalorder %s343_s25, %s343_s25 }
  0x6c   : > { %p3519_p9 = scmp.ne.s32.totalorder %s343_s25, %s3518_s21  ;;  %p3527_p12 = scmp.lt.s32.totalorder %s3518_s21, %s3518_s21 }
  0x6e   : > { %p3521_p4 = pnand %p3519_p9, %p3878_p8  ;;  %p3528_p1 = por %p3527_p12, %p3526_p11 }
  0x70   : > { %p3522_p10 = pneg %p3521_p4 }
  0x72   : > { %p3529_p3 = pnand %p3528_p1, %p3522_p10 }
  0x74   : > { %3532 = shalt.err (!%p3529_p3)
}
  0x75   : > { %s4578_s17 = smov 4   ;;  %s4579_s20 = smov 64  }
  0x76   : > { %3240 = dma.hbm_to_vmem [thread:$0]  (!%p3862_p6), %s4557_s7, 1024, %s343_s25, [#allocation15], %s4579_s20, %s4579_s20, %s4578_s17  }
  0x77   : > { %s3533_s24 = scalar_lea.hbm %s4552_s2, 384 }
  0x78   : > { %p3534_p1 = scmp.ne.s32.totalorder %s4552_s2, %s3533_s24  ;;  %p3540_p0 = scmp.lt.u32.totalorder %s3533_s24, %s4552_s2 }
  0x7a   : > { %p3536_p3 = pnand %p3534_p1, %p3878_p8 }
  0x7c   : > { %p3537_p13 = pneg %p3536_p3 }
  0x7e   : > { %p3542_p2 = pnand %p3540_p0, %p3537_p13 }
  0x80   : > { %3545 = shalt.err (!%p3542_p2)
}
  0x81   : > { %s3546_s21 = scalar_lea.vmem %s280_s28, 384  ;;  %p3554_p4 = scmp.lt.s32.totalorder %s280_s28, %s280_s28 }
  0x82   : > { %p3547_p5 = scmp.ne.s32.totalorder %s280_s28, %s3546_s21  ;;  %p3555_p10 = scmp.lt.s32.totalorder %s3546_s21, %s3546_s21 }
  0x84   : > { %p3549_p7 = pnand %p3547_p5, %p3878_p8  ;;  %p3556_p11 = por %p3555_p10, %p3554_p4 }
  0x86   : > { %p3550_p9 = pneg %p3549_p7 }
  0x88   : > { %p3557_p12 = pnand %p3556_p11, %p3550_p9 }
  0x8a   : > { %3560 = shalt.err (!%p3557_p12)
}
  0x8b   : > { %3225 = dma.hbm_to_vmem [thread:$0]  (!%p3862_p6), %s4552_s2, 384, %s280_s28, [#allocation6], %s4579_s20, %s4579_s20, %s4578_s17  }
  0x8c   : > { %s3768_s3 = smov [#allocation10]   ;;  %s3769_s23 = smov [#allocation13]  }
  0x8d   : > { %s306_s22 = sshll.u32 %s3768_s3, 4  ;;  %s329_s24 = sshll.u32 %s3769_s23, 4  ;;  %s307_s22 = int_to_ptr.vmem [resolvable:$true] %s306_s22  ;;  %s330_s24 = int_to_ptr.vmem [resolvable:$true] %s329_s24 }
  0x8e   : > { %s3561_s13 = scalar_lea.hbm %s4554_s4, 16 }
  0x8f   : > { %p3562_p1 = scmp.ne.s32.totalorder %s4554_s4, %s3561_s13  ;;  %p3568_p0 = scmp.lt.u32.totalorder %s3561_s13, %s4554_s4 }
  0x91   : > { %p3564_p3 = pnand %p3562_p1, %p3878_p8 }
  0x93   : > { %p3565_p13 = pneg %p3564_p3 }
  0x95   : > { %p3570_p2 = pnand %p3568_p0, %p3565_p13 }
  0x97   : > { %3573 = shalt.err (!%p3570_p2)
}
  0x98   : > { %s3574_s28 = scalar_lea.vmem %s307_s22, 16  ;;  %s3581_s17 = scalar_lea.vmem %s307_s22, 32 }
  0x99   : > { %p3575_p5 = scmp.ne.s32.totalorder %s307_s22, %s3574_s28  ;;  %p3582_p4 = scmp.lt.s32.totalorder %s307_s22, %s307_s22 }
  0x9a   : > { %p3583_p10 = scmp.lt.s32.totalorder %s3581_s17, %s3574_s28 }
  0x9b   : > { %p3577_p7 = pnand %p3575_p5, %p3878_p8 }
  0x9c   : > { %p3584_p11 = por %p3583_p10, %p3582_p4 }
  0x9d   : > { %p3578_p9 = pneg %p3577_p7 }
  0x9f   : > { %p3585_p12 = pnand %p3584_p11, %p3578_p9 }
  0xa1   : > { %3588 = shalt.err (!%p3585_p12)
}
  0xa2   : > { %3231 = dma.hbm_to_vmem [thread:$0]  (!%p3862_p6), %s4554_s4, 16, %s307_s22, [#allocation9]  }
  0xa3   : > { %s3589_s23 = scalar_lea.hbm %s4556_s6, 2048 }
  0xa4   : > { %p3590_p1 = scmp.ne.s32.totalorder %s4556_s6, %s3589_s23  ;;  %p3596_p0 = scmp.lt.u32.totalorder %s3589_s23, %s4556_s6 }
  0xa6   : > { %p3592_p3 = pnand %p3590_p1, %p3878_p8 }
  0xa8   : > { %p3593_p13 = pneg %p3592_p3 }
  0xaa   : > { %p3598_p2 = pnand %p3596_p0, %p3593_p13 }
  0xac   : > { %3601 = shalt.err (!%p3598_p2)
}
  0xad   : > { %s3602_s21 = scalar_lea.vmem %s330_s24, 2048  ;;  %p3610_p4 = scmp.lt.s32.totalorder %s330_s24, %s330_s24 }
  0xae   : > { %p3603_p5 = scmp.ne.s32.totalorder %s330_s24, %s3602_s21  ;;  %p3611_p10 = scmp.lt.s32.totalorder %s3602_s21, %s3602_s21 }
  0xb0   : > { %p3605_p7 = pnand %p3603_p5, %p3878_p8  ;;  %p3612_p11 = por %p3611_p10, %p3610_p4 }
  0xb2   : > { %p3606_p9 = pneg %p3605_p7 }
  0xb4   : > { %p3613_p12 = pnand %p3612_p11, %p3606_p9 }
  0xb6   : > { %3616 = shalt.err (!%p3613_p12)
}
  0xb7   : > { %s4580_s22 = smov 128   ;;  %s3770_s17 = smov [#allocation16]  }
  0xb8   : > { %3237 = dma.hbm_to_vmem [thread:$0]  (!%p3862_p6), %s4556_s6, 2048, %s330_s24, [#allocation12], %s4580_s22, %s4580_s22, %s3765_s9  }
  0xb9   : > { %s356_s20 = sshll.u32 %s3770_s17, 4  ;;  %s3617_s3 = scalar_lea.hbm %s4558_s8, 16  ;;  %s357_s20 = int_to_ptr.vmem [resolvable:$true] %s356_s20 }
  0xba   : > { %p3618_p1 = scmp.ne.s32.totalorder %s4558_s8, %s3617_s3  ;;  %p3624_p0 = scmp.lt.u32.totalorder %s3617_s3, %s4558_s8 }
  0xbc   : > { %p3620_p3 = pnand %p3618_p1, %p3878_p8 }
  0xbe   : > { %p3621_p13 = pneg %p3620_p3 }
  0xc0   : > { %p3626_p2 = pnand %p3624_p0, %p3621_p13 }
  0xc2   : > { %3629 = shalt.err (!%p3626_p2)
}
  0xc3   : > { %s3630_s24 = scalar_lea.vmem %s357_s20, 16  ;;  %s3637_s18 = scalar_lea.vmem %s357_s20, 32 }
  0xc4   : > { %p3631_p5 = scmp.ne.s32.totalorder %s357_s20, %s3630_s24  ;;  %p3638_p4 = scmp.lt.s32.totalorder %s357_s20, %s357_s20 }
  0xc5   : > { %p3639_p10 = scmp.lt.s32.totalorder %s3637_s18, %s3630_s24 }
  0xc6   : > { %p3633_p7 = pnand %p3631_p5, %p3878_p8 }
  0xc7   : > { %p3640_p11 = por %p3639_p10, %p3638_p4 }
  0xc8   : > { %p3634_p9 = pneg %p3633_p7 }
  0xca   : > { %p3641_p12 = pnand %p3640_p11, %p3634_p9 }
  0xcc   : > { %3644 = shalt.err (!%p3641_p12)
}
  0xcd   : > { %3243 = dma.hbm_to_vmem [thread:$0]  (!%p3862_p6), %s4558_s8, 16, %s357_s20, [#allocation15]  }
  0xce   : > { %s2459_s27 = sadd.s32 4294967294, %s3757_s12   ;;  %s4055_s19 = sadd.s32 1, %s3757_s12  }
  0xcf   : > { %s33_s28 = ssub.s32 %s3757_s12, %s4055_s19  ;;  %s36_s17 = sadd.s32 1, %s3753_s11 }
  0xd0   : > { %p34_p8 = scmp.eq.s32.totalorder %s33_s28, 0  ;;  %p43_p1 = scmp.ne.s32.totalorder %s3753_s11, %s3749_s10 }
  0xd1   : > { %p44_p3 = scmp.eq.s32.totalorder %s3757_s12, 0  ;;  %p49_p13 = scmp.ne.s32.totalorder %s3749_s10, %s3745_s30 }
  0xd2   : > { %s4066_s1 = scalar_select %p34_p8, %s3753_s11, %s36_s17  }
  0xd3   : > { %p4068_p0 = por %p44_p3, %p43_p1  ;;  %p4582_p2 = scmp.eq.s32.totalorder %s3846_s15, 0 }
  0xd4   : > { %p241_p5 = scmp.eq.s32.totalorder %s3846_s15, 1  ;;  %p247_p7 = scmp.eq.s32.totalorder %s2459_s27, 1 }
  0xd5   : > { %p4074_p6 = por %p4582_p2, %p49_p13  ;;  %p3260_p9 = scmp.lt.s32.totalorder %s3757_s12, 2 }
  0xd6   : > { %s367_s3 = sand.u32 1, %s3753_s11   ;;  %p4081_p4 = por %p241_p5, %p43_p1 }
  0xd7   : > { %p4085_p10 = por %p247_p7, %p49_p13  ;;  %s2470_s29 = sshll.u32 %s367_s3, 6 }
  0xd8   : > { %s4584_s23 = scalar_select %p4081_p4, 1, 0 }
  0xd9   : > { %s4585_s26 = scalar_select %p4085_p10, 1, 0 }
  0xda   : > { %s2600_s13 = sshll.u32 %s3757_s12, 10  ;;  %s371_s25 = scalar_lea.vmem [#allocation2], %s2470_s29 }
  0xdb   : > { %s4093_s21 = scalar_lea.hbm %s4550_s0, %s2600_s13  ;;  %s379_s27 = sshll.u32 %s371_s25, 4  ;;  %s4095_s27 = int_to_ptr.vmem [resolvable:$true] %s379_s27 }
  0xdc   : > { %p4099_p11 = pnand %p3260_p9, %p4068_p0  ;;  %s4103_s17 = scalar_lea.sflag [#allocation3], %s367_s3 }
  0xdd   : > { %s3645_s24 = scalar_lea.hbm %s4093_s21, 1024  ;;  %s3650_s14 = scalar_lea.hbm %s4550_s0, 2048 }
  0xde   : > { %p3646_p12 = scmp.ne.s32.totalorder %s4093_s21, %s3645_s24  ;;  %p3647_p8 = pneg %p4099_p11 }
  0xdf   : > { %p3651_p13 = scmp.lt.u32.totalorder %s4093_s21, %s4550_s0  ;;  %p3652_p0 = scmp.lt.u32.totalorder %s3650_s14, %s3645_s24 }
  0xe0   : > { %p3648_p1 = pnand %p3647_p8, %p3646_p12  ;;  %p3654_p5 = scmp.lt.u32.totalorder %s3645_s24, %s4093_s21 }
  0xe1   : > { %p3653_p2 = por %p3652_p0, %p3651_p13 }
  0xe2   : > { %p3649_p3 = pneg %p3648_p1 }
  0xe3   : > { %p3655_p7 = por %p3654_p5, %p3653_p2 }
  0xe5   : > { %p3656_p9 = pnand %p3655_p7, %p3649_p3 }
  0xe7   : > { %3659 = shalt.err (!%p3656_p9)
}
  0xe8   : > { %s3660_s3 = scalar_lea.vmem %s4095_s27, 1024  ;;  %s3771_s29 = smov [#allocation2]  }
  0xe9   : > { %p3661_p12 = scmp.ne.s32.totalorder %s4095_s27, %s3660_s3  ;;  %s3665_s13 = sshll.u32 %s3771_s29, 4  ;;  %s3666_s13 = int_to_ptr.vmem [resolvable:$false] %s3665_s13 }
  0xea   : > { %s3667_s18 = scalar_lea.vmem %s3666_s13, 2048  ;;  %p3668_p4 = scmp.lt.s32.totalorder %s4095_s27, %s3666_s13 }
  0xeb   : > { %p3663_p1 = pnand %p3661_p12, %p3647_p8  ;;  %p3669_p13 = scmp.lt.s32.totalorder %s3667_s18, %s3660_s3 }
  0xed   : > { %p3664_p10 = pneg %p3663_p1  ;;  %p3670_p0 = por %p3669_p13, %p3668_p4 }
  0xef   : > { %p3671_p2 = pnand %p3670_p0, %p3664_p10 }
  0xf1   : > { %3674 = shalt.err (!%p3671_p2)
}
  0xf2   : > { %3247 = dma.hbm_to_vmem [thread:$0]  (!%p4099_p11), %s4093_s21, 1024, %s4095_s27, %s4103_s17, %s4580_s22, %s4580_s22, %s3765_s9  }
  0xf3   : > { %p4587_p8 = scmp.ne.s32.totalorder %s4573_s16, 0 }
  0xf4   : > { %s4137_s24 = sand.u32 (!%p4587_p8), 1, %s3749_s10  }
  0xf5   : > { %391 = sbr.rel (%p4587_p8) target bundleno = 2141 (0x85d), region = 56  ;;  %s2475_s14 = sshll.u32 (!%p4587_p8), %s4137_s24, 6 }
  0xf6   : > { %s394_s25 = scalar_lea.sflag (!%p4587_p8), [#allocation3], %s4137_s24  ;;  %s4141_s3 = scalar_lea.vmem (!%p4587_p8), [#allocation2], %s2475_s14 }
  0xfc   : > { %3720 = dma.done.wait (%p4074_p6), %s394_s25, 1024  }
  0xfd   : > { %3722 = vsyncadd (%p4074_p6), %s394_s25, 4294966272  ;;  %p4588_p4 = scmp.eq.s32.totalorder %s3846_s15, 0 }
  0xff   : > { %3724 = dma.done.wait (%p4588_p4), [#allocation6], 1152   ;;  %p4589_p10 = pmov %p4588_p4 }
 0x100   : > { %p4590_p11 = pmov %p4588_p4 }
 0x101   : > { %3726 = vsyncadd (%p4589_p10), [#allocation6], 4294966144 }
 0x102   : > { %3728 = dma.done.wait (%p4590_p11), [#allocation9], 10256   ;;  %p4591_p3 = pmov %p4588_p4 }
 0x104   : > { %3730 = vsyncadd (%p4591_p3), [#allocation9], 4294957040  ;;  %p4592_p5 = pmov %p4591_p3 }
 0x105   : > { %p4593_p7 = pmov %p4591_p3 }
 0x106   : > { %3732 = dma.done.wait (%p4592_p5), [#allocation12], 4096  }
 0x107   : > { %3734 = vsyncadd (%p4593_p7), [#allocation12], 4294963200  ;;  %p4594_p6 = pmov %p4591_p3 }
 0x108   : > { %p4595_p9 = pmov %p4591_p3 }
 0x109   : > { %3736 = dma.done.wait (%p4594_p6), [#allocation15], 1040  }
 0x10a   : > { %3738 = vsyncadd (%p4595_p9), [#allocation15], 4294966256  ;;  %v3316_v0 = vld [vmem:[#allocation7] sm:$0xff]   ;;  %v3317_v1 = vld [vmem:[#allocation7 + $0x8] sm:$0xff]   ;;  %vm503_vm0 = vcmask 392192   ;;  %vm627_vm1 = vcmask 523264  }
 0x10b   : > { %2849 = vmatprep.subr.bf16.mxu0 %v3316_v0  ;;  %v467_v2 = vld [vmem:[%s4141_s3] sm:$0xff]  ;;  %v468_v3 = vld [vmem:[%s4141_s3 + $0x8] sm:$0xff]  ;;  %v469_v6 = vld [vmem:[%s4141_s3 + $0x10] sm:$0xff]  ;;  %vm735_vm2 = vcmask 1043456   ;;  %vm773_vm3 = vcmask 1042432   ;;  %vm756_vm4 = vcmask 1046528  }
 0x10c   : > { %2850 = vmatpush3.bf16.msra.mxu0 %v3316_v0  ;;  %v3318_v4 = vld [vmem:[#allocation7 + $0x10] sm:$0xff]   ;;  %v475_v5 = vpack.c.bf16 %v468_v3, %v467_v2  ;;  %v470_v7 = vld [vmem:[%s4141_s3 + $0x18] sm:$0xff]  ;;  %v472_v9 = vld [vmem:[%s4141_s3 + $0x28] sm:$0xff]  ;;  %vm807_vm5 = vcmask 1041408   ;;  %vm841_vm6 = vcmask 1040384   ;;  %vm790_vm7 = vcmask 1045504  }
 0x10d   : > { %2851 = vmatprep.subr.bf16.mxu0 %v3317_v1  ;;  %v471_v8 = vld [vmem:[%s4141_s3 + $0x20] sm:$0xff]  ;;  %v476_v10 = vpack.c.bf16 %v470_v7, %v469_v6  ;;  %v473_v12 = vld [vmem:[%s4141_s3 + $0x30] sm:$0xff]  ;;  %v474_v13 = vld [vmem:[%s4141_s3 + $0x38] sm:$0xff]  ;;  %vm824_vm8 = vcmask 1044480   ;;  %s2484_s16 = sshll.u32 %s4137_s24, 5  ;;  %s2601_s20 = sshll.u32 %s3846_s15, 9 }
 0x10e   : > { %2855 = vmatprep.mubr.msk.bf16.mxu0 %vm503_vm0, %v475_v5  ;;  %v477_v11 = vpack.c.bf16 %v472_v9, %v471_v8  ;;  %v478_v14 = vpack.c.bf16 %v474_v13, %v473_v12  ;;  %v3319_v15 = vld [vmem:[#allocation5] sm:$0xff]   ;;  %v3325_v16 = vld [vmem:[#allocation8 + $0x40] sm:$0xff]   ;;  %v3329_v18 = vld [vmem:[#allocation8 + $0x48] sm:$0xff]   ;;  %s463_s9 = scalar_lea.vmem [#allocation17], %s2484_s16  ;;  %s4596_s28 = sld [smem:[#allocation26_spill]] }
 0x10f   : > { %2871 = vmatprep.mubr.msk.bf16.mxu1 %vm627_vm1, %v3319_v15  ;;  %v3327_v17 = vld [vmem:[#allocation8] sm:$0xff]   ;;  %v3331_v19 = vld [vmem:[#allocation8 + $0x8] sm:$0xff]   ;;  %v3333_v20 = vld [vmem:[#allocation8 + $0x50] sm:$0xff]   ;;  %s2310_s22 = sshll.u32 %s463_s9, 4  ;;  %s2297_s15 = scalar_lea.sflag [#allocation4], %s4137_s24  ;;  %s4497_s22 = int_to_ptr.vmem [resolvable:$true] %s2310_s22 }
 0x110   : > { %2852 = vmatpush3.bf16.msra.mxu0 %v3317_v1  ;;  %v3335_v21 = vld [vmem:[#allocation8 + $0x10] sm:$0xff]   ;;  %v3337_v22 = vld [vmem:[#allocation8 + $0x58] sm:$0xff]   ;;  %v3326_v36 = vld [vmem:[#allocation8 + $0xc0] sm:$0xff]   ;;  %s3675_s29 = scalar_lea.vmem %s4497_s22, 512  ;;  %p4597_p1 = scmp.ne.s32.totalorder %s4584_s23, 0 }
 0x111   : > { %2853 = vmatprep.subr.bf16.mxu0 %v3318_v4  ;;  %v3339_v23 = vld [vmem:[#allocation8 + $0x18] sm:$0xff]   ;;  %v3320_v37 = vld [vmem:[#allocation5 + $0x8] sm:$0xff]   ;;  %v3321_v38 = vld [vmem:[#allocation5 + $0x10] sm:$0xff]   ;;  %p3676_p12 = scmp.ne.s32.totalorder %s4497_s22, %s3675_s29  ;;  %s3772_s13 = smov [#allocation17]  }
 0x112   : > { %v3328_v39 = vld [vmem:[#allocation8 + $0x80] sm:$0xff]   ;;  %v3330_v40 = vld [vmem:[#allocation8 + $0xc8] sm:$0xff]   ;;  %v3334_v42 = vld [vmem:[#allocation8 + $0xd0] sm:$0xff]   ;;  %s3679_s18 = sshll.u32 %s3772_s13, 4  ;;  %s3680_s18 = int_to_ptr.vmem [resolvable:$false] %s3679_s18 }
 0x113   : > { %v3332_v41 = vld [vmem:[#allocation8 + $0x88] sm:$0xff]   ;;  %v3322_v43 = vld [vmem:[#allocation5 + $0x18] sm:$0xff]   ;;  %v3323_v44 = vld [vmem:[#allocation5 + $0x20] sm:$0xff]   ;;  %p3677_p13 = pnand %p3676_p12, %p4597_p1  ;;  %s3681_s14 = scalar_lea.vmem %s3680_s18, 1024 }
 0x114   : > { %2854 = vmatpush3.bf16.msra.mxu0 %v3318_v4  ;;  %v3336_v45 = vld [vmem:[#allocation8 + $0x90] sm:$0xff]   ;;  %v3338_v46 = vld [vmem:[#allocation8 + $0xd8] sm:$0xff]   ;;  %v3324_v48 = vld [vmem:[#allocation5 + $0x28] sm:$0xff]   ;;  %s4503_s17 = scalar_lea.hbm %s4596_s28, %s2601_s20  ;;  %p3682_p2 = scmp.lt.s32.totalorder %s4497_s22, %s3680_s18 }
 0x115   : > { %2619 = vmatprep.subr.bf16.mxu0 %v3325_v16  ;;  %v3340_v47 = vld [vmem:[#allocation8 + $0x98] sm:$0xff]   ;;  %v3341_v49 = vld [vmem:[#allocation8 + $0x60] sm:$0xff]   ;;  %v3345_v53 = vld [vmem:[#allocation8 + $0x68] sm:$0xff]   ;;  %p3678_p0 = pneg %p3677_p13  ;;  %p3683_p8 = scmp.lt.s32.totalorder %s3681_s14, %s3675_s29 }
 0x116   : > { %v3342_v50 = vld [vmem:[#allocation8 + $0xe0] sm:$0xff]   ;;  %v3346_v54 = vld [vmem:[#allocation8 + $0xe8] sm:$0xff]   ;;  %v3349_v57 = vld [vmem:[#allocation8 + $0x70] sm:$0xff]  }
 0x117   : > { %2856 = vmatmul.mubr.msk.bf16.vlgmr.msra.gmra.mrb[0].mxu0 %vm503_vm0, %v476_v10  ;;  %v3343_v51 = vld [vmem:[#allocation8 + $0x20] sm:$0xff]   ;;  %v3347_v55 = vld [vmem:[#allocation8 + $0x28] sm:$0xff]   ;;  %v3350_v58 = vld [vmem:[#allocation8 + $0xf0] sm:$0xff]   ;;  %p3684_p4 = por %p3683_p8, %p3682_p2 }
 0x118   : > { %2859 = vmatprep.mubr.msk.bf16.mxu0 %vm503_vm0, %v477_v11  ;;  %2620 = vmatpush3.bf16.msra.mxu0 %v3327_v17  ;;  %v3344_v52 = vld [vmem:[#allocation8 + $0xa0] sm:$0xff]   ;;  %v3348_v56 = vld [vmem:[#allocation8 + $0xa8] sm:$0xff]   ;;  %v3351_v59 = vld [vmem:[#allocation8 + $0x30] sm:$0xff]  }
 0x119   : > { %2621 = vmatprep.subr.bf16.mxu0 %v3329_v18  ;;  %v3352_v60 = vld [vmem:[#allocation8 + $0xb0] sm:$0xff]   ;;  %v3353_v61 = vld [vmem:[#allocation8 + $0x78] sm:$0xff]   ;;  %v3357_v1 = vld [vmem:[#allocation8 + $0x140] sm:$0xff]   ;;  %p3685_p10 = pnand %p3684_p4, %p3678_p0 }
 0x11a   : > { %v3354_v62 = vld [vmem:[#allocation8 + $0xf8] sm:$0xff]   ;;  %v3358_v2 = vld [vmem:[#allocation8 + $0x1c0] sm:$0xff]  }
 0x11b   : > { %v3355_v63 = vld [vmem:[#allocation8 + $0x38] sm:$0xff]  }
 0x11c   : > { %2622 = vmatpush3.bf16.msra.mxu0 %v3331_v19  ;;  %v3356_v0 = vld [vmem:[#allocation8 + $0xb8] sm:$0xff]  }
 0x11d   : > { %2623 = vmatprep.subr.bf16.mxu0 %v3333_v20 }
 0x11f   : > { %2860 = vmatmul.mubr.msk.bf16.gmra.mrb[4].mxu0 %vm503_vm0, %v478_v14 }
 0x120   : > { %2624 = vmatpush3.bf16.msra.mxu0 %v3335_v21 }
 0x121   : > { %2625 = vmatprep.subr.bf16.mxu0 %v3337_v22 }
 0x124   : > { %2626 = vmatpush3.bf16.msra.mxu0 %v3339_v23 }
 0x125   : > { %2627 = vmatprep.subr.bf16.mxu0 %v3341_v49 }
 0x128   : > { %2628 = vmatpush3.bf16.msra.mxu0 %v3343_v51 }
 0x129   : > { %2629 = vmatprep.subr.bf16.mxu0 %v3345_v53 }
 0x12c   : > { %2630 = vmatpush3.bf16.msra.mxu0 %v3347_v55 }
 0x12d   : > { %2631 = vmatprep.subr.bf16.mxu0 %v3349_v57 }
 0x130   : > { %2632 = vmatpush3.bf16.msra.mxu0 %v3351_v59 }
 0x131   : > { %2633 = vmatprep.subr.bf16.mxu0 %v3353_v61 }
 0x134   : > { %2634 = vmatpush3.bf16.msra.mxu0 %v3355_v63  ;;  %v3360_v63 = vld [vmem:[#allocation8 + $0x180] sm:$0xff]  }
 0x135   : > { %2675 = vmatprep.subr.bf16.mxu0 %v3357_v1 }
 0x1ea   : > { %v2857_v24 = vpop.f32.mrb[0].mxu0 }
 0x1eb   : > { %v550_v25 = vpop.f32.mrb[1].mxu0 }
 0x1ec   : > { %v2858_v26 = vpop.f32.mrb[2].mxu0 }
 0x1ed   : > { %v594_v27 = vpack.c.bf16 %v2858_v26, %v2857_v24  ;;  %v553_v28 = vpop.f32.mrb[3].mxu0 }
 0x1ee   : > { %v593_v29 = vpack.c.bf16 %v553_v28, %v550_v25 }
 0x1f0   : > { %2863 = vmatprep.subr.bf16.mxu1 %v593_v29 }
 0x1f1   : > { %2864 = vmatpush3.bf16.msra.mxu1 %v593_v29 }
 0x1f2   : > { %v2861_v30 = vpop.f32.mrb[4].mxu0  ;;  %2865 = vmatprep.subr.bf16.mxu1 %v594_v27 }
 0x1f3   : > { %v566_v31 = vpop.f32.mrb[5].mxu0 }
 0x1f4   : > { %v2862_v32 = vpop.f32.mrb[6].mxu0 }
 0x1f5   : > { %v596_v33 = vpack.c.bf16 %v2862_v32, %v2861_v30  ;;  %v569_v34 = vpop.f32.mrb[7].mxu0  ;;  %2866 = vmatpush3.bf16.msra.mxu1 %v594_v27 }
 0x1f6   : > { %v595_v35 = vpack.c.bf16 %v569_v34, %v566_v31 }
 0x1f8   : > { %2867 = vmatprep.subr.bf16.mxu1 %v595_v35 }
 0x1f9   : > { %2868 = vmatpush3.bf16.msra.mxu1 %v595_v35 }
 0x1fa   : > { %2869 = vmatprep.subr.bf16.mxu1 %v596_v33 }
 0x1fd   : > { %2870 = vmatpush3.bf16.msra.mxu1 %v596_v33 }
 0x1fe   : > { %2647 = vmatprep.subr.bf16.mxu1 %v3326_v36 }
 0x200   : > { %2872 = vmatmul.mubr.msk.bf16.vlgmr.msra.gmra.mrb[0].mxu1 %vm627_vm1, %v3320_v37 }
 0x201   : > { %2875 = vmatprep.mubr.msk.bf16.mxu1 %vm627_vm1, %v3321_v38  ;;  %2648 = vmatpush3.bf16.msra.mxu1 %v3328_v39 }
 0x202   : > { %2649 = vmatprep.subr.bf16.mxu1 %v3330_v40 }
 0x205   : > { %2650 = vmatpush3.bf16.msra.mxu1 %v3332_v41 }
 0x206   : > { %2651 = vmatprep.subr.bf16.mxu1 %v3334_v42 }
 0x208   : > { %2876 = vmatmul.mubr.msk.bf16.gmra.mrb[4].mxu1 %vm627_vm1, %v3322_v43 }
 0x209   : > { %2879 = vmatprep.mubr.msk.bf16.mxu1 %vm627_vm1, %v3323_v44  ;;  %2652 = vmatpush3.bf16.msra.mxu1 %v3336_v45 }
 0x20a   : > { %2653 = vmatprep.subr.bf16.mxu1 %v3338_v46 }
 0x20d   : > { %2654 = vmatpush3.bf16.msra.mxu1 %v3340_v47 }
 0x20e   : > { %2655 = vmatprep.subr.bf16.mxu1 %v3342_v50 }
 0x210   : > { %2880 = vmatmul.mubr.msk.bf16.gmra.mrb[8].mxu1 %vm627_vm1, %v3324_v48 }
 0x211   : > { %2656 = vmatpush3.bf16.msra.mxu1 %v3344_v52 }
 0x212   : > { %2657 = vmatprep.subr.bf16.mxu1 %v3346_v54 }
 0x215   : > { %2658 = vmatpush3.bf16.msra.mxu1 %v3348_v56 }
 0x216   : > { %2659 = vmatprep.subr.bf16.mxu1 %v3350_v58 }
 0x219   : > { %2660 = vmatpush3.bf16.msra.mxu1 %v3352_v60 }
 0x21a   : > { %2661 = vmatprep.subr.bf16.mxu1 %v3354_v62  ;;  %v3359_v62 = vld [vmem:[#allocation8 + $0x100] sm:$0xff]  }
 0x21d   : > { %2662 = vmatpush3.bf16.msra.mxu1 %v3356_v0 }
 0x21e   : > { %2703 = vmatprep.subr.bf16.mxu1 %v3358_v2 }
 0x2d3   : > { %v4181_v3 = vpop.f32.mrb[0].mxu1 }
 0x2d4   : > { %v4183_v4 = vpop.f32.mrb[1].mxu1  ;;  %v737_v5 = vrot.slane %v4181_v3, 4  ;;  %v775_v6 = vrot.slane %v4181_v3, 5  ;;  %v809_v7 = vrot.slane %v4181_v3, 6  ;;  %v843_v9 = vrot.slane %v4181_v3, 7 }
 0x2d5   : > { %v4188_v8 = vpop.f32.mrb[2].mxu1  ;;  %v757_v10 = vrot.slane %v4183_v4, 1  ;;  %v791_v11 = vrot.slane %v4183_v4, 2  ;;  %v825_v12 = vrot.slane %v4183_v4, 3  ;;  %v858_v22 = vrot.slane %v4183_v4, 4 }
 0x2d6   : > { %v683_v13 = vpop.f32.mrb[3].mxu1  ;;  %v870_v14 = vpack.c.bf16 %v4188_v8, %v4183_v4  ;;  %v760_v30 = vrot.slane %v4188_v8, 1  ;;  %v794_v33 = vrot.slane %v4188_v8, 2  ;;  %v828_v34 = vrot.slane %v4188_v8, 3 }
 0x2d7   : > { %v758_v15 = vrot.slane %v683_v13, 1  ;;  %v792_v16 = vrot.slane %v683_v13, 2  ;;  %v826_v17 = vrot.slane %v683_v13, 3  ;;  %v736_v18 = vrot.slane %v683_v13, 4 }
 0x2d8   : > { %v774_v19 = vrot.slane %v683_v13, 5  ;;  %v808_v20 = vrot.slane %v683_v13, 6  ;;  %v842_v21 = vrot.slane %v683_v13, 7 }
 0x2d9   : > { %v759_v23 = vsel %vm756_vm4, %v757_v10, %v758_v15  ;;  %v4199_v24 = vsel %vm790_vm7, %v791_v11, %v792_v16  ;;  %v4202_v25 = vsel %vm824_vm8, %v825_v12, %v826_v17  ;;  %v738_v26 = vsel %vm735_vm2, %v736_v18, %v737_v5  ;;  %v3361_v5 = vld [vmem:[#allocation8 + $0x148] sm:$0xff]  }
 0x2da   : > { %v776_v27 = vsel %vm773_vm3, %v774_v19, %v775_v6  ;;  %v4207_v28 = vsel %vm807_vm5, %v808_v20, %v809_v7  ;;  %v4210_v29 = vsel %vm841_vm6, %v842_v21, %v843_v9  ;;  %v4216_v32 = vsel %vm735_vm2, %v858_v22, %v736_v18  ;;  %v3362_v6 = vld [vmem:[#allocation8 + $0x1c8] sm:$0xff]  }
 0x2db   : > { %v4213_v31 = vpop.f32.mrb[4].mxu1  ;;  %v3363_v22 = vld [vmem:[#allocation8 + $0x108] sm:$0xff]  }
 0x2dc   : > { %v763_v35 = vrot.slane %v4213_v31, 1  ;;  %v797_v36 = vrot.slane %v4213_v31, 2  ;;  %v4222_v37 = vpop.f32.mrb[5].mxu1  ;;  %v831_v38 = vrot.slane %v4213_v31, 3 }
 0x2dd   : > { %v761_v39 = vrot.slane %v4222_v37, 1  ;;  %v795_v40 = vrot.slane %v4222_v37, 2  ;;  %v829_v41 = vrot.slane %v4222_v37, 3  ;;  %v4228_v42 = vpop.f32.mrb[6].mxu1  ;;  %v739_v44 = vrot.slane %v4222_v37, 4 }
 0x2de   : > { %v4230_v43 = vpop.f32.mrb[7].mxu1  ;;  %v777_v45 = vrot.slane %v4222_v37, 5  ;;  %v742_v46 = vrot.slane %v4228_v42, 4  ;;  %v764_v47 = vrot.slane %v4228_v42, 1  ;;  %v811_v54 = vrot.slane %v4222_v37, 6 }
 0x2df   : > { %v740_v48 = vrot.slane %v4230_v43, 4  ;;  %v778_v49 = vrot.slane %v4230_v43, 5  ;;  %v812_v50 = vrot.slane %v4230_v43, 6  ;;  %v846_v51 = vrot.slane %v4230_v43, 7 }
 0x2e0   : > { %v762_v52 = vsel %vm756_vm4, %v760_v30, %v761_v39  ;;  %v4242_v53 = vsel %vm756_vm4, %v763_v35, %v764_v47  ;;  %v845_v55 = vrot.slane %v4222_v37, 7  ;;  %v4251_v59 = vsel %vm790_vm7, %v794_v33, %v795_v40  ;;  %v3364_v35 = vld [vmem:[#allocation8 + $0x188] sm:$0xff]   ;;  %v3375_v37 = vld [vmem:[#allocation8 + $0x120] sm:$0xff]  }
 0x2e1   : > { %v741_v56 = vsel %vm735_vm2, %v739_v44, %v740_v48  ;;  %v779_v57 = vsel %vm773_vm3, %v777_v45, %v778_v49  ;;  %v872_v58 = vpack.c.bf16 %v762_v52, %v759_v23  ;;  %v4254_v0 = vsel %vm807_vm5, %v811_v54, %v812_v50  ;;  %v3365_v49 = vld [vmem:[#allocation8 + $0x150] sm:$0xff]  }
 0x2e2   : > { %v871_v60 = vpack.c.bf16 %v741_v56, %v738_v26  ;;  %v873_v61 = vpack.c.bf16 %v779_v57, %v776_v27  ;;  %v4257_v1 = vsel %vm841_vm6, %v845_v55, %v846_v51  ;;  %v875_v7 = vpack.c.bf16 %v4254_v0, %v4207_v28  ;;  %v3366_v50 = vld [vmem:[#allocation8 + $0x1d0] sm:$0xff]  }
 0x2e3   : > { %v4259_v2 = vpop.f32.mrb[8].mxu1  ;;  %v877_v9 = vpack.c.bf16 %v4257_v1, %v4210_v29  ;;  %v874_v10 = vpack.c.bf16 %v4251_v59, %v4199_v24  ;;  %v4268_v11 = vsel %vm824_vm8, %v828_v34, %v829_v41  ;;  %v780_v15 = vrot.slane %v4228_v42, 5  ;;  %v3367_v57 = vld [vmem:[#allocation8 + $0x110] sm:$0xff]   ;;  %v3396_v24 = vld [vmem:[#allocation8 + $0x218] sm:$0xff]   ;;  %v3398_v59 = vld [vmem:[#allocation8 + $0x220] sm:$0xff]  }
 0x2e4   : > { %v4270_v12 = vpop.f32.mrb[9].mxu1  ;;  %1569 = vmatprep.mubr.bf16.mxu0 %v871_v60  ;;  %1618 = vmatprep.mubr.bf16.mxu1 %v873_v61  ;;  %v745_v13 = vrot.slane %v4259_v2, 4  ;;  %v783_v16 = vrot.slane %v4259_v2, 5  ;;  %v876_v17 = vpack.c.bf16 %v4268_v11, %v4202_v25  ;;  %v767_v23 = vrot.slane %v4259_v2, 1  ;;  %v3397_v25 = vld [vmem:[#allocation8 + $0x260] sm:$0xff]   ;;  %v3400_v11 = vld [vmem:[#allocation8 + $0x228] sm:$0xff]  }
 0x2e5   : > { %v743_v18 = vrot.slane %v4270_v12, 4  ;;  %v781_v19 = vrot.slane %v4270_v12, 5  ;;  %v815_v20 = vrot.slane %v4270_v12, 6  ;;  %v4280_v21 = vpop.f32.mrb[10].mxu1  ;;  %1570 = vmatmul.mubr.bf16.vlgmr.msra.gmra.mrb[8].mxu0 %v870_v14  ;;  %1619 = vmatmul.mubr.bf16.vlgmr.msra.gmra.mrb[12].mxu1 %v872_v58  ;;  %v849_v26 = vrot.slane %v4270_v12, 7  ;;  %v3368_v58 = vld [vmem:[#allocation8 + $0x190] sm:$0xff]  }
 0x2e6   : > { %v746_v27 = vrot.slane %v4280_v21, 4  ;;  %v784_v30 = vrot.slane %v4280_v21, 5  ;;  %v818_v33 = vrot.slane %v4280_v21, 6  ;;  %2676 = vmatpush3.bf16.msra.mxu0 %v3359_v62  ;;  %2704 = vmatpush3.bf16.msra.mxu1 %v3360_v63  ;;  %v4290_v34 = vpop.f32.mrb[11].mxu1  ;;  %v852_v4 = vrot.slane %v4280_v21, 7 }
 0x2e7   : > { %v766_v14 = vrot.slane %v4290_v34, 1  ;;  %v800_v39 = vrot.slane %v4290_v34, 2  ;;  %v834_v40 = vrot.slane %v4290_v34, 3  ;;  %2677 = vmatprep.subr.bf16.mxu0 %v3361_v5  ;;  %2705 = vmatprep.subr.bf16.mxu1 %v3362_v6  ;;  %v744_v41 = vsel %vm735_vm2, %v742_v46, %v743_v18 }
 0x2e8   : > { %v747_v45 = vsel %vm735_vm2, %v745_v13, %v746_v27  ;;  %v782_v47 = vsel %vm773_vm3, %v780_v15, %v781_v19  ;;  %v785_v48 = vsel %vm773_vm3, %v783_v16, %v784_v30  ;;  %v880_v54 = vpack.c.bf16 %v4290_v34, %v4213_v31  ;;  %v3370_v16 = vld [vmem:[#allocation8 + $0x1d8] sm:$0xff]  }
 0x2e9   : > { %v881_v51 = vpack.c.bf16 %v747_v45, %v744_v41  ;;  %v883_v52 = vpack.c.bf16 %v785_v48, %v782_v47  ;;  %v768_v55 = vsel %vm756_vm4, %v766_v14, %v767_v23  ;;  %v814_v60 = vrot.slane %v4228_v42, 6  ;;  %v3372_v14 = vld [vmem:[#allocation8 + $0x198] sm:$0xff]   ;;  %v3374_v45 = vld [vmem:[#allocation8 + $0x1e0] sm:$0xff]   ;;  %v3384_v48 = vld [vmem:[#allocation8 + $0x1b0] sm:$0xff]  }
 0x2ea   : > { %2678 = vmatpush3.bf16.msra.mxu0 %v3363_v22  ;;  %2706 = vmatpush3.bf16.msra.mxu1 %v3364_v35  ;;  %v882_v56 = vpack.c.bf16 %v768_v55, %v4242_v53  ;;  %v817_v61 = vrot.slane %v4259_v2, 6  ;;  %v848_v62 = vrot.slane %v4228_v42, 7  ;;  %v851_v63 = vrot.slane %v4259_v2, 7  ;;  %v3369_v53 = vld [vmem:[#allocation8 + $0x158] sm:$0xff]   ;;  %v3390_v55 = vld [vmem:[#allocation8 + $0x200] sm:$0xff]  }
 0x2eb   : > { %1577 = vmatprep.mubr.bf16.mxu0 %v881_v51  ;;  %1626 = vmatprep.mubr.bf16.mxu1 %v883_v52  ;;  %v798_v5 = vrot.slane %v4228_v42, 2  ;;  %v801_v6 = vrot.slane %v4259_v2, 2  ;;  %v832_v15 = vrot.slane %v4228_v42, 3  ;;  %v4316_v18 = vsel %vm807_vm5, %v814_v60, %v815_v20  ;;  %v3379_v42 = vld [vmem:[#allocation8 + $0x128] sm:$0xff]   ;;  %v3387_v51 = vld [vmem:[#allocation8 + $0x138] sm:$0xff]   ;;  %v3394_v60 = vld [vmem:[#allocation8 + $0x210] sm:$0xff]  }
 0x2ec   : > { %2679 = vmatprep.subr.bf16.mxu0 %v3365_v49  ;;  %2707 = vmatprep.subr.bf16.mxu1 %v3366_v50  ;;  %v4319_v19 = vsel %vm807_vm5, %v817_v61, %v818_v33  ;;  %v4322_v22 = vsel %vm841_vm6, %v848_v62, %v849_v26  ;;  %v835_v23 = vrot.slane %v4259_v2, 3  ;;  %v864_v27 = vrot.slane %v4290_v34, 4  ;;  %v3371_v33 = vld [vmem:[#allocation8 + $0x118] sm:$0xff]   ;;  %v3381_v2 = vld [vmem:[#allocation8 + $0x170] sm:$0xff]  }
 0x2ed   : > { %1578 = vmatmul.mubr.bf16.gmra.mrb[12].mxu0 %v880_v54  ;;  %1627 = vmatmul.mubr.bf16.gmra.mrb[16].mxu1 %v882_v56  ;;  %v885_v30 = vpack.c.bf16 %v4319_v19, %v4316_v18  ;;  %v4329_v35 = vsel %vm841_vm6, %v851_v63, %v852_v4  ;;  %v4334_v20 = vsel %vm790_vm7, %v797_v36, %v798_v5  ;;  %v860_v26 = vrot.slane %v4188_v8, 4  ;;  %v3373_v8 = vld [vmem:[#allocation8 + $0x160] sm:$0xff]   ;;  %v3385_v49 = vld [vmem:[#allocation8 + $0x178] sm:$0xff]   ;;  %v3391_v56 = vld [vmem:[#allocation8 + $0x248] sm:$0xff]  }
 0x2ee   : > { %2680 = vmatpush3.bf16.msra.mxu0 %v3367_v57  ;;  %2708 = vmatpush3.bf16.msra.mxu1 %v3368_v58  ;;  %v887_v34 = vpack.c.bf16 %v4329_v35, %v4322_v22  ;;  %v4340_v41 = vsel %vm790_vm7, %v800_v39, %v801_v6  ;;  %v4345_v4 = vsel %vm824_vm8, %v831_v38, %v832_v15  ;;  %v862_v36 = vrot.slane %v4213_v31, 4  ;;  %v3386_v50 = vld [vmem:[#allocation8 + $0x1f8] sm:$0xff]   ;;  %v3389_v54 = vld [vmem:[#allocation8 + $0x240] sm:$0xff]   ;;  %v3392_v57 = vld [vmem:[#allocation8 + $0x208] sm:$0xff]  }
 0x2ef   : > { %1667 = vmatprep.mubr.bf16.mxu0 %v875_v7  ;;  %1716 = vmatprep.mubr.bf16.mxu1 %v877_v9  ;;  %v884_v39 = vpack.c.bf16 %v4340_v41, %v4334_v20  ;;  %v836_v47 = vsel %vm824_vm8, %v834_v40, %v835_v23  ;;  %v879_v38 = vpack.c.bf16 %v4230_v43, %v4181_v3  ;;  %v3376_v43 = vld [vmem:[#allocation8 + $0x1a0] sm:$0xff]   ;;  %v3377_v7 = vld [vmem:[#allocation8 + $0x168] sm:$0xff]   ;;  %v3383_v40 = vld [vmem:[#allocation8 + $0x130] sm:$0xff]  }
 0x2f0   : > { %2681 = vmatprep.subr.bf16.mxu0 %v3369_v53  ;;  %2709 = vmatprep.subr.bf16.mxu1 %v3370_v16  ;;  %v886_v31 = vpack.c.bf16 %v836_v47, %v4345_v4  ;;  %v4363_v28 = vsel %vm735_vm2, %v860_v26, %v739_v44  ;;  %v889_v29 = vpack.c.bf16 %v4280_v21, %v4270_v12  ;;  %v3378_v9 = vld [vmem:[#allocation8 + $0x1e8] sm:$0xff]   ;;  %v3388_v52 = vld [vmem:[#allocation8 + $0x1b8] sm:$0xff]   ;;  %v3393_v58 = vld [vmem:[#allocation8 + $0x250] sm:$0xff]  }
 0x2f1   : > { %v878_v0 = vpack.c.bf16 %v4363_v28, %v4216_v32  ;;  %v4372_v1 = vsel %vm735_vm2, %v862_v36, %v742_v46  ;;  %v4377_v3 = vsel %vm735_vm2, %v864_v27, %v745_v13  ;;  %v3380_v46 = vld [vmem:[#allocation8 + $0x1a8] sm:$0xff]   ;;  %v3382_v13 = vld [vmem:[#allocation8 + $0x1f0] sm:$0xff]   ;;  %v3395_v61 = vld [vmem:[#allocation8 + $0x258] sm:$0xff]  }
 0x2f2   : > { %2682 = vmatpush3.bf16.msra.mxu0 %v3371_v33  ;;  %2710 = vmatpush3.bf16.msra.mxu1 %v3372_v14  ;;  %v888_v44 = vpack.c.bf16 %v4377_v3, %v4372_v1  ;;  %v3402_v62 = vld [vmem:[#allocation8 + $0x230] sm:$0xff]   ;;  %v3403_v63 = vld [vmem:[#allocation8 + $0x278] sm:$0xff]   ;;  %v1782_v6 = vld [vmem:[#allocation11] sm:$0xff] }
 0x2f3   : > { %2683 = vmatprep.subr.bf16.mxu0 %v3373_v8  ;;  %2711 = vmatprep.subr.bf16.mxu1 %v3374_v45  ;;  %v3404_v5 = vld [vmem:[#allocation8 + $0x238] sm:$0xff]   ;;  %v1783_v15 = vld [vmem:[#allocation11 + $0x8] sm:$0xff]  ;;  %v1786_v32 = vld [vmem:[#allocation11 + $0x20] sm:$0xff] }
 0x2f4   : > { %v4399_v53 = vpack.c.bf16 %v1783_v15, %v1782_v6  ;;  %v1784_v16 = vld [vmem:[#allocation11 + $0x10] sm:$0xff]  ;;  %v1785_v18 = vld [vmem:[#allocation11 + $0x18] sm:$0xff]  ;;  %v1787_v22 = vld [vmem:[#allocation11 + $0x28] sm:$0xff] }
 0x2f5   : > { %v4403_v19 = vpack.c.bf16 %v1785_v18, %v1784_v16  ;;  %v4405_v12 = vpack.c.bf16 %v1787_v22, %v1786_v32  ;;  %v1788_v21 = vld [vmem:[#allocation11 + $0x30] sm:$0xff]  ;;  %v1789_v23 = vld [vmem:[#allocation11 + $0x38] sm:$0xff]  ;;  %v1791_v35 = vld [vmem:[#allocation11 + $0x48] sm:$0xff] }
 0x2f6   : > { %2684 = vmatpush3.bf16.msra.mxu0 %v3375_v37  ;;  %2712 = vmatpush3.bf16.msra.mxu1 %v3376_v43  ;;  %v4410_v27 = vpack.c.bf16 %v1789_v23, %v1788_v21  ;;  %v1792_v26 = vld [vmem:[#allocation11 + $0x50] sm:$0xff]  ;;  %v1793_v33 = vld [vmem:[#allocation11 + $0x58] sm:$0xff]  ;;  %v1795_v41 = vld [vmem:[#allocation11 + $0x68] sm:$0xff] }
 0x2f7   : > { %2685 = vmatprep.subr.bf16.mxu0 %v3377_v7  ;;  %2713 = vmatprep.subr.bf16.mxu1 %v3378_v9  ;;  %v4418_v14 = vpack.c.bf16 %v1793_v33, %v1792_v26  ;;  %v1796_v36 = vld [vmem:[#allocation11 + $0x70] sm:$0xff]  ;;  %v1797_v8 = vld [vmem:[#allocation11 + $0x78] sm:$0xff]  ;;  %v1884_v47 = vld [vmem:[#allocation13 + $0x8] sm:$0xff] }
 0x2f8   : > { %v4427_v45 = vpack.c.bf16 %v1797_v8, %v1796_v36  ;;  %v1886_v28 = vld [vmem:[#allocation13 + $0x18] sm:$0xff]  ;;  %v1888_v1 = vld [vmem:[#allocation13 + $0x28] sm:$0xff]  ;;  %v1889_v37 = vld [vmem:[#allocation13 + $0x30] sm:$0xff] }
 0x2f9   : > { %v1890_v43 = vld [vmem:[#allocation13 + $0x38] sm:$0xff]  ;;  %v1891_v7 = vld [vmem:[#allocation13 + $0x40] sm:$0xff]  ;;  %v1892_v9 = vld [vmem:[#allocation13 + $0x48] sm:$0xff] }
 0x2fa   : > { %2686 = vmatpush3.bf16.msra.mxu0 %v3379_v42  ;;  %2714 = vmatpush3.bf16.msra.mxu1 %v3380_v46  ;;  %v4447_v42 = vpack.c.bf16 %v1892_v9, %v1891_v7  ;;  %v1893_v46 = vld [vmem:[#allocation13 + $0x50] sm:$0xff] }
 0x2fb   : > { %2687 = vmatprep.subr.bf16.mxu0 %v3381_v2  ;;  %2715 = vmatprep.subr.bf16.mxu1 %v3382_v13  ;;  %v1894_v2 = vld [vmem:[#allocation13 + $0x58] sm:$0xff] }
 0x2fc   : > { %v4451_v13 = vpack.c.bf16 %v1894_v2, %v1893_v46 }
 0x2fe   : > { %2688 = vmatpush3.bf16.msra.mxu0 %v3383_v40  ;;  %2716 = vmatpush3.bf16.msra.mxu1 %v3384_v48  ;;  %v1895_v40 = vld [vmem:[#allocation13 + $0x60] sm:$0xff]  ;;  %v1896_v48 = vld [vmem:[#allocation13 + $0x68] sm:$0xff] }
 0x2ff   : > { %2689 = vmatprep.subr.bf16.mxu0 %v3385_v49  ;;  %2717 = vmatprep.subr.bf16.mxu1 %v3386_v50  ;;  %v4455_v49 = vpack.c.bf16 %v1896_v48, %v1895_v40  ;;  %v1897_v50 = vld [vmem:[#allocation13 + $0x70] sm:$0xff] }
 0x302   : > { %2690 = vmatpush3.bf16.msra.mxu0 %v3387_v51  ;;  %2718 = vmatpush3.bf16.msra.mxu1 %v3388_v52  ;;  %v1898_v51 = vld [vmem:[#allocation13 + $0x78] sm:$0xff] }
 0x303   : > { %2731 = vmatprep.subr.bf16.mxu0 %v3389_v54  ;;  %3056 = vmatprep.subr.bf16.mxu1 %v4399_v53  ;;  %v4459_v52 = vpack.c.bf16 %v1898_v51, %v1897_v50 }
 0x305   : > { %1668 = vmatmul.mubr.bf16.vlgmr.msra.gmra.mrb[16].mxu0 %v874_v10  ;;  %1717 = vmatmul.mubr.bf16.vlgmr.msra.gmra.mrb[20].mxu1 %v876_v17  ;;  %v3399_v10 = vld [vmem:[#allocation8 + $0x268] sm:$0xff]   ;;  %v3401_v17 = vld [vmem:[#allocation8 + $0x270] sm:$0xff]  }
 0x306   : > { %1675 = vmatprep.mubr.bf16.mxu0 %v885_v30  ;;  %1724 = vmatprep.mubr.bf16.mxu1 %v887_v34  ;;  %v1790_v30 = vld [vmem:[#allocation11 + $0x40] sm:$0xff] }
 0x307   : > { %2732 = vmatpush3.bf16.msra.mxu0 %v3390_v55  ;;  %3058 = vmatpush3.bf16.msra.mxu1 %v4399_v53  ;;  %v4414_v20 = vpack.c.bf16 %v1791_v35, %v1790_v30  ;;  %v1794_v34 = vld [vmem:[#allocation11 + $0x60] sm:$0xff] }
 0x308   : > { %2733 = vmatprep.subr.bf16.mxu0 %v3391_v56  ;;  %3060 = vmatprep.subr.bf16.mxu1 %v4403_v19  ;;  %v4422_v4 = vpack.c.bf16 %v1795_v41, %v1794_v34  ;;  %v2504_v56 = vld [vmem:[#allocation10] ss:$0 sm:$0xff] }
 0x30b   : > { %2734 = vmatpush3.bf16.msra.mxu0 %v3392_v57  ;;  %3062 = vmatpush3.bf16.msra.mxu1 %v4403_v19 }
 0x30c   : > { %2735 = vmatprep.subr.bf16.mxu0 %v3393_v58  ;;  %3064 = vmatprep.subr.bf16.mxu1 %v4405_v12 }
 0x30d   : > { %1676 = vmatmul.mubr.bf16.gmra.mrb[20].mxu0 %v884_v39  ;;  %1725 = vmatmul.mubr.bf16.gmra.mrb[24].mxu1 %v886_v31  ;;  %v1883_v39 = vld [vmem:[#allocation13] sm:$0xff] }
 0x30e   : > { %1765 = vmatprep.mubr.bf16.mxu0 %v879_v38  ;;  %v1885_v38 = vld [vmem:[#allocation13 + $0x10] sm:$0xff]  ;;  %v4432_v31 = vpack.c.bf16 %v1884_v47, %v1883_v39 }
 0x30f   : > { %2736 = vmatpush3.bf16.msra.mxu0 %v3394_v60  ;;  %3066 = vmatpush3.bf16.msra.mxu1 %v4405_v12 }
 0x310   : > { %2737 = vmatprep.subr.bf16.mxu0 %v3395_v61  ;;  %3068 = vmatprep.subr.bf16.mxu1 %v4410_v27 }
 0x313   : > { %2738 = vmatpush3.bf16.msra.mxu0 %v3396_v24  ;;  %3070 = vmatpush3.bf16.msra.mxu1 %v4410_v27 }
 0x314   : > { %2739 = vmatprep.subr.bf16.mxu0 %v3397_v25  ;;  %3072 = vmatprep.subr.bf16.mxu1 %v4414_v20 }
 0x317   : > { %2740 = vmatpush3.bf16.msra.mxu0 %v3398_v59  ;;  %3074 = vmatpush3.bf16.msra.mxu1 %v4414_v20 }
 0x318   : > { %2741 = vmatprep.subr.bf16.mxu0 %v3399_v10  ;;  %3076 = vmatprep.subr.bf16.mxu1 %v4418_v14 }
 0x31b   : > { %2742 = vmatpush3.bf16.msra.mxu0 %v3400_v11  ;;  %3078 = vmatpush3.bf16.msra.mxu1 %v4418_v14 }
 0x31c   : > { %2743 = vmatprep.subr.bf16.mxu0 %v3401_v17  ;;  %3080 = vmatprep.subr.bf16.mxu1 %v4422_v4 }
 0x31f   : > { %2744 = vmatpush3.bf16.msra.mxu0 %v3402_v62  ;;  %3082 = vmatpush3.bf16.msra.mxu1 %v4422_v4 }
 0x320   : > { %2745 = vmatprep.subr.bf16.mxu0 %v3403_v63  ;;  %3084 = vmatprep.subr.bf16.mxu1 %v4427_v45 }
 0x323   : > { %2746 = vmatpush3.bf16.msra.mxu0 %v3404_v5  ;;  %3086 = vmatpush3.bf16.msra.mxu1 %v4427_v45 }
 0x324   : > { %3120 = vmatprep.subr.bf16.mxu1 %v4399_v53  ;;  %3088 = vmatprep.subr.bf16.mxu0 %v4432_v31 }
 0x326   : > { %1766 = vmatmul.mubr.bf16.vlgmr.msra.gmra.mrb[24].mxu0 %v878_v0  ;;  %v1887_v0 = vld [vmem:[#allocation13 + $0x20] sm:$0xff] }
 0x327   : > { %1773 = vmatprep.mubr.bf16.mxu0 %v889_v29  ;;  %v4434_v29 = vpack.c.bf16 %v1886_v28, %v1885_v38  ;;  %3090 = vmatpush3.bf16.msra.mxu0 %v4432_v31  ;;  %v4439_v3 = vpack.c.bf16 %v1888_v1, %v1887_v0 }
 0x329   : > { %3092 = vmatprep.subr.bf16.mxu0 %v4434_v29 }
 0x32b   : > { %3094 = vmatpush3.bf16.msra.mxu0 %v4434_v29 }
 0x32c   : > { %3096 = vmatprep.subr.bf16.mxu0 %v4439_v3 }
 0x32e   : > { %1774 = vmatmul.mubr.bf16.gmra.mrb[28].mxu0 %v888_v44  ;;  %v4443_v44 = vpack.c.bf16 %v1890_v43, %v1889_v37 }
 0x32f   : > { %3098 = vmatpush3.bf16.msra.mxu0 %v4439_v3 }
 0x330   : > { %3100 = vmatprep.subr.bf16.mxu0 %v4443_v44 }
 0x333   : > { %3102 = vmatpush3.bf16.msra.mxu0 %v4443_v44 }
 0x334   : > { %3104 = vmatprep.subr.bf16.mxu0 %v4447_v42 }
 0x337   : > { %3106 = vmatpush3.bf16.msra.mxu0 %v4447_v42 }
 0x338   : > { %3108 = vmatprep.subr.bf16.mxu0 %v4451_v13 }
 0x33b   : > { %3110 = vmatpush3.bf16.msra.mxu0 %v4451_v13 }
 0x33c   : > { %3112 = vmatprep.subr.bf16.mxu0 %v4455_v49 }
 0x33f   : > { %3114 = vmatpush3.bf16.msra.mxu0 %v4455_v49 }
 0x340   : > { %3116 = vmatprep.subr.bf16.mxu0 %v4459_v52 }
 0x343   : > { %3118 = vmatpush3.bf16.msra.mxu0 %v4459_v52 }
 0x344   : > { %3152 = vmatprep.subr.bf16.mxu0 %v4432_v31 }
 0x3b8   : > { %v2635_v54 = vpop.f32.mrb[8].mxu0  ;;  %v2663_v55 = vpop.f32.mrb[12].mxu1 }
 0x3b9   : > { %v2636_v57 = vpop.f32.mrb[9].mxu0  ;;  %v2664_v58 = vpop.f32.mrb[13].mxu1 }
 0x3ba   : > { %v2637_v60 = vadd.f32 %v2636_v57, %v2635_v54  ;;  %v2665_v61 = vadd.f32 %v2664_v58, %v2663_v55  ;;  %v2638_v24 = vpop.f32.mrb[10].mxu0  ;;  %v2666_v25 = vpop.f32.mrb[14].mxu1 }
 0x3bb   : > { %v2639_v59 = vpop.f32.mrb[11].mxu0  ;;  %v2667_v10 = vpop.f32.mrb[15].mxu1 }
 0x3bc   : > { %v1572_v11 = vadd.f32 %v2637_v60, %v2504_v56  ;;  %v2640_v17 = vadd.f32 %v2639_v59, %v2638_v24  ;;  %v2668_v62 = vadd.f32 %v2667_v10, %v2666_v25 }
 0x3be   : > { %v1621_v63 = vadd.f32 %v2665_v61, %v1572_v11  ;;  %v1575_v5 = vadd.f32 %v2640_v17, %v2504_v56 }
 0x3c0   : > { %v1624_v6 = vadd.f32 %v2668_v62, %v1575_v5  ;;  %v2641_v15 = vpop.f32.mrb[12].mxu0  ;;  %v2669_v16 = vpop.f32.mrb[16].mxu1 }
 0x3c1   : > { %v2642_v18 = vpop.f32.mrb[13].mxu0  ;;  %v2670_v32 = vpop.f32.mrb[17].mxu1 }
 0x3c2   : > { %v2643_v22 = vadd.f32 %v2642_v18, %v2641_v15  ;;  %v2671_v21 = vadd.f32 %v2670_v32, %v2669_v16  ;;  %v2644_v23 = vpop.f32.mrb[14].mxu0  ;;  %v2672_v30 = vpop.f32.mrb[18].mxu1 }
 0x3c3   : > { %v2645_v35 = vpop.f32.mrb[15].mxu0  ;;  %v2673_v26 = vpop.f32.mrb[19].mxu1 }
 0x3c4   : > { %v1580_v33 = vadd.f32 %v2643_v22, %v2504_v56  ;;  %v2646_v34 = vadd.f32 %v2645_v35, %v2644_v23  ;;  %v2674_v41 = vadd.f32 %v2673_v26, %v2672_v30 }
 0x3c6   : > { %v1629_v36 = vadd.f32 %v2671_v21, %v1580_v33  ;;  %v1583_v8 = vadd.f32 %v2646_v34, %v2504_v56 }
 0x3c8   : > { %v1632_v39 = vadd.f32 %v2674_v41, %v1583_v8 }
 0x3d8   : > { %v2691_v47 = vpop.f32.mrb[16].mxu0  ;;  %v2719_v38 = vpop.f32.mrb[20].mxu1 }
 0x3d9   : > { %v2692_v28 = vpop.f32.mrb[17].mxu0  ;;  %v2720_v0 = vpop.f32.mrb[21].mxu1 }
 0x3da   : > { %v2693_v1 = vadd.f32 %v2692_v28, %v2691_v47  ;;  %v2721_v37 = vadd.f32 %v2720_v0, %v2719_v38  ;;  %v2694_v43 = vpop.f32.mrb[18].mxu0  ;;  %v2722_v7 = vpop.f32.mrb[22].mxu1  ;;  %v3406_v28 = vld [vmem:[#allocation14 + $0x8] sm:$0xff]   ;;  %v3408_v0 = vld [vmem:[#allocation14 + $0x18] sm:$0xff]  }
 0x3db   : > { %v2695_v9 = vpop.f32.mrb[19].mxu0  ;;  %v2723_v46 = vpop.f32.mrb[23].mxu1 }
 0x3dc   : > { %v1670_v2 = vadd.f32 %v2693_v1, %v1621_v63  ;;  %v2696_v40 = vadd.f32 %v2695_v9, %v2694_v43  ;;  %v2724_v48 = vadd.f32 %v2723_v46, %v2722_v7  ;;  %v3409_v1 = vld [vmem:[#allocation14 + $0x20] sm:$0xff]  }
 0x3de   : > { %v1719_v50 = vadd.f32 %v2721_v37, %v1670_v2  ;;  %v1673_v51 = vadd.f32 %v2696_v40, %v1624_v6 }
 0x3e0   : > { %v1722_v54 = vadd.f32 %v2724_v48, %v1673_v51  ;;  %v2697_v55 = vpop.f32.mrb[20].mxu0  ;;  %v2725_v57 = vpop.f32.mrb[24].mxu1 }
 0x3e1   : > { %v2698_v56 = vpop.f32.mrb[21].mxu0  ;;  %v2726_v58 = vpop.f32.mrb[25].mxu1 }
 0x3e2   : > { %v2699_v60 = vadd.f32 %v2698_v56, %v2697_v55  ;;  %v2727_v61 = vadd.f32 %v2726_v58, %v2725_v57  ;;  %v2700_v24 = vpop.f32.mrb[22].mxu0  ;;  %v2728_v25 = vpop.f32.mrb[26].mxu1  ;;  %v3410_v57 = vld [vmem:[#allocation14 + $0x28] sm:$0xff]   ;;  %v3411_v56 = vld [vmem:[#allocation14 + $0x30] sm:$0xff]   ;;  %v3412_v58 = vld [vmem:[#allocation14 + $0x38] sm:$0xff]  }
 0x3e3   : > { %v2701_v59 = vpop.f32.mrb[23].mxu0  ;;  %v2729_v10 = vpop.f32.mrb[27].mxu1 }
 0x3e4   : > { %v1678_v11 = vadd.f32 %v2699_v60, %v1629_v36  ;;  %v2702_v17 = vadd.f32 %v2701_v59, %v2700_v24  ;;  %v2730_v62 = vadd.f32 %v2729_v10, %v2728_v25 }
 0x3e6   : > { %v1727_v5 = vadd.f32 %v2727_v61, %v1678_v11  ;;  %v1681_v63 = vadd.f32 %v2702_v17, %v1632_v39 }
 0x3e8   : > { %v1730_v15 = vadd.f32 %v2730_v62, %v1681_v63  ;;  %v2585_v63 = vld [vmem:[#allocation16] ss:$0 sm:$0xff] }
 0x3f9   : > { %v2747_v16 = vpop.f32.mrb[24].mxu0 }
 0x3fa   : > { %v2748_v18 = vpop.f32.mrb[25].mxu0 }
 0x3fb   : > { %v2749_v6 = vadd.f32 %v2748_v18, %v2747_v16  ;;  %v2750_v32 = vpop.f32.mrb[26].mxu0 }
 0x3fc   : > { %v2751_v22 = vpop.f32.mrb[27].mxu0 }
 0x3fd   : > { %v1768_v21 = vadd.f32 %v2749_v6, %v1719_v50  ;;  %v2752_v23 = vadd.f32 %v2751_v22, %v2750_v32 }
 0x3ff   : > { %v1771_v30 = vadd.f32 %v2752_v23, %v1722_v54  ;;  %2915 = vmatprep.mubr.f32.mxu1 %v1768_v21 }
 0x401   : > { %v2753_v35 = vpop.f32.mrb[28].mxu0  ;;  %2916 = vmatmul.mubr.f32.vlgmr.msra.gmra.mrb[28].mxu1 %v1771_v30 }
 0x402   : > { %v2754_v26 = vpop.f32.mrb[29].mxu0  ;;  %3122 = vmatpush3.bf16.msra.mxu1 %v4399_v53 }
 0x403   : > { %v2755_v33 = vadd.f32 %v2754_v26, %v2753_v35  ;;  %v2756_v34 = vpop.f32.mrb[30].mxu0  ;;  %3124 = vmatprep.subr.bf16.mxu1 %v4403_v19 }
 0x404   : > { %v2757_v41 = vpop.f32.mrb[31].mxu0 }
 0x405   : > { %v1776_v36 = vadd.f32 %v2755_v33, %v1727_v5  ;;  %v2758_v8 = vadd.f32 %v2757_v41, %v2756_v34 }
 0x406   : > { %3126 = vmatpush3.bf16.msra.mxu1 %v4403_v19 }
 0x407   : > { %v1779_v39 = vadd.f32 %v2758_v8, %v1730_v15  ;;  %2918 = vmatprep.mubr.f32.mxu1 %v1776_v36  ;;  %3128 = vmatprep.subr.bf16.mxu1 %v4405_v12 }
 0x409   : > { %2919 = vmatmul.mubr.f32.gmra.mrb[30].mxu1 %v1779_v39 }
 0x40a   : > { %3130 = vmatpush3.bf16.msra.mxu1 %v4405_v12 }
 0x40b   : > { %3132 = vmatprep.subr.bf16.mxu1 %v4410_v27 }
 0x40e   : > { %3134 = vmatpush3.bf16.msra.mxu1 %v4410_v27 }
 0x40f   : > { %3136 = vmatprep.subr.bf16.mxu1 %v4414_v20 }
 0x412   : > { %3138 = vmatpush3.bf16.msra.mxu1 %v4414_v20 }
 0x413   : > { %3140 = vmatprep.subr.bf16.mxu1 %v4418_v14 }
 0x416   : > { %3142 = vmatpush3.bf16.msra.mxu1 %v4418_v14 }
 0x417   : > { %3144 = vmatprep.subr.bf16.mxu1 %v4422_v4 }
 0x41a   : > { %3146 = vmatpush3.bf16.msra.mxu1 %v4422_v4 }
 0x41b   : > { %3148 = vmatprep.subr.bf16.mxu1 %v4427_v45 }
 0x41e   : > { %3150 = vmatpush3.bf16.msra.mxu1 %v4427_v45 }
 0x4d4   : > { %v2917_v53 = vpop.f32.mrb[28].mxu1 }
 0x4d5   : > { %v1864_v19 = vpop.f32.mrb[29].mxu1 }
 0x4d6   : > { %2953 = vmatprep.mubr.f32.mxu0 %v1864_v19 }
 0x4d7   : > { %2954 = vmatmul.mubr.f32.vlgmr.msra.gmra.mrb[32].mxu0 %v2917_v53 }
 0x4d8   : > { %3154 = vmatpush3.bf16.msra.mxu0 %v4432_v31 }
 0x4d9   : > { %3156 = vmatprep.subr.bf16.mxu0 %v4434_v29 }
 0x4dc   : > { %v2920_v12 = vpop.f32.mrb[30].mxu1  ;;  %3158 = vmatpush3.bf16.msra.mxu0 %v4434_v29 }
 0x4dd   : > { %v1874_v27 = vpop.f32.mrb[31].mxu1  ;;  %3160 = vmatprep.subr.bf16.mxu0 %v4439_v3 }
 0x4de   : > { %2956 = vmatprep.mubr.f32.mxu0 %v1874_v27 }
 0x4df   : > { %2957 = vmatmul.mubr.f32.gmra.mrb[34].mxu0 %v2920_v12 }
 0x4e0   : > { %3162 = vmatpush3.bf16.msra.mxu0 %v4439_v3 }
 0x4e1   : > { %3164 = vmatprep.subr.bf16.mxu0 %v4443_v44 }
 0x4e4   : > { %3166 = vmatpush3.bf16.msra.mxu0 %v4443_v44 }
 0x4e5   : > { %3168 = vmatprep.subr.bf16.mxu0 %v4447_v42 }
 0x4e8   : > { %3170 = vmatpush3.bf16.msra.mxu0 %v4447_v42 }
 0x4e9   : > { %3172 = vmatprep.subr.bf16.mxu0 %v4451_v13 }
 0x4ec   : > { %3174 = vmatpush3.bf16.msra.mxu0 %v4451_v13 }
 0x4ed   : > { %3176 = vmatprep.subr.bf16.mxu0 %v4455_v49 }
 0x4f0   : > { %3178 = vmatpush3.bf16.msra.mxu0 %v4455_v49  ;;  %v3405_v49 = vld [vmem:[#allocation14] sm:$0xff]  }
 0x4f1   : > { %3180 = vmatprep.subr.bf16.mxu0 %v4459_v52  ;;  %3035 = vmatprep.subr.bf16.mxu1 %v3405_v49 }
 0x4f4   : > { %3182 = vmatpush3.bf16.msra.mxu0 %v4459_v52  ;;  %v3407_v52 = vld [vmem:[#allocation14 + $0x10] sm:$0xff]  }
 0x5aa   : > { %v2955_v20 = vpop.f32.mrb[32].mxu0 }
 0x5ab   : > { %v1985_v14 = vsub.f32 %v1771_v30, %v2955_v20  ;;  %v1965_v4 = vpop.f32.mrb[33].mxu0 }
 0x5ac   : > { %v1984_v45 = vsub.f32 %v1768_v21, %v1965_v4 }
 0x5ad   : > { %v1989_v29 = vmul.f32 %v1985_v14, %v1985_v14 }
 0x5ae   : > { %v1988_v31 = vmul.f32 %v1984_v45, %v1984_v45 }
 0x5b0   : > { %2991 = vmatprep.mubr.f32.mxu1 %v1988_v31 }
 0x5b1   : > { %2992 = vmatmul.mubr.f32.vlgmr.msra.gmra.mrb[32].mxu1 %v1989_v29 }
 0x5b2   : > { %v2958_v3 = vpop.f32.mrb[34].mxu0  ;;  %3036 = vmatpush3.bf16.msra.mxu1 %v3405_v49 }
 0x5b3   : > { %v1987_v44 = vsub.f32 %v1779_v39, %v2958_v3  ;;  %v1975_v42 = vpop.f32.mrb[35].mxu0  ;;  %3037 = vmatprep.subr.bf16.mxu1 %v3406_v28 }
 0x5b4   : > { %v1986_v13 = vsub.f32 %v1776_v36, %v1975_v42 }
 0x5b5   : > { %v1991_v38 = vmul.f32 %v1987_v44, %v1987_v44 }
 0x5b6   : > { %v1990_v47 = vmul.f32 %v1986_v13, %v1986_v13  ;;  %3038 = vmatpush3.bf16.msra.mxu1 %v3406_v28 }
 0x5b7   : > { %3039 = vmatprep.subr.bf16.mxu1 %v3407_v52 }
 0x5b8   : > { %2994 = vmatprep.mubr.f32.mxu1 %v1990_v47 }
 0x5b9   : > { %2995 = vmatmul.mubr.f32.gmra.mrb[34].mxu1 %v1991_v38 }
 0x5ba   : > { %3040 = vmatpush3.bf16.msra.mxu1 %v3407_v52 }
 0x5bb   : > { %3041 = vmatprep.subr.bf16.mxu1 %v3408_v0 }
 0x5be   : > { %3042 = vmatpush3.bf16.msra.mxu1 %v3408_v0 }
 0x5bf   : > { %3043 = vmatprep.subr.bf16.mxu1 %v3409_v1 }
 0x5c2   : > { %3044 = vmatpush3.bf16.msra.mxu1 %v3409_v1 }
 0x5c3   : > { %3045 = vmatprep.subr.bf16.mxu1 %v3410_v57 }
 0x5c6   : > { %3046 = vmatpush3.bf16.msra.mxu1 %v3410_v57 }
 0x5c7   : > { %3047 = vmatprep.subr.bf16.mxu1 %v3411_v56 }
 0x5ca   : > { %3048 = vmatpush3.bf16.msra.mxu1 %v3411_v56 }
 0x5cb   : > { %3049 = vmatprep.subr.bf16.mxu1 %v3412_v58 }
 0x5ce   : > { %3050 = vmatpush3.bf16.msra.mxu1 %v3412_v58 }
 0x684   : > { %v2993_v37 = vpop.f32.mrb[32].mxu1 }
 0x685   : > { %v2064_v43 = vadd.f32 1e-05, %v2993_v37  ;;  %v2058_v7 = vpop.f32.mrb[33].mxu1 }
 0x686   : > { %v2059_v9 = vadd.f32 1e-05, %v2058_v7 }
 0x688   : > { %3413 = vrsqrt.f32 %v2059_v9 }
 0x689   : > { %3415 = vrsqrt.f32 %v2064_v43 }
 0x68c   : > { %v2996_v46 = vpop.f32.mrb[34].mxu1 }
 0x68d   : > { %v2074_v2 = vadd.f32 1e-05, %v2996_v46  ;;  %v2068_v40 = vpop.f32.mrb[35].mxu1 }
 0x68e   : > { %v2069_v48 = vadd.f32 1e-05, %v2068_v40 }
 0x690   : > { %3417 = vrsqrt.f32 %v2069_v48 }
 0x691   : > { %3419 = vrsqrt.f32 %v2074_v2 }
 0x692   : > { %v3414_v50 = vpop.eup %3413 }
 0x693   : > { %v3416_v51 = vpop.eup %3415  ;;  %3029 = vmatprep.mubr.f32.mxu0 %v3414_v50 }
 0x694   : > { %3030 = vmatmul.mubr.f32.vlgmr.msra.gmra.mrb[36].mxu0 %v3416_v51 }
 0x69a   : > { %v3418_v54 = vpop.eup %3417 }
 0x69b   : > { %v3420_v55 = vpop.eup %3419  ;;  %3032 = vmatprep.mubr.f32.mxu0 %v3418_v54 }
 0x69c   : > { %3033 = vmatmul.mubr.f32.gmra.mrb[38].mxu0 %v3420_v55 }
 0x767   : > { %v3031_v60 = vpop.f32.mrb[36].mxu0 }
 0x768   : > { %v2167_v61 = vmul.f32 %v3031_v60, %v1985_v14  ;;  %v2147_v24 = vpop.f32.mrb[37].mxu0 }
 0x769   : > { %v2166_v25 = vmul.f32 %v2147_v24, %v1984_v45 }
 0x76b   : > { %v2170_v59 = vpack.c.bf16 %v2167_v61, %v2166_v25 }
 0x76d   : > { %3051 = vmatprep.mubr.bf16.mxu1 %v2170_v59 }
 0x76f   : > { %v3034_v10 = vpop.f32.mrb[38].mxu0 }
 0x770   : > { %v2169_v11 = vmul.f32 %v3034_v10, %v1987_v44  ;;  %v2157_v17 = vpop.f32.mrb[39].mxu0 }
 0x771   : > { %v2168_v62 = vmul.f32 %v2157_v17, %v1986_v13 }
 0x773   : > { %v2171_v5 = vpack.c.bf16 %v2169_v11, %v2168_v62 }
 0x775   : > { %3052 = vmatmul.mubr.bf16.vlgmr.msra.gmra.mrb[36].mxu1 %v2171_v5 }
 0x848   : > { %v3053_v15 = vpop.f32.mrb[36].mxu1 }
 0x849   : > { %v2286_v16 = vadd.f32 %v3053_v15, %v2585_v63  ;;  %v2277_v18 = vpop.f32.mrb[37].mxu1 }
 0x84a   : > { %v2278_v6 = vadd.f32 %v2585_v63, %v2277_v18  ;;  %v3054_v32 = vpop.f32.mrb[38].mxu1 }
 0x84b   : > { %2294 = vst.msk [vmem:[%s463_s9 + $0x10] sm:$0xff] %vm503_vm0, %v2286_v16  ;;  %v2289_v22 = vadd.f32 %v3054_v32, %v2585_v63  ;;  %v2280_v21 = vpop.f32.mrb[39].mxu1 }
 0x84c   : > { %2292 = vst.msk [vmem:[%s463_s9] sm:$0xff] %vm503_vm0, %v2278_v6  ;;  %v2281_v23 = vadd.f32 %v2585_v63, %v2280_v21 }
 0x84d   : > { %2295 = vst.msk [vmem:[%s463_s9 + $0x18] sm:$0xff] %vm503_vm0, %v2289_v22 }
 0x84e   : > { %2293 = vst.msk [vmem:[%s463_s9 + $0x8] sm:$0xff] %vm503_vm0, %v2281_v23 }
 0x84f   : > { %3688 = shalt.err (!%p3685_p10)
}
 0x850   : > { %s3689_s25 = scalar_lea.hbm %s4503_s17, 512  ;;  %s3693_s9 = scalar_lea.hbm %s4596_s28, 1024 }
 0x851   : > { %p3690_p11 = scmp.ne.s32.totalorder %s4503_s17, %s3689_s25  ;;  %p3694_p7 = scmp.lt.u32.totalorder %s4503_s17, %s4596_s28 }
 0x852   : > { %p3695_p6 = scmp.lt.u32.totalorder %s3693_s9, %s3689_s25  ;;  %p3697_p12 = scmp.lt.u32.totalorder %s3689_s25, %s4503_s17 }
 0x853   : > { %p3691_p3 = pnand %p3690_p11, %p4597_p1 }
 0x854   : > { %p3696_p9 = por %p3695_p6, %p3694_p7 }
 0x855   : > { %p3692_p5 = pneg %p3691_p3 }
 0x856   : > { %p3698_p13 = por %p3697_p12, %p3696_p9 }
 0x858   : > { %p3699_p0 = pnand %p3698_p13, %p3692_p5 }
 0x85a   : > { %3702 = shalt.err (!%p3699_p0)
}
 0x85b   : > { %s3773_s27 = smov 128   ;;  %s3774_s29 = smov 8  }
 0x85c   : > { %3217 = dma.vmem_to_hbm [thread:$0]  (%p4597_p1), %s4497_s22, 512, %s4503_s17, %s2297_s15, %s3773_s27, %s3773_s27, %s3774_s29  }
 0x85d PF: > { %s2325_s13 = sand.u32 1, %s3745_s30   ;;  %p4598_p2 = scmp.ne.s32.totalorder %s4585_s26, 0 }
 0x85e   : > { %p4599_p8 = scmp.ge.s32.totalorder %s3757_s12, 2  ;;  %s2326_s18 = scalar_lea.sflag [#allocation4], %s2325_s13 }
 0x860   : > { %p3249_p4 = pnand %p4599_p8, %p4598_p2 }
 0x862   : > { %3740 = dma.done.wait (!%p3249_p4), %s2326_s18, 512  }
 0x863   : > { %3742 = vsyncadd (!%p3249_p4), %s2326_s18, 4294966784  ;;  %p26_p10 = scmp.ge.s32.totalorder %s4055_s19, 4   ;;  %s4600_s30 = smov %s3749_s10 }
 0x864   : > { %s4601_s10 = smov %s3753_s11  ;;  %s4602_s11 = smov %s4066_s1 }
 0x865   : > { %s4603_s12 = smov %s4055_s19  ;;  %28 = sbr.rel (!%p26_p10) target bundleno = 13 (0xd), region = 133 }
 0x86c   :  { %2331 = vsyncpa [#allocation3], 1 }
 0x86d   :  { %2333 = vsyncpa [#allocation3 + $0x1], 1 }
 0x86e   :  { %2334 = vsyncpa [#allocation6], 1 }
 0x86f   :  { %2335 = vsyncpa [#allocation9], 1 }
 0x870   :  { %2336 = vsyncpa [#allocation12], 1 }
 0x871   :  { %2337 = vsyncpa [#allocation15], 1 }
 0x872   :  { %2338 = vsyncpa [#allocation4], 1 }
 0x873   :  { %2340 = vsyncpa [#allocation4 + $0x1], 1 }

// kernel: wt_patch_merging.1
= control target key start
LH: loop header
LB: loop body
LE: loop exit
PB: predicated region body
PF: predicated region fallthrough
CT: control target
= control target key end

     0   :  { %s4550_s0 = inlined_call_operand.hbm [shape: f32[8,16,48], index: 0, kind: input, shape index: {}]   ;;  %s4551_s1 = inlined_call_operand.hbm [shape: bf16[96,64], index: 1, kind: input, shape index: {}]   ;;  %s4552_s2 = inlined_call_operand.hbm [shape: bf16[48,128], index: 2, kind: input, shape index: {}]   ;;  %s4553_s3 = inlined_call_operand.hbm [shape: bf16[1280,128], index: 3, kind: input, shape index: {}]   ;;  %s4554_s4 = inlined_call_operand.hbm [shape: f32[1,128], index: 4, kind: input, shape index: {}]   ;;  %s4555_s5 = inlined_call_operand.hbm [shape: f32[128,128], index: 5, kind: input, shape index: {}]   ;;  %s4556_s6 = inlined_call_operand.hbm [shape: f32[128,128], index: 6, kind: input, shape index: {}]   ;;  %s4557_s7 = inlined_call_operand.hbm [shape: bf16[128,48], index: 7, kind: input, shape index: {}]   ;;  %s4558_s8 = inlined_call_operand.hbm [shape: f32[1,48], index: 8, kind: input, shape index: {}]   ;;  %s4559_s9 = inlined_call_operand.hbm [shape: f32[8,8,48], index: 9, kind: output, shape index: {}]  }
   0x1   :  { %4570 = sst [smem:[#allocation24_spill]] %s4551_s1 }
   0x2   :  { %4571 = sst [smem:[#allocation25_spill]] %s4553_s3 }
   0x3   :  { %4572 = sst [smem:[#allocation26_spill]] %s4559_s9 }
   0x4   :  { %14 = vsyncpa [#allocation3], 0 }
   0x5   :  { %16 = vsyncpa [#allocation3 + $0x1], 0 }
   0x6   :  { %17 = vsyncpa [#allocation6], 0 }
   0x7   :  { %18 = vsyncpa [#allocation9], 0 }
   0x8   :  { %19 = vsyncpa [#allocation12], 0 }
   0x9   :  { %20 = vsyncpa [#allocation15], 0 }
   0xa   :  { %21 = vsyncpa [#allocation4], 0 }
   0xb   :  { %23 = vsyncpa [#allocation4 + $0x1], 0  ;;  %s3825_s30 = smov 0   ;;  %s3827_s10 = smov 0  }
   0xc   :  { %s3829_s11 = smov 0   ;;  %s3831_s12 = smov 0  }
   0xd LB: > { %s3759_s13 = smov [#allocation5]   ;;  %s3846_s15 = sadd.s32 4294967295, %s3757_s12   ;;  %s3757_s12 = sphi %s3831_s12, %s4603_s12   ;;  %s3753_s11 = sphi %s3829_s11, %s4602_s11   ;;  %s3749_s10 = sphi %s3827_s10, %s4601_s10   ;;  %s3745_s30 = sphi %s3825_s30, %s4600_s30  }
   0xe   : > { %s266_s14 = sshll.u32 %s3759_s13, 4  ;;  %p2460_p0 = scmp.ge.s32.totalorder %s3757_s12, 1  ;;  %s3851_s14 = int_to_ptr.vmem [resolvable:$true] %s266_s14 }
   0xf   : > { %p4565_p1 = scmp.eq.s32.totalorder %s3846_s15, 0  ;;  %p254_p2 = scmp.lt.s32.totalorder %s3757_s12, 3 }
  0x10   : > { %s3760_s17 = smov [#allocation8]   ;;  %s3761_s20 = smov [#allocation11]  }
  0x11   : > { %p3853_p3 = pnand %p2460_p0, %p254_p2  ;;  %s292_s18 = sshll.u32 %s3760_s17, 4  ;;  %s3866_s18 = int_to_ptr.vmem [resolvable:$true] %s292_s18 }
  0x12   : > { %s316_s21 = sshll.u32 %s3761_s20, 4  ;;  %s4575_s1 = sld [smem:[#allocation24_spill]]  ;;  %s3868_s21 = int_to_ptr.vmem [resolvable:$true] %s316_s21 }
  0x13   : > { %s4573_s16 = scalar_select %p3853_p3, 1, 0 }
  0x14   : > { %p3219_p5 = pneg %p3853_p3 }
  0x16   : > { %p3862_p6 = pnand %p3219_p5, %p4565_p1 }
  0x18   : > { %s3421_s24 = scalar_lea.hbm %s4575_s1, 768  ;;  %p3878_p8 = pneg %p3862_p6 }
  0x19   : > { %p3422_p7 = scmp.ne.s32.totalorder %s4575_s1, %s3421_s24  ;;  %p3428_p11 = scmp.lt.u32.totalorder %s3421_s24, %s4575_s1 }
  0x1b   : > { %p3424_p9 = pnand %p3878_p8, %p3422_p7 }
  0x1d   : > { %p3425_p10 = pneg %p3424_p9 }
  0x1f   : > { %p3430_p12 = pnand %p3428_p11, %p3425_p10 }
  0x21   : > { %3433 = shalt.err (!%p3430_p12)
}
  0x22   : > { %s3434_s13 = scalar_lea.vmem %s3851_s14, 768  ;;  %p3442_p5 = scmp.lt.s32.totalorder %s3851_s14, %s3851_s14 }
  0x23   : > { %p3435_p13 = scmp.ne.s32.totalorder %s3851_s14, %s3434_s13  ;;  %p3443_p4 = scmp.lt.s32.totalorder %s3434_s13, %s3434_s13 }
  0x25   : > { %p3437_p0 = pnand %p3435_p13, %p3878_p8  ;;  %p3444_p7 = por %p3443_p4, %p3442_p5 }
  0x27   : > { %p3438_p2 = pneg %p3437_p0 }
  0x29   : > { %p3445_p9 = pnand %p3444_p7, %p3438_p2 }
  0x2b   : > { %3448 = shalt.err (!%p3445_p9)
}
  0x2c   : > { %s4561_s17 = smov 64   ;;  %s4563_s20 = smov 4  }
  0x2d   : > { %3222 = dma.hbm_to_vmem [thread:$0]  (!%p3862_p6), %s4575_s1, 768, %s3851_s14, [#allocation6], %s4561_s17, %s4561_s17, %s4563_s20  }
  0x2e   : > { %s4577_s3 = sld [smem:[#allocation25_spill]] }
  0x34   : > { %s3449_s26 = scalar_lea.hbm %s4577_s3, 10240 }
  0x35   : > { %p3450_p4 = scmp.ne.s32.totalorder %s4577_s3, %s3449_s26  ;;  %p3456_p12 = scmp.lt.u32.totalorder %s3449_s26, %s4577_s3 }
  0x37   : > { %p3452_p10 = pnand %p3450_p4, %p3878_p8 }
  0x39   : > { %p3453_p11 = pneg %p3452_p10 }
  0x3b   : > { %p3458_p13 = pnand %p3456_p12, %p3453_p11 }
  0x3d   : > { %3461 = shalt.err (!%p3458_p13)
}
  0x3e   : > { %s3462_s14 = scalar_lea.vmem %s3866_s18, 10240  ;;  %p3470_p7 = scmp.lt.s32.totalorder %s3866_s18, %s3866_s18 }
  0x3f   : > { %p3463_p0 = scmp.ne.s32.totalorder %s3866_s18, %s3462_s14  ;;  %p3471_p9 = scmp.lt.s32.totalorder %s3462_s14, %s3462_s14 }
  0x41   : > { %p3465_p2 = pnand %p3463_p0, %p3878_p8  ;;  %p3472_p4 = por %p3471_p9, %p3470_p7 }
  0x43   : > { %p3466_p5 = pneg %p3465_p2 }
  0x45   : > { %p3473_p10 = pnand %p3472_p4, %p3466_p5 }
  0x47   : > { %3476 = shalt.err (!%p3473_p10)
}
  0x48   : > { %3228 = dma.hbm_to_vmem [thread:$0]  (!%p3862_p6), %s4577_s3, 10240, %s3866_s18, [#allocation9], %s4561_s17, %s4561_s17, %s4563_s20  }
  0x49   : > { %s3477_s25 = scalar_lea.hbm %s4555_s5, 2048 }
  0x4a   : > { %p3478_p11 = scmp.ne.s32.totalorder %s4555_s5, %s3477_s25  ;;  %p3484_p0 = scmp.lt.u32.totalorder %s3477_s25, %s4555_s5 }
  0x4c   : > { %p3480_p12 = pnand %p3478_p11, %p3878_p8 }
  0x4e   : > { %p3481_p13 = pneg %p3480_p12 }
  0x50   : > { %p3486_p2 = pnand %p3484_p0, %p3481_p13 }
  0x52   : > { %3489 = shalt.err (!%p3486_p2)
}
  0x53   : > { %s3490_s18 = scalar_lea.vmem %s3868_s21, 2048  ;;  %p3498_p4 = scmp.lt.s32.totalorder %s3868_s21, %s3868_s21 }
  0x54   : > { %p3491_p5 = scmp.ne.s32.totalorder %s3868_s21, %s3490_s18  ;;  %p3499_p10 = scmp.lt.s32.totalorder %s3490_s18, %s3490_s18 }
  0x56   : > { %p3493_p7 = pnand %p3491_p5, %p3878_p8  ;;  %p3500_p11 = por %p3499_p10, %p3498_p4 }
  0x58   : > { %p3494_p9 = pneg %p3493_p7 }
  0x5a   : > { %p3501_p12 = pnand %p3500_p11, %p3494_p9 }
  0x5c   : > { %3504 = shalt.err (!%p3501_p12)
}
  0x5d   : > { %s4567_s14 = smov 128   ;;  %s3765_s9 = smov 8  }
  0x5e   : > { %3234 = dma.hbm_to_vmem [thread:$0]  (!%p3862_p6), %s4555_s5, 2048, %s3868_s21, [#allocation12], %s4567_s14, %s4567_s14, %s3765_s9  }
  0x5f   : > { %s3766_s24 = smov [#allocation14]   ;;  %s3767_s26 = smov [#allocation7]  }
  0x60   : > { %s342_s25 = sshll.u32 %s3766_s24, 4  ;;  %s279_s28 = sshll.u32 %s3767_s26, 4  ;;  %s343_s25 = int_to_ptr.vmem [resolvable:$true] %s342_s25  ;;  %s280_s28 = int_to_ptr.vmem [resolvable:$true] %s279_s28 }
  0x61   : > { %s3505_s18 = scalar_lea.hbm %s4557_s7, 1024 }
  0x62   : > { %p3506_p13 = scmp.ne.s32.totalorder %s4557_s7, %s3505_s18  ;;  %p3512_p5 = scmp.lt.u32.totalorder %s3505_s18, %s4557_s7 }
  0x64   : > { %p3508_p0 = pnand %p3506_p13, %p3878_p8 }
  0x66   : > { %p3509_p2 = pneg %p3508_p0 }
  0x68   : > { %p3514_p7 = pnand %p3512_p5, %p3509_p2 }
  0x6a   : > { %3517 = shalt.err (!%p3514_p7)
}
  0x6b   : > { %s3518_s21 = scalar_lea.vmem %s343_s25, 1024  ;;  %p3526_p11 = scmp.lt.s32.totalorder %s343_s25, %s343_s25 }
  0x6c   : > { %p3519_p9 = scmp.ne.s32.totalorder %s343_s25, %s3518_s21  ;;  %p3527_p12 = scmp.lt.s32.totalorder %s3518_s21, %s3518_s21 }
  0x6e   : > { %p3521_p4 = pnand %p3519_p9, %p3878_p8  ;;  %p3528_p1 = por %p3527_p12, %p3526_p11 }
  0x70   : > { %p3522_p10 = pneg %p3521_p4 }
  0x72   : > { %p3529_p3 = pnand %p3528_p1, %p3522_p10 }
  0x74   : > { %3532 = shalt.err (!%p3529_p3)
}
  0x75   : > { %s4578_s17 = smov 4   ;;  %s4579_s20 = smov 64  }
  0x76   : > { %3240 = dma.hbm_to_vmem [thread:$0]  (!%p3862_p6), %s4557_s7, 1024, %s343_s25, [#allocation15], %s4579_s20, %s4579_s20, %s4578_s17  }
  0x77   : > { %s3533_s24 = scalar_lea.hbm %s4552_s2, 384 }
  0x78   : > { %p3534_p1 = scmp.ne.s32.totalorder %s4552_s2, %s3533_s24  ;;  %p3540_p0 = scmp.lt.u32.totalorder %s3533_s24, %s4552_s2 }
  0x7a   : > { %p3536_p3 = pnand %p3534_p1, %p3878_p8 }
  0x7c   : > { %p3537_p13 = pneg %p3536_p3 }
  0x7e   : > { %p3542_p2 = pnand %p3540_p0, %p3537_p13 }
  0x80   : > { %3545 = shalt.err (!%p3542_p2)
}
  0x81   : > { %s3546_s21 = scalar_lea.vmem %s280_s28, 384  ;;  %p3554_p4 = scmp.lt.s32.totalorder %s280_s28, %s280_s28 }
  0x82   : > { %p3547_p5 = scmp.ne.s32.totalorder %s280_s28, %s3546_s21  ;;  %p3555_p10 = scmp.lt.s32.totalorder %s3546_s21, %s3546_s21 }
  0x84   : > { %p3549_p7 = pnand %p3547_p5, %p3878_p8  ;;  %p3556_p11 = por %p3555_p10, %p3554_p4 }
  0x86   : > { %p3550_p9 = pneg %p3549_p7 }
  0x88   : > { %p3557_p12 = pnand %p3556_p11, %p3550_p9 }
  0x8a   : > { %3560 = shalt.err (!%p3557_p12)
}
  0x8b   : > { %3225 = dma.hbm_to_vmem [thread:$0]  (!%p3862_p6), %s4552_s2, 384, %s280_s28, [#allocation6], %s4579_s20, %s4579_s20, %s4578_s17  }
  0x8c   : > { %s3768_s3 = smov [#allocation10]   ;;  %s3769_s23 = smov [#allocation13]  }
  0x8d   : > { %s306_s22 = sshll.u32 %s3768_s3, 4  ;;  %s329_s24 = sshll.u32 %s3769_s23, 4  ;;  %s307_s22 = int_to_ptr.vmem [resolvable:$true] %s306_s22  ;;  %s330_s24 = int_to_ptr.vmem [resolvable:$true] %s329_s24 }
  0x8e   : > { %s3561_s13 = scalar_lea.hbm %s4554_s4, 16 }
  0x8f   : > { %p3562_p1 = scmp.ne.s32.totalorder %s4554_s4, %s3561_s13  ;;  %p3568_p0 = scmp.lt.u32.totalorder %s3561_s13, %s4554_s4 }
  0x91   : > { %p3564_p3 = pnand %p3562_p1, %p3878_p8 }
  0x93   : > { %p3565_p13 = pneg %p3564_p3 }
  0x95   : > { %p3570_p2 = pnand %p3568_p0, %p3565_p13 }
  0x97   : > { %3573 = shalt.err (!%p3570_p2)
}
  0x98   : > { %s3574_s28 = scalar_lea.vmem %s307_s22, 16  ;;  %s3581_s17 = scalar_lea.vmem %s307_s22, 32 }
  0x99   : > { %p3575_p5 = scmp.ne.s32.totalorder %s307_s22, %s3574_s28  ;;  %p3582_p4 = scmp.lt.s32.totalorder %s307_s22, %s307_s22 }
  0x9a   : > { %p3583_p10 = scmp.lt.s32.totalorder %s3581_s17, %s3574_s28 }
  0x9b   : > { %p3577_p7 = pnand %p3575_p5, %p3878_p8 }
  0x9c   : > { %p3584_p11 = por %p3583_p10, %p3582_p4 }
  0x9d   : > { %p3578_p9 = pneg %p3577_p7 }
  0x9f   : > { %p3585_p12 = pnand %p3584_p11, %p3578_p9 }
  0xa1   : > { %3588 = shalt.err (!%p3585_p12)
}
  0xa2   : > { %3231 = dma.hbm_to_vmem [thread:$0]  (!%p3862_p6), %s4554_s4, 16, %s307_s22, [#allocation9]  }
  0xa3   : > { %s3589_s23 = scalar_lea.hbm %s4556_s6, 2048 }
  0xa4   : > { %p3590_p1 = scmp.ne.s32.totalorder %s4556_s6, %s3589_s23  ;;  %p3596_p0 = scmp.lt.u32.totalorder %s3589_s23, %s4556_s6 }
  0xa6   : > { %p3592_p3 = pnand %p3590_p1, %p3878_p8 }
  0xa8   : > { %p3593_p13 = pneg %p3592_p3 }
  0xaa   : > { %p3598_p2 = pnand %p3596_p0, %p3593_p13 }
  0xac   : > { %3601 = shalt.err (!%p3598_p2)
}
  0xad   : > { %s3602_s21 = scalar_lea.vmem %s330_s24, 2048  ;;  %p3610_p4 = scmp.lt.s32.totalorder %s330_s24, %s330_s24 }
  0xae   : > { %p3603_p5 = scmp.ne.s32.totalorder %s330_s24, %s3602_s21  ;;  %p3611_p10 = scmp.lt.s32.totalorder %s3602_s21, %s3602_s21 }
  0xb0   : > { %p3605_p7 = pnand %p3603_p5, %p3878_p8  ;;  %p3612_p11 = por %p3611_p10, %p3610_p4 }
  0xb2   : > { %p3606_p9 = pneg %p3605_p7 }
  0xb4   : > { %p3613_p12 = pnand %p3612_p11, %p3606_p9 }
  0xb6   : > { %3616 = shalt.err (!%p3613_p12)
}
  0xb7   : > { %s4580_s22 = smov 128   ;;  %s3770_s17 = smov [#allocation16]  }
  0xb8   : > { %3237 = dma.hbm_to_vmem [thread:$0]  (!%p3862_p6), %s4556_s6, 2048, %s330_s24, [#allocation12], %s4580_s22, %s4580_s22, %s3765_s9  }
  0xb9   : > { %s356_s20 = sshll.u32 %s3770_s17, 4  ;;  %s3617_s3 = scalar_lea.hbm %s4558_s8, 16  ;;  %s357_s20 = int_to_ptr.vmem [resolvable:$true] %s356_s20 }
  0xba   : > { %p3618_p1 = scmp.ne.s32.totalorder %s4558_s8, %s3617_s3  ;;  %p3624_p0 = scmp.lt.u32.totalorder %s3617_s3, %s4558_s8 }
  0xbc   : > { %p3620_p3 = pnand %p3618_p1, %p3878_p8 }
  0xbe   : > { %p3621_p13 = pneg %p3620_p3 }
  0xc0   : > { %p3626_p2 = pnand %p3624_p0, %p3621_p13 }
  0xc2   : > { %3629 = shalt.err (!%p3626_p2)
}
  0xc3   : > { %s3630_s24 = scalar_lea.vmem %s357_s20, 16  ;;  %s3637_s18 = scalar_lea.vmem %s357_s20, 32 }
  0xc4   : > { %p3631_p5 = scmp.ne.s32.totalorder %s357_s20, %s3630_s24  ;;  %p3638_p4 = scmp.lt.s32.totalorder %s357_s20, %s357_s20 }
  0xc5   : > { %p3639_p10 = scmp.lt.s32.totalorder %s3637_s18, %s3630_s24 }
  0xc6   : > { %p3633_p7 = pnand %p3631_p5, %p3878_p8 }
  0xc7   : > { %p3640_p11 = por %p3639_p10, %p3638_p4 }
  0xc8   : > { %p3634_p9 = pneg %p3633_p7 }
  0xca   : > { %p3641_p12 = pnand %p3640_p11, %p3634_p9 }
  0xcc   : > { %3644 = shalt.err (!%p3641_p12)
}
  0xcd   : > { %3243 = dma.hbm_to_vmem [thread:$0]  (!%p3862_p6), %s4558_s8, 16, %s357_s20, [#allocation15]  }
  0xce   : > { %s2459_s27 = sadd.s32 4294967294, %s3757_s12   ;;  %s4055_s19 = sadd.s32 1, %s3757_s12  }
  0xcf   : > { %s33_s28 = ssub.s32 %s3757_s12, %s4055_s19  ;;  %s36_s17 = sadd.s32 1, %s3753_s11 }
  0xd0   : > { %p34_p8 = scmp.eq.s32.totalorder %s33_s28, 0  ;;  %p43_p1 = scmp.ne.s32.totalorder %s3753_s11, %s3749_s10 }
  0xd1   : > { %p44_p3 = scmp.eq.s32.totalorder %s3757_s12, 0  ;;  %p49_p13 = scmp.ne.s32.totalorder %s3749_s10, %s3745_s30 }
  0xd2   : > { %s4066_s1 = scalar_select %p34_p8, %s3753_s11, %s36_s17  }
  0xd3   : > { %p4068_p0 = por %p44_p3, %p43_p1  ;;  %p4582_p2 = scmp.eq.s32.totalorder %s3846_s15, 0 }
  0xd4   : > { %p241_p5 = scmp.eq.s32.totalorder %s3846_s15, 1  ;;  %p247_p7 = scmp.eq.s32.totalorder %s2459_s27, 1 }
  0xd5   : > { %p4074_p6 = por %p4582_p2, %p49_p13  ;;  %p3260_p9 = scmp.lt.s32.totalorder %s3757_s12, 2 }
  0xd6   : > { %s367_s3 = sand.u32 1, %s3753_s11   ;;  %p4081_p4 = por %p241_p5, %p43_p1 }
  0xd7   : > { %p4085_p10 = por %p247_p7, %p49_p13  ;;  %s2470_s29 = sshll.u32 %s367_s3, 6 }
  0xd8   : > { %s4584_s23 = scalar_select %p4081_p4, 1, 0 }
  0xd9   : > { %s4585_s26 = scalar_select %p4085_p10, 1, 0 }
  0xda   : > { %s2600_s13 = sshll.u32 %s3757_s12, 10  ;;  %s371_s25 = scalar_lea.vmem [#allocation2], %s2470_s29 }
  0xdb   : > { %s4093_s21 = scalar_lea.hbm %s4550_s0, %s2600_s13  ;;  %s379_s27 = sshll.u32 %s371_s25, 4  ;;  %s4095_s27 = int_to_ptr.vmem [resolvable:$true] %s379_s27 }
  0xdc   : > { %p4099_p11 = pnand %p3260_p9, %p4068_p0  ;;  %s4103_s17 = scalar_lea.sflag [#allocation3], %s367_s3 }
  0xdd   : > { %s3645_s24 = scalar_lea.hbm %s4093_s21, 1024  ;;  %s3650_s14 = scalar_lea.hbm %s4550_s0, 2048 }
  0xde   : > { %p3646_p12 = scmp.ne.s32.totalorder %s4093_s21, %s3645_s24  ;;  %p3647_p8 = pneg %p4099_p11 }
  0xdf   : > { %p3651_p13 = scmp.lt.u32.totalorder %s4093_s21, %s4550_s0  ;;  %p3652_p0 = scmp.lt.u32.totalorder %s3650_s14, %s3645_s24 }
  0xe0   : > { %p3648_p1 = pnand %p3647_p8, %p3646_p12  ;;  %p3654_p5 = scmp.lt.u32.totalorder %s3645_s24, %s4093_s21 }
  0xe1   : > { %p3653_p2 = por %p3652_p0, %p3651_p13 }
  0xe2   : > { %p3649_p3 = pneg %p3648_p1 }
  0xe3   : > { %p3655_p7 = por %p3654_p5, %p3653_p2 }
  0xe5   : > { %p3656_p9 = pnand %p3655_p7, %p3649_p3 }
  0xe7   : > { %3659 = shalt.err (!%p3656_p9)
}
  0xe8   : > { %s3660_s3 = scalar_lea.vmem %s4095_s27, 1024  ;;  %s3771_s29 = smov [#allocation2]  }
  0xe9   : > { %p3661_p12 = scmp.ne.s32.totalorder %s4095_s27, %s3660_s3  ;;  %s3665_s13 = sshll.u32 %s3771_s29, 4  ;;  %s3666_s13 = int_to_ptr.vmem [resolvable:$false] %s3665_s13 }
  0xea   : > { %s3667_s18 = scalar_lea.vmem %s3666_s13, 2048  ;;  %p3668_p4 = scmp.lt.s32.totalorder %s4095_s27, %s3666_s13 }
  0xeb   : > { %p3663_p1 = pnand %p3661_p12, %p3647_p8  ;;  %p3669_p13 = scmp.lt.s32.totalorder %s3667_s18, %s3660_s3 }
  0xed   : > { %p3664_p10 = pneg %p3663_p1  ;;  %p3670_p0 = por %p3669_p13, %p3668_p4 }
  0xef   : > { %p3671_p2 = pnand %p3670_p0, %p3664_p10 }
  0xf1   : > { %3674 = shalt.err (!%p3671_p2)
}
  0xf2   : > { %3247 = dma.hbm_to_vmem [thread:$0]  (!%p4099_p11), %s4093_s21, 1024, %s4095_s27, %s4103_s17, %s4580_s22, %s4580_s22, %s3765_s9  }
  0xf3   : > { %p4587_p8 = scmp.ne.s32.totalorder %s4573_s16, 0 }
  0xf4   : > { %s4137_s24 = sand.u32 (!%p4587_p8), 1, %s3749_s10  }
  0xf5   : > { %391 = sbr.rel (%p4587_p8) target bundleno = 2141 (0x85d), region = 56  ;;  %s2475_s14 = sshll.u32 (!%p4587_p8), %s4137_s24, 6 }
  0xf6   : > { %s394_s25 = scalar_lea.sflag (!%p4587_p8), [#allocation3], %s4137_s24  ;;  %s4141_s3 = scalar_lea.vmem (!%p4587_p8), [#allocation2], %s2475_s14 }
  0xfc   : > { %3720 = dma.done.wait (%p4074_p6), %s394_s25, 1024  }
  0xfd   : > { %3722 = vsyncadd (%p4074_p6), %s394_s25, 4294966272  ;;  %p4588_p4 = scmp.eq.s32.totalorder %s3846_s15, 0 }
  0xff   : > { %3724 = dma.done.wait (%p4588_p4), [#allocation6], 1152   ;;  %p4589_p10 = pmov %p4588_p4 }
 0x100   : > { %p4590_p11 = pmov %p4588_p4 }
 0x101   : > { %3726 = vsyncadd (%p4589_p10), [#allocation6], 4294966144 }
 0x102   : > { %3728 = dma.done.wait (%p4590_p11), [#allocation9], 10256   ;;  %p4591_p3 = pmov %p4588_p4 }
 0x104   : > { %3730 = vsyncadd (%p4591_p3), [#allocation9], 4294957040  ;;  %p4592_p5 = pmov %p4591_p3 }
 0x105   : > { %p4593_p7 = pmov %p4591_p3 }
 0x106   : > { %3732 = dma.done.wait (%p4592_p5), [#allocation12], 4096  }
 0x107   : > { %3734 = vsyncadd (%p4593_p7), [#allocation12], 4294963200  ;;  %p4594_p6 = pmov %p4591_p3 }
 0x108   : > { %p4595_p9 = pmov %p4591_p3 }
 0x109   : > { %3736 = dma.done.wait (%p4594_p6), [#allocation15], 1040  }
 0x10a   : > { %3738 = vsyncadd (%p4595_p9), [#allocation15], 4294966256  ;;  %v3316_v0 = vld [vmem:[#allocation7] sm:$0xff]   ;;  %v3317_v1 = vld [vmem:[#allocation7 + $0x8] sm:$0xff]   ;;  %vm503_vm0 = vcmask 392192   ;;  %vm627_vm1 = vcmask 523264  }
 0x10b   : > { %2849 = vmatprep.subr.bf16.mxu0 %v3316_v0  ;;  %v467_v2 = vld [vmem:[%s4141_s3] sm:$0xff]  ;;  %v468_v3 = vld [vmem:[%s4141_s3 + $0x8] sm:$0xff]  ;;  %v469_v6 = vld [vmem:[%s4141_s3 + $0x10] sm:$0xff]  ;;  %vm735_vm2 = vcmask 1043456   ;;  %vm773_vm3 = vcmask 1042432   ;;  %vm756_vm4 = vcmask 1046528  }
 0x10c   : > { %2850 = vmatpush3.bf16.msra.mxu0 %v3316_v0  ;;  %v3318_v4 = vld [vmem:[#allocation7 + $0x10] sm:$0xff]   ;;  %v475_v5 = vpack.c.bf16 %v468_v3, %v467_v2  ;;  %v470_v7 = vld [vmem:[%s4141_s3 + $0x18] sm:$0xff]  ;;  %v472_v9 = vld [vmem:[%s4141_s3 + $0x28] sm:$0xff]  ;;  %vm807_vm5 = vcmask 1041408   ;;  %vm841_vm6 = vcmask 1040384   ;;  %vm790_vm7 = vcmask 1045504  }
 0x10d   : > { %2851 = vmatprep.subr.bf16.mxu0 %v3317_v1  ;;  %v471_v8 = vld [vmem:[%s4141_s3 + $0x20] sm:$0xff]  ;;  %v476_v10 = vpack.c.bf16 %v470_v7, %v469_v6  ;;  %v473_v12 = vld [vmem:[%s4141_s3 + $0x30] sm:$0xff]  ;;  %v474_v13 = vld [vmem:[%s4141_s3 + $0x38] sm:$0xff]  ;;  %vm824_vm8 = vcmask 1044480   ;;  %s2484_s16 = sshll.u32 %s4137_s24, 5  ;;  %s2601_s20 = sshll.u32 %s3846_s15, 9 }
 0x10e   : > { %2855 = vmatprep.mubr.msk.bf16.mxu0 %vm503_vm0, %v475_v5  ;;  %v477_v11 = vpack.c.bf16 %v472_v9, %v471_v8  ;;  %v478_v14 = vpack.c.bf16 %v474_v13, %v473_v12  ;;  %v3319_v15 = vld [vmem:[#allocation5] sm:$0xff]   ;;  %v3325_v16 = vld [vmem:[#allocation8 + $0x40] sm:$0xff]   ;;  %v3329_v18 = vld [vmem:[#allocation8 + $0x48] sm:$0xff]   ;;  %s463_s9 = scalar_lea.vmem [#allocation17], %s2484_s16  ;;  %s4596_s28 = sld [smem:[#allocation26_spill]] }
 0x10f   : > { %2871 = vmatprep.mubr.msk.bf16.mxu1 %vm627_vm1, %v3319_v15  ;;  %v3327_v17 = vld [vmem:[#allocation8] sm:$0xff]   ;;  %v3331_v19 = vld [vmem:[#allocation8 + $0x8] sm:$0xff]   ;;  %v3333_v20 = vld [vmem:[#allocation8 + $0x50] sm:$0xff]   ;;  %s2310_s22 = sshll.u32 %s463_s9, 4  ;;  %s2297_s15 = scalar_lea.sflag [#allocation4], %s4137_s24  ;;  %s4497_s22 = int_to_ptr.vmem [resolvable:$true] %s2310_s22 }
 0x110   : > { %2852 = vmatpush3.bf16.msra.mxu0 %v3317_v1  ;;  %v3335_v21 = vld [vmem:[#allocation8 + $0x10] sm:$0xff]   ;;  %v3337_v22 = vld [vmem:[#allocation8 + $0x58] sm:$0xff]   ;;  %v3326_v36 = vld [vmem:[#allocation8 + $0xc0] sm:$0xff]   ;;  %s3675_s29 = scalar_lea.vmem %s4497_s22, 512  ;;  %p4597_p1 = scmp.ne.s32.totalorder %s4584_s23, 0 }
 0x111   : > { %2853 = vmatprep.subr.bf16.mxu0 %v3318_v4  ;;  %v3339_v23 = vld [vmem:[#allocation8 + $0x18] sm:$0xff]   ;;  %v3320_v37 = vld [vmem:[#allocation5 + $0x8] sm:$0xff]   ;;  %v3321_v38 = vld [vmem:[#allocation5 + $0x10] sm:$0xff]   ;;  %p3676_p12 = scmp.ne.s32.totalorder %s4497_s22, %s3675_s29  ;;  %s3772_s13 = smov [#allocation17]  }
 0x112   : > { %v3328_v39 = vld [vmem:[#allocation8 + $0x80] sm:$0xff]   ;;  %v3330_v40 = vld [vmem:[#allocation8 + $0xc8] sm:$0xff]   ;;  %v3334_v42 = vld [vmem:[#allocation8 + $0xd0] sm:$0xff]   ;;  %s3679_s18 = sshll.u32 %s3772_s13, 4  ;;  %s3680_s18 = int_to_ptr.vmem [resolvable:$false] %s3679_s18 }
 0x113   : > { %v3332_v41 = vld [vmem:[#allocation8 + $0x88] sm:$0xff]   ;;  %v3322_v43 = vld [vmem:[#allocation5 + $0x18] sm:$0xff]   ;;  %v3323_v44 = vld [vmem:[#allocation5 + $0x20] sm:$0xff]   ;;  %p3677_p13 = pnand %p3676_p12, %p4597_p1  ;;  %s3681_s14 = scalar_lea.vmem %s3680_s18, 1024 }
 0x114   : > { %2854 = vmatpush3.bf16.msra.mxu0 %v3318_v4  ;;  %v3336_v45 = vld [vmem:[#allocation8 + $0x90] sm:$0xff]   ;;  %v3338_v46 = vld [vmem:[#allocation8 + $0xd8] sm:$0xff]   ;;  %v3324_v48 = vld [vmem:[#allocation5 + $0x28] sm:$0xff]   ;;  %s4503_s17 = scalar_lea.hbm %s4596_s28, %s2601_s20  ;;  %p3682_p2 = scmp.lt.s32.totalorder %s4497_s22, %s3680_s18 }
 0x115   : > { %2619 = vmatprep.subr.bf16.mxu0 %v3325_v16  ;;  %v3340_v47 = vld [vmem:[#allocation8 + $0x98] sm:$0xff]   ;;  %v3341_v49 = vld [vmem:[#allocation8 + $0x60] sm:$0xff]   ;;  %v3345_v53 = vld [vmem:[#allocation8 + $0x68] sm:$0xff]   ;;  %p3678_p0 = pneg %p3677_p13  ;;  %p3683_p8 = scmp.lt.s32.totalorder %s3681_s14, %s3675_s29 }
 0x116   : > { %v3342_v50 = vld [vmem:[#allocation8 + $0xe0] sm:$0xff]   ;;  %v3346_v54 = vld [vmem:[#allocation8 + $0xe8] sm:$0xff]   ;;  %v3349_v57 = vld [vmem:[#allocation8 + $0x70] sm:$0xff]  }
 0x117   : > { %2856 = vmatmul.mubr.msk.bf16.vlgmr.msra.gmra.mrb[0].mxu0 %vm503_vm0, %v476_v10  ;;  %v3343_v51 = vld [vmem:[#allocation8 + $0x20] sm:$0xff]   ;;  %v3347_v55 = vld [vmem:[#allocation8 + $0x28] sm:$0xff]   ;;  %v3350_v58 = vld [vmem:[#allocation8 + $0xf0] sm:$0xff]   ;;  %p3684_p4 = por %p3683_p8, %p3682_p2 }
 0x118   : > { %2859 = vmatprep.mubr.msk.bf16.mxu0 %vm503_vm0, %v477_v11  ;;  %2620 = vmatpush3.bf16.msra.mxu0 %v3327_v17  ;;  %v3344_v52 = vld [vmem:[#allocation8 + $0xa0] sm:$0xff]   ;;  %v3348_v56 = vld [vmem:[#allocation8 + $0xa8] sm:$0xff]   ;;  %v3351_v59 = vld [vmem:[#allocation8 + $0x30] sm:$0xff]  }
 0x119   : > { %2621 = vmatprep.subr.bf16.mxu0 %v3329_v18  ;;  %v3352_v60 = vld [vmem:[#allocation8 + $0xb0] sm:$0xff]   ;;  %v3353_v61 = vld [vmem:[#allocation8 + $0x78] sm:$0xff]   ;;  %v3357_v1 = vld [vmem:[#allocation8 + $0x140] sm:$0xff]   ;;  %p3685_p10 = pnand %p3684_p4, %p3678_p0 }
 0x11a   : > { %v3354_v62 = vld [vmem:[#allocation8 + $0xf8] sm:$0xff]   ;;  %v3358_v2 = vld [vmem:[#allocation8 + $0x1c0] sm:$0xff]  }
 0x11b   : > { %v3355_v63 = vld [vmem:[#allocation8 + $0x38] sm:$0xff]  }
 0x11c   : > { %2622 = vmatpush3.bf16.msra.mxu0 %v3331_v19  ;;  %v3356_v0 = vld [vmem:[#allocation8 + $0xb8] sm:$0xff]  }
 0x11d   : > { %2623 = vmatprep.subr.bf16.mxu0 %v3333_v20 }
 0x11f   : > { %2860 = vmatmul.mubr.msk.bf16.gmra.mrb[4].mxu0 %vm503_vm0, %v478_v14 }
 0x120   : > { %2624 = vmatpush3.bf16.msra.mxu0 %v3335_v21 }
 0x121   : > { %2625 = vmatprep.subr.bf16.mxu0 %v3337_v22 }
 0x124   : > { %2626 = vmatpush3.bf16.msra.mxu0 %v3339_v23 }
 0x125   : > { %2627 = vmatprep.subr.bf16.mxu0 %v3341_v49 }
 0x128   : > { %2628 = vmatpush3.bf16.msra.mxu0 %v3343_v51 }
 0x129   : > { %2629 = vmatprep.subr.bf16.mxu0 %v3345_v53 }
 0x12c   : > { %2630 = vmatpush3.bf16.msra.mxu0 %v3347_v55 }
 0x12d   : > { %2631 = vmatprep.subr.bf16.mxu0 %v3349_v57 }
 0x130   : > { %2632 = vmatpush3.bf16.msra.mxu0 %v3351_v59 }
 0x131   : > { %2633 = vmatprep.subr.bf16.mxu0 %v3353_v61 }
 0x134   : > { %2634 = vmatpush3.bf16.msra.mxu0 %v3355_v63  ;;  %v3360_v63 = vld [vmem:[#allocation8 + $0x180] sm:$0xff]  }
 0x135   : > { %2675 = vmatprep.subr.bf16.mxu0 %v3357_v1 }
 0x1ea   : > { %v2857_v24 = vpop.f32.mrb[0].mxu0 }
 0x1eb   : > { %v550_v25 = vpop.f32.mrb[1].mxu0 }
 0x1ec   : > { %v2858_v26 = vpop.f32.mrb[2].mxu0 }
 0x1ed   : > { %v594_v27 = vpack.c.bf16 %v2858_v26, %v2857_v24  ;;  %v553_v28 = vpop.f32.mrb[3].mxu0 }
 0x1ee   : > { %v593_v29 = vpack.c.bf16 %v553_v28, %v550_v25 }
 0x1f0   : > { %2863 = vmatprep.subr.bf16.mxu1 %v593_v29 }
 0x1f1   : > { %2864 = vmatpush3.bf16.msra.mxu1 %v593_v29 }
 0x1f2   : > { %v2861_v30 = vpop.f32.mrb[4].mxu0  ;;  %2865 = vmatprep.subr.bf16.mxu1 %v594_v27 }
 0x1f3   : > { %v566_v31 = vpop.f32.mrb[5].mxu0 }
 0x1f4   : > { %v2862_v32 = vpop.f32.mrb[6].mxu0 }
 0x1f5   : > { %v596_v33 = vpack.c.bf16 %v2862_v32, %v2861_v30  ;;  %v569_v34 = vpop.f32.mrb[7].mxu0  ;;  %2866 = vmatpush3.bf16.msra.mxu1 %v594_v27 }
 0x1f6   : > { %v595_v35 = vpack.c.bf16 %v569_v34, %v566_v31 }
 0x1f8   : > { %2867 = vmatprep.subr.bf16.mxu1 %v595_v35 }
 0x1f9   : > { %2868 = vmatpush3.bf16.msra.mxu1 %v595_v35 }
 0x1fa   : > { %2869 = vmatprep.subr.bf16.mxu1 %v596_v33 }
 0x1fd   : > { %2870 = vmatpush3.bf16.msra.mxu1 %v596_v33 }
 0x1fe   : > { %2647 = vmatprep.subr.bf16.mxu1 %v3326_v36 }
 0x200   : > { %2872 = vmatmul.mubr.msk.bf16.vlgmr.msra.gmra.mrb[0].mxu1 %vm627_vm1, %v3320_v37 }
 0x201   : > { %2875 = vmatprep.mubr.msk.bf16.mxu1 %vm627_vm1, %v3321_v38  ;;  %2648 = vmatpush3.bf16.msra.mxu1 %v3328_v39 }
 0x202   : > { %2649 = vmatprep.subr.bf16.mxu1 %v3330_v40 }
 0x205   : > { %2650 = vmatpush3.bf16.msra.mxu1 %v3332_v41 }
 0x206   : > { %2651 = vmatprep.subr.bf16.mxu1 %v3334_v42 }
 0x208   : > { %2876 = vmatmul.mubr.msk.bf16.gmra.mrb[4].mxu1 %vm627_vm1, %v3322_v43 }
 0x209   : > { %2879 = vmatprep.mubr.msk.bf16.mxu1 %vm627_vm1, %v3323_v44  ;;  %2652 = vmatpush3.bf16.msra.mxu1 %v3336_v45 }
 0x20a   : > { %2653 = vmatprep.subr.bf16.mxu1 %v3338_v46 }
 0x20d   : > { %2654 = vmatpush3.bf16.msra.mxu1 %v3340_v47 }
 0x20e   : > { %2655 = vmatprep.subr.bf16.mxu1 %v3342_v50 }
 0x210   : > { %2880 = vmatmul.mubr.msk.bf16.gmra.mrb[8].mxu1 %vm627_vm1, %v3324_v48 }
 0x211   : > { %2656 = vmatpush3.bf16.msra.mxu1 %v3344_v52 }
 0x212   : > { %2657 = vmatprep.subr.bf16.mxu1 %v3346_v54 }
 0x215   : > { %2658 = vmatpush3.bf16.msra.mxu1 %v3348_v56 }
 0x216   : > { %2659 = vmatprep.subr.bf16.mxu1 %v3350_v58 }
 0x219   : > { %2660 = vmatpush3.bf16.msra.mxu1 %v3352_v60 }
 0x21a   : > { %2661 = vmatprep.subr.bf16.mxu1 %v3354_v62  ;;  %v3359_v62 = vld [vmem:[#allocation8 + $0x100] sm:$0xff]  }
 0x21d   : > { %2662 = vmatpush3.bf16.msra.mxu1 %v3356_v0 }
 0x21e   : > { %2703 = vmatprep.subr.bf16.mxu1 %v3358_v2 }
 0x2d3   : > { %v4181_v3 = vpop.f32.mrb[0].mxu1 }
 0x2d4   : > { %v4183_v4 = vpop.f32.mrb[1].mxu1  ;;  %v737_v5 = vrot.slane %v4181_v3, 4  ;;  %v775_v6 = vrot.slane %v4181_v3, 5  ;;  %v809_v7 = vrot.slane %v4181_v3, 6  ;;  %v843_v9 = vrot.slane %v4181_v3, 7 }
 0x2d5   : > { %v4188_v8 = vpop.f32.mrb[2].mxu1  ;;  %v757_v10 = vrot.slane %v4183_v4, 1  ;;  %v791_v11 = vrot.slane %v4183_v4, 2  ;;  %v825_v12 = vrot.slane %v4183_v4, 3  ;;  %v858_v22 = vrot.slane %v4183_v4, 4 }
 0x2d6   : > { %v683_v13 = vpop.f32.mrb[3].mxu1  ;;  %v870_v14 = vpack.c.bf16 %v4188_v8, %v4183_v4  ;;  %v760_v30 = vrot.slane %v4188_v8, 1  ;;  %v794_v33 = vrot.slane %v4188_v8, 2  ;;  %v828_v34 = vrot.slane %v4188_v8, 3 }
 0x2d7   : > { %v758_v15 = vrot.slane %v683_v13, 1  ;;  %v792_v16 = vrot.slane %v683_v13, 2  ;;  %v826_v17 = vrot.slane %v683_v13, 3  ;;  %v736_v18 = vrot.slane %v683_v13, 4 }
 0x2d8   : > { %v774_v19 = vrot.slane %v683_v13, 5  ;;  %v808_v20 = vrot.slane %v683_v13, 6  ;;  %v842_v21 = vrot.slane %v683_v13, 7 }
 0x2d9   : > { %v759_v23 = vsel %vm756_vm4, %v757_v10, %v758_v15  ;;  %v4199_v24 = vsel %vm790_vm7, %v791_v11, %v792_v16  ;;  %v4202_v25 = vsel %vm824_vm8, %v825_v12, %v826_v17  ;;  %v738_v26 = vsel %vm735_vm2, %v736_v18, %v737_v5  ;;  %v3361_v5 = vld [vmem:[#allocation8 + $0x148] sm:$0xff]  }
 0x2da   : > { %v776_v27 = vsel %vm773_vm3, %v774_v19, %v775_v6  ;;  %v4207_v28 = vsel %vm807_vm5, %v808_v20, %v809_v7  ;;  %v4210_v29 = vsel %vm841_vm6, %v842_v21, %v843_v9  ;;  %v4216_v32 = vsel %vm735_vm2, %v858_v22, %v736_v18  ;;  %v3362_v6 = vld [vmem:[#allocation8 + $0x1c8] sm:$0xff]  }
 0x2db   : > { %v4213_v31 = vpop.f32.mrb[4].mxu1  ;;  %v3363_v22 = vld [vmem:[#allocation8 + $0x108] sm:$0xff]  }
 0x2dc   : > { %v763_v35 = vrot.slane %v4213_v31, 1  ;;  %v797_v36 = vrot.slane %v4213_v31, 2  ;;  %v4222_v37 = vpop.f32.mrb[5].mxu1  ;;  %v831_v38 = vrot.slane %v4213_v31, 3 }
 0x2dd   : > { %v761_v39 = vrot.slane %v4222_v37, 1  ;;  %v795_v40 = vrot.slane %v4222_v37, 2  ;;  %v829_v41 = vrot.slane %v4222_v37, 3  ;;  %v4228_v42 = vpop.f32.mrb[6].mxu1  ;;  %v739_v44 = vrot.slane %v4222_v37, 4 }
 0x2de   : > { %v4230_v43 = vpop.f32.mrb[7].mxu1  ;;  %v777_v45 = vrot.slane %v4222_v37, 5  ;;  %v742_v46 = vrot.slane %v4228_v42, 4  ;;  %v764_v47 = vrot.slane %v4228_v42, 1  ;;  %v811_v54 = vrot.slane %v4222_v37, 6 }
 0x2df   : > { %v740_v48 = vrot.slane %v4230_v43, 4  ;;  %v778_v49 = vrot.slane %v4230_v43, 5  ;;  %v812_v50 = vrot.slane %v4230_v43, 6  ;;  %v846_v51 = vrot.slane %v4230_v43, 7 }
 0x2e0   : > { %v762_v52 = vsel %vm756_vm4, %v760_v30, %v761_v39  ;;  %v4242_v53 = vsel %vm756_vm4, %v763_v35, %v764_v47  ;;  %v845_v55 = vrot.slane %v4222_v37, 7  ;;  %v4251_v59 = vsel %vm790_vm7, %v794_v33, %v795_v40  ;;  %v3364_v35 = vld [vmem:[#allocation8 + $0x188] sm:$0xff]   ;;  %v3375_v37 = vld [vmem:[#allocation8 + $0x120] sm:$0xff]  }
 0x2e1   : > { %v741_v56 = vsel %vm735_vm2, %v739_v44, %v740_v48  ;;  %v779_v57 = vsel %vm773_vm3, %v777_v45, %v778_v49  ;;  %v872_v58 = vpack.c.bf16 %v762_v52, %v759_v23  ;;  %v4254_v0 = vsel %vm807_vm5, %v811_v54, %v812_v50  ;;  %v3365_v49 = vld [vmem:[#allocation8 + $0x150] sm:$0xff]  }
 0x2e2   : > { %v871_v60 = vpack.c.bf16 %v741_v56, %v738_v26  ;;  %v873_v61 = vpack.c.bf16 %v779_v57, %v776_v27  ;;  %v4257_v1 = vsel %vm841_vm6, %v845_v55, %v846_v51  ;;  %v875_v7 = vpack.c.bf16 %v4254_v0, %v4207_v28  ;;  %v3366_v50 = vld [vmem:[#allocation8 + $0x1d0] sm:$0xff]  }
 0x2e3   : > { %v4259_v2 = vpop.f32.mrb[8].mxu1  ;;  %v877_v9 = vpack.c.bf16 %v4257_v1, %v4210_v29  ;;  %v874_v10 = vpack.c.bf16 %v4251_v59, %v4199_v24  ;;  %v4268_v11 = vsel %vm824_vm8, %v828_v34, %v829_v41  ;;  %v780_v15 = vrot.slane %v4228_v42, 5  ;;  %v3367_v57 = vld [vmem:[#allocation8 + $0x110] sm:$0xff]   ;;  %v3396_v24 = vld [vmem:[#allocation8 + $0x218] sm:$0xff]   ;;  %v3398_v59 = vld [vmem:[#allocation8 + $0x220] sm:$0xff]  }
 0x2e4   : > { %v4270_v12 = vpop.f32.mrb[9].mxu1  ;;  %1569 = vmatprep.mubr.bf16.mxu0 %v871_v60  ;;  %1618 = vmatprep.mubr.bf16.mxu1 %v873_v61  ;;  %v745_v13 = vrot.slane %v4259_v2, 4  ;;  %v783_v16 = vrot.slane %v4259_v2, 5  ;;  %v876_v17 = vpack.c.bf16 %v4268_v11, %v4202_v25  ;;  %v767_v23 = vrot.slane %v4259_v2, 1  ;;  %v3397_v25 = vld [vmem:[#allocation8 + $0x260] sm:$0xff]   ;;  %v3400_v11 = vld [vmem:[#allocation8 + $0x228] sm:$0xff]  }
 0x2e5   : > { %v743_v18 = vrot.slane %v4270_v12, 4  ;;  %v781_v19 = vrot.slane %v4270_v12, 5  ;;  %v815_v20 = vrot.slane %v4270_v12, 6  ;;  %v4280_v21 = vpop.f32.mrb[10].mxu1  ;;  %1570 = vmatmul.mubr.bf16.vlgmr.msra.gmra.mrb[8].mxu0 %v870_v14  ;;  %1619 = vmatmul.mubr.bf16.vlgmr.msra.gmra.mrb[12].mxu1 %v872_v58  ;;  %v849_v26 = vrot.slane %v4270_v12, 7  ;;  %v3368_v58 = vld [vmem:[#allocation8 + $0x190] sm:$0xff]  }
 0x2e6   : > { %v746_v27 = vrot.slane %v4280_v21, 4  ;;  %v784_v30 = vrot.slane %v4280_v21, 5  ;;  %v818_v33 = vrot.slane %v4280_v21, 6  ;;  %2676 = vmatpush3.bf16.msra.mxu0 %v3359_v62  ;;  %2704 = vmatpush3.bf16.msra.mxu1 %v3360_v63  ;;  %v4290_v34 = vpop.f32.mrb[11].mxu1  ;;  %v852_v4 = vrot.slane %v4280_v21, 7 }
 0x2e7   : > { %v766_v14 = vrot.slane %v4290_v34, 1  ;;  %v800_v39 = vrot.slane %v4290_v34, 2  ;;  %v834_v40 = vrot.slane %v4290_v34, 3  ;;  %2677 = vmatprep.subr.bf16.mxu0 %v3361_v5  ;;  %2705 = vmatprep.subr.bf16.mxu1 %v3362_v6  ;;  %v744_v41 = vsel %vm735_vm2, %v742_v46, %v743_v18 }
 0x2e8   : > { %v747_v45 = vsel %vm735_vm2, %v745_v13, %v746_v27  ;;  %v782_v47 = vsel %vm773_vm3, %v780_v15, %v781_v19  ;;  %v785_v48 = vsel %vm773_vm3, %v783_v16, %v784_v30  ;;  %v880_v54 = vpack.c.bf16 %v4290_v34, %v4213_v31  ;;  %v3370_v16 = vld [vmem:[#allocation8 + $0x1d8] sm:$0xff]  }
 0x2e9   : > { %v881_v51 = vpack.c.bf16 %v747_v45, %v744_v41  ;;  %v883_v52 = vpack.c.bf16 %v785_v48, %v782_v47  ;;  %v768_v55 = vsel %vm756_vm4, %v766_v14, %v767_v23  ;;  %v814_v60 = vrot.slane %v4228_v42, 6  ;;  %v3372_v14 = vld [vmem:[#allocation8 + $0x198] sm:$0xff]   ;;  %v3374_v45 = vld [vmem:[#allocation8 + $0x1e0] sm:$0xff]   ;;  %v3384_v48 = vld [vmem:[#allocation8 + $0x1b0] sm:$0xff]  }
 0x2ea   : > { %2678 = vmatpush3.bf16.msra.mxu0 %v3363_v22  ;;  %2706 = vmatpush3.bf16.msra.mxu1 %v3364_v35  ;;  %v882_v56 = vpack.c.bf16 %v768_v55, %v4242_v53  ;;  %v817_v61 = vrot.slane %v4259_v2, 6  ;;  %v848_v62 = vrot.slane %v4228_v42, 7  ;;  %v851_v63 = vrot.slane %v4259_v2, 7  ;;  %v3369_v53 = vld [vmem:[#allocation8 + $0x158] sm:$0xff]   ;;  %v3390_v55 = vld [vmem:[#allocation8 + $0x200] sm:$0xff]  }
 0x2eb   : > { %1577 = vmatprep.mubr.bf16.mxu0 %v881_v51  ;;  %1626 = vmatprep.mubr.bf16.mxu1 %v883_v52  ;;  %v798_v5 = vrot.slane %v4228_v42, 2  ;;  %v801_v6 = vrot.slane %v4259_v2, 2  ;;  %v832_v15 = vrot.slane %v4228_v42, 3  ;;  %v4316_v18 = vsel %vm807_vm5, %v814_v60, %v815_v20  ;;  %v3379_v42 = vld [vmem:[#allocation8 + $0x128] sm:$0xff]   ;;  %v3387_v51 = vld [vmem:[#allocation8 + $0x138] sm:$0xff]   ;;  %v3394_v60 = vld [vmem:[#allocation8 + $0x210] sm:$0xff]  }
 0x2ec   : > { %2679 = vmatprep.subr.bf16.mxu0 %v3365_v49  ;;  %2707 = vmatprep.subr.bf16.mxu1 %v3366_v50  ;;  %v4319_v19 = vsel %vm807_vm5, %v817_v61, %v818_v33  ;;  %v4322_v22 = vsel %vm841_vm6, %v848_v62, %v849_v26  ;;  %v835_v23 = vrot.slane %v4259_v2, 3  ;;  %v864_v27 = vrot.slane %v4290_v34, 4  ;;  %v3371_v33 = vld [vmem:[#allocation8 + $0x118] sm:$0xff]   ;;  %v3381_v2 = vld [vmem:[#allocation8 + $0x170] sm:$0xff]  }
 0x2ed   : > { %1578 = vmatmul.mubr.bf16.gmra.mrb[12].mxu0 %v880_v54  ;;  %1627 = vmatmul.mubr.bf16.gmra.mrb[16].mxu1 %v882_v56  ;;  %v885_v30 = vpack.c.bf16 %v4319_v19, %v4316_v18  ;;  %v4329_v35 = vsel %vm841_vm6, %v851_v63, %v852_v4  ;;  %v4334_v20 = vsel %vm790_vm7, %v797_v36, %v798_v5  ;;  %v860_v26 = vrot.slane %v4188_v8, 4  ;;  %v3373_v8 = vld [vmem:[#allocation8 + $0x160] sm:$0xff]   ;;  %v3385_v49 = vld [vmem:[#allocation8 + $0x178] sm:$0xff]   ;;  %v3391_v56 = vld [vmem:[#allocation8 + $0x248] sm:$0xff]  }
 0x2ee   : > { %2680 = vmatpush3.bf16.msra.mxu0 %v3367_v57  ;;  %2708 = vmatpush3.bf16.msra.mxu1 %v3368_v58  ;;  %v887_v34 = vpack.c.bf16 %v4329_v35, %v4322_v22  ;;  %v4340_v41 = vsel %vm790_vm7, %v800_v39, %v801_v6  ;;  %v4345_v4 = vsel %vm824_vm8, %v831_v38, %v832_v15  ;;  %v862_v36 = vrot.slane %v4213_v31, 4  ;;  %v3386_v50 = vld [vmem:[#allocation8 + $0x1f8] sm:$0xff]   ;;  %v3389_v54 = vld [vmem:[#allocation8 + $0x240] sm:$0xff]   ;;  %v3392_v57 = vld [vmem:[#allocation8 + $0x208] sm:$0xff]  }
 0x2ef   : > { %1667 = vmatprep.mubr.bf16.mxu0 %v875_v7  ;;  %1716 = vmatprep.mubr.bf16.mxu1 %v877_v9  ;;  %v884_v39 = vpack.c.bf16 %v4340_v41, %v4334_v20  ;;  %v836_v47 = vsel %vm824_vm8, %v834_v40, %v835_v23  ;;  %v879_v38 = vpack.c.bf16 %v4230_v43, %v4181_v3  ;;  %v3376_v43 = vld [vmem:[#allocation8 + $0x1a0] sm:$0xff]   ;;  %v3377_v7 = vld [vmem:[#allocation8 + $0x168] sm:$0xff]   ;;  %v3383_v40 = vld [vmem:[#allocation8 + $0x130] sm:$0xff]  }
 0x2f0   : > { %2681 = vmatprep.subr.bf16.mxu0 %v3369_v53  ;;  %2709 = vmatprep.subr.bf16.mxu1 %v3370_v16  ;;  %v886_v31 = vpack.c.bf16 %v836_v47, %v4345_v4  ;;  %v4363_v28 = vsel %vm735_vm2, %v860_v26, %v739_v44  ;;  %v889_v29 = vpack.c.bf16 %v4280_v21, %v4270_v12  ;;  %v3378_v9 = vld [vmem:[#allocation8 + $0x1e8] sm:$0xff]   ;;  %v3388_v52 = vld [vmem:[#allocation8 + $0x1b8] sm:$0xff]   ;;  %v3393_v58 = vld [vmem:[#allocation8 + $0x250] sm:$0xff]  }
 0x2f1   : > { %v878_v0 = vpack.c.bf16 %v4363_v28, %v4216_v32  ;;  %v4372_v1 = vsel %vm735_vm2, %v862_v36, %v742_v46  ;;  %v4377_v3 = vsel %vm735_vm2, %v864_v27, %v745_v13  ;;  %v3380_v46 = vld [vmem:[#allocation8 + $0x1a8] sm:$0xff]   ;;  %v3382_v13 = vld [vmem:[#allocation8 + $0x1f0] sm:$0xff]   ;;  %v3395_v61 = vld [vmem:[#allocation8 + $0x258] sm:$0xff]  }
 0x2f2   : > { %2682 = vmatpush3.bf16.msra.mxu0 %v3371_v33  ;;  %2710 = vmatpush3.bf16.msra.mxu1 %v3372_v14  ;;  %v888_v44 = vpack.c.bf16 %v4377_v3, %v4372_v1  ;;  %v3402_v62 = vld [vmem:[#allocation8 + $0x230] sm:$0xff]   ;;  %v3403_v63 = vld [vmem:[#allocation8 + $0x278] sm:$0xff]   ;;  %v1782_v6 = vld [vmem:[#allocation11] sm:$0xff] }
 0x2f3   : > { %2683 = vmatprep.subr.bf16.mxu0 %v3373_v8  ;;  %2711 = vmatprep.subr.bf16.mxu1 %v3374_v45  ;;  %v3404_v5 = vld [vmem:[#allocation8 + $0x238] sm:$0xff]   ;;  %v1783_v15 = vld [vmem:[#allocation11 + $0x8] sm:$0xff]  ;;  %v1786_v32 = vld [vmem:[#allocation11 + $0x20] sm:$0xff] }
 0x2f4   : > { %v4399_v53 = vpack.c.bf16 %v1783_v15, %v1782_v6  ;;  %v1784_v16 = vld [vmem:[#allocation11 + $0x10] sm:$0xff]  ;;  %v1785_v18 = vld [vmem:[#allocation11 + $0x18] sm:$0xff]  ;;  %v1787_v22 = vld [vmem:[#allocation11 + $0x28] sm:$0xff] }
 0x2f5   : > { %v4403_v19 = vpack.c.bf16 %v1785_v18, %v1784_v16  ;;  %v4405_v12 = vpack.c.bf16 %v1787_v22, %v1786_v32  ;;  %v1788_v21 = vld [vmem:[#allocation11 + $0x30] sm:$0xff]  ;;  %v1789_v23 = vld [vmem:[#allocation11 + $0x38] sm:$0xff]  ;;  %v1791_v35 = vld [vmem:[#allocation11 + $0x48] sm:$0xff] }
 0x2f6   : > { %2684 = vmatpush3.bf16.msra.mxu0 %v3375_v37  ;;  %2712 = vmatpush3.bf16.msra.mxu1 %v3376_v43  ;;  %v4410_v27 = vpack.c.bf16 %v1789_v23, %v1788_v21  ;;  %v1792_v26 = vld [vmem:[#allocation11 + $0x50] sm:$0xff]  ;;  %v1793_v33 = vld [vmem:[#allocation11 + $0x58] sm:$0xff]  ;;  %v1795_v41 = vld [vmem:[#allocation11 + $0x68] sm:$0xff] }
 0x2f7   : > { %2685 = vmatprep.subr.bf16.mxu0 %v3377_v7  ;;  %2713 = vmatprep.subr.bf16.mxu1 %v3378_v9  ;;  %v4418_v14 = vpack.c.bf16 %v1793_v33, %v1792_v26  ;;  %v1796_v36 = vld [vmem:[#allocation11 + $0x70] sm:$0xff]  ;;  %v1797_v8 = vld [vmem:[#allocation11 + $0x78] sm:$0xff]  ;;  %v1884_v47 = vld [vmem:[#allocation13 + $0x8] sm:$0xff] }
 0x2f8   : > { %v4427_v45 = vpack.c.bf16 %v1797_v8, %v1796_v36  ;;  %v1886_v28 = vld [vmem:[#allocation13 + $0x18] sm:$0xff]  ;;  %v1888_v1 = vld [vmem:[#allocation13 + $0x28] sm:$0xff]  ;;  %v1889_v37 = vld [vmem:[#allocation13 + $0x30] sm:$0xff] }
 0x2f9   : > { %v1890_v43 = vld [vmem:[#allocation13 + $0x38] sm:$0xff]  ;;  %v1891_v7 = vld [vmem:[#allocation13 + $0x40] sm:$0xff]  ;;  %v1892_v9 = vld [vmem:[#allocation13 + $0x48] sm:$0xff] }
 0x2fa   : > { %2686 = vmatpush3.bf16.msra.mxu0 %v3379_v42  ;;  %2714 = vmatpush3.bf16.msra.mxu1 %v3380_v46  ;;  %v4447_v42 = vpack.c.bf16 %v1892_v9, %v1891_v7  ;;  %v1893_v46 = vld [vmem:[#allocation13 + $0x50] sm:$0xff] }
 0x2fb   : > { %2687 = vmatprep.subr.bf16.mxu0 %v3381_v2  ;;  %2715 = vmatprep.subr.bf16.mxu1 %v3382_v13  ;;  %v1894_v2 = vld [vmem:[#allocation13 + $0x58] sm:$0xff] }
 0x2fc   : > { %v4451_v13 = vpack.c.bf16 %v1894_v2, %v1893_v46 }
 0x2fe   : > { %2688 = vmatpush3.bf16.msra.mxu0 %v3383_v40  ;;  %2716 = vmatpush3.bf16.msra.mxu1 %v3384_v48  ;;  %v1895_v40 = vld [vmem:[#allocation13 + $0x60] sm:$0xff]  ;;  %v1896_v48 = vld [vmem:[#allocation13 + $0x68] sm:$0xff] }
 0x2ff   : > { %2689 = vmatprep.subr.bf16.mxu0 %v3385_v49  ;;  %2717 = vmatprep.subr.bf16.mxu1 %v3386_v50  ;;  %v4455_v49 = vpack.c.bf16 %v1896_v48, %v1895_v40  ;;  %v1897_v50 = vld [vmem:[#allocation13 + $0x70] sm:$0xff] }
 0x302   : > { %2690 = vmatpush3.bf16.msra.mxu0 %v3387_v51  ;;  %2718 = vmatpush3.bf16.msra.mxu1 %v3388_v52  ;;  %v1898_v51 = vld [vmem:[#allocation13 + $0x78] sm:$0xff] }
 0x303   : > { %2731 = vmatprep.subr.bf16.mxu0 %v3389_v54  ;;  %3056 = vmatprep.subr.bf16.mxu1 %v4399_v53  ;;  %v4459_v52 = vpack.c.bf16 %v1898_v51, %v1897_v50 }
 0x305   : > { %1668 = vmatmul.mubr.bf16.vlgmr.msra.gmra.mrb[16].mxu0 %v874_v10  ;;  %1717 = vmatmul.mubr.bf16.vlgmr.msra.gmra.mrb[20].mxu1 %v876_v17  ;;  %v3399_v10 = vld [vmem:[#allocation8 + $0x268] sm:$0xff]   ;;  %v3401_v17 = vld [vmem:[#allocation8 + $0x270] sm:$0xff]  }
 0x306   : > { %1675 = vmatprep.mubr.bf16.mxu0 %v885_v30  ;;  %1724 = vmatprep.mubr.bf16.mxu1 %v887_v34  ;;  %v1790_v30 = vld [vmem:[#allocation11 + $0x40] sm:$0xff] }
 0x307   : > { %2732 = vmatpush3.bf16.msra.mxu0 %v3390_v55  ;;  %3058 = vmatpush3.bf16.msra.mxu1 %v4399_v53  ;;  %v4414_v20 = vpack.c.bf16 %v1791_v35, %v1790_v30  ;;  %v1794_v34 = vld [vmem:[#allocation11 + $0x60] sm:$0xff] }
 0x308   : > { %2733 = vmatprep.subr.bf16.mxu0 %v3391_v56  ;;  %3060 = vmatprep.subr.bf16.mxu1 %v4403_v19  ;;  %v4422_v4 = vpack.c.bf16 %v1795_v41, %v1794_v34  ;;  %v2504_v56 = vld [vmem:[#allocation10] ss:$0 sm:$0xff] }
 0x30b   : > { %2734 = vmatpush3.bf16.msra.mxu0 %v3392_v57  ;;  %3062 = vmatpush3.bf16.msra.mxu1 %v4403_v19 }
 0x30c   : > { %2735 = vmatprep.subr.bf16.mxu0 %v3393_v58  ;;  %3064 = vmatprep.subr.bf16.mxu1 %v4405_v12 }
 0x30d   : > { %1676 = vmatmul.mubr.bf16.gmra.mrb[20].mxu0 %v884_v39  ;;  %1725 = vmatmul.mubr.bf16.gmra.mrb[24].mxu1 %v886_v31  ;;  %v1883_v39 = vld [vmem:[#allocation13] sm:$0xff] }
 0x30e   : > { %1765 = vmatprep.mubr.bf16.mxu0 %v879_v38  ;;  %v1885_v38 = vld [vmem:[#allocation13 + $0x10] sm:$0xff]  ;;  %v4432_v31 = vpack.c.bf16 %v1884_v47, %v1883_v39 }
 0x30f   : > { %2736 = vmatpush3.bf16.msra.mxu0 %v3394_v60  ;;  %3066 = vmatpush3.bf16.msra.mxu1 %v4405_v12 }
 0x310   : > { %2737 = vmatprep.subr.bf16.mxu0 %v3395_v61  ;;  %3068 = vmatprep.subr.bf16.mxu1 %v4410_v27 }
 0x313   : > { %2738 = vmatpush3.bf16.msra.mxu0 %v3396_v24  ;;  %3070 = vmatpush3.bf16.msra.mxu1 %v4410_v27 }
 0x314   : > { %2739 = vmatprep.subr.bf16.mxu0 %v3397_v25  ;;  %3072 = vmatprep.subr.bf16.mxu1 %v4414_v20 }
 0x317   : > { %2740 = vmatpush3.bf16.msra.mxu0 %v3398_v59  ;;  %3074 = vmatpush3.bf16.msra.mxu1 %v4414_v20 }
 0x318   : > { %2741 = vmatprep.subr.bf16.mxu0 %v3399_v10  ;;  %3076 = vmatprep.subr.bf16.mxu1 %v4418_v14 }
 0x31b   : > { %2742 = vmatpush3.bf16.msra.mxu0 %v3400_v11  ;;  %3078 = vmatpush3.bf16.msra.mxu1 %v4418_v14 }
 0x31c   : > { %2743 = vmatprep.subr.bf16.mxu0 %v3401_v17  ;;  %3080 = vmatprep.subr.bf16.mxu1 %v4422_v4 }
 0x31f   : > { %2744 = vmatpush3.bf16.msra.mxu0 %v3402_v62  ;;  %3082 = vmatpush3.bf16.msra.mxu1 %v4422_v4 }
 0x320   : > { %2745 = vmatprep.subr.bf16.mxu0 %v3403_v63  ;;  %3084 = vmatprep.subr.bf16.mxu1 %v4427_v45 }
 0x323   : > { %2746 = vmatpush3.bf16.msra.mxu0 %v3404_v5  ;;  %3086 = vmatpush3.bf16.msra.mxu1 %v4427_v45 }
 0x324   : > { %3120 = vmatprep.subr.bf16.mxu1 %v4399_v53  ;;  %3088 = vmatprep.subr.bf16.mxu0 %v4432_v31 }
 0x326   : > { %1766 = vmatmul.mubr.bf16.vlgmr.msra.gmra.mrb[24].mxu0 %v878_v0  ;;  %v1887_v0 = vld [vmem:[#allocation13 + $0x20] sm:$0xff] }
 0x327   : > { %1773 = vmatprep.mubr.bf16.mxu0 %v889_v29  ;;  %v4434_v29 = vpack.c.bf16 %v1886_v28, %v1885_v38  ;;  %3090 = vmatpush3.bf16.msra.mxu0 %v4432_v31  ;;  %v4439_v3 = vpack.c.bf16 %v1888_v1, %v1887_v0 }
 0x329   : > { %3092 = vmatprep.subr.bf16.mxu0 %v4434_v29 }
 0x32b   : > { %3094 = vmatpush3.bf16.msra.mxu0 %v4434_v29 }
 0x32c   : > { %3096 = vmatprep.subr.bf16.mxu0 %v4439_v3 }
 0x32e   : > { %1774 = vmatmul.mubr.bf16.gmra.mrb[28].mxu0 %v888_v44  ;;  %v4443_v44 = vpack.c.bf16 %v1890_v43, %v1889_v37 }
 0x32f   : > { %3098 = vmatpush3.bf16.msra.mxu0 %v4439_v3 }
 0x330   : > { %3100 = vmatprep.subr.bf16.mxu0 %v4443_v44 }
 0x333   : > { %3102 = vmatpush3.bf16.msra.mxu0 %v4443_v44 }
 0x334   : > { %3104 = vmatprep.subr.bf16.mxu0 %v4447_v42 }
 0x337   : > { %3106 = vmatpush3.bf16.msra.mxu0 %v4447_v42 }
 0x338   : > { %3108 = vmatprep.subr.bf16.mxu0 %v4451_v13 }
 0x33b   : > { %3110 = vmatpush3.bf16.msra.mxu0 %v4451_v13 }
 0x33c   : > { %3112 = vmatprep.subr.bf16.mxu0 %v4455_v49 }
 0x33f   : > { %3114 = vmatpush3.bf16.msra.mxu0 %v4455_v49 }
 0x340   : > { %3116 = vmatprep.subr.bf16.mxu0 %v4459_v52 }
 0x343   : > { %3118 = vmatpush3.bf16.msra.mxu0 %v4459_v52 }
 0x344   : > { %3152 = vmatprep.subr.bf16.mxu0 %v4432_v31 }
 0x3b8   : > { %v2635_v54 = vpop.f32.mrb[8].mxu0  ;;  %v2663_v55 = vpop.f32.mrb[12].mxu1 }
 0x3b9   : > { %v2636_v57 = vpop.f32.mrb[9].mxu0  ;;  %v2664_v58 = vpop.f32.mrb[13].mxu1 }
 0x3ba   : > { %v2637_v60 = vadd.f32 %v2636_v57, %v2635_v54  ;;  %v2665_v61 = vadd.f32 %v2664_v58, %v2663_v55  ;;  %v2638_v24 = vpop.f32.mrb[10].mxu0  ;;  %v2666_v25 = vpop.f32.mrb[14].mxu1 }
 0x3bb   : > { %v2639_v59 = vpop.f32.mrb[11].mxu0  ;;  %v2667_v10 = vpop.f32.mrb[15].mxu1 }
 0x3bc   : > { %v1572_v11 = vadd.f32 %v2637_v60, %v2504_v56  ;;  %v2640_v17 = vadd.f32 %v2639_v59, %v2638_v24  ;;  %v2668_v62 = vadd.f32 %v2667_v10, %v2666_v25 }
 0x3be   : > { %v1621_v63 = vadd.f32 %v2665_v61, %v1572_v11  ;;  %v1575_v5 = vadd.f32 %v2640_v17, %v2504_v56 }
 0x3c0   : > { %v1624_v6 = vadd.f32 %v2668_v62, %v1575_v5  ;;  %v2641_v15 = vpop.f32.mrb[12].mxu0  ;;  %v2669_v16 = vpop.f32.mrb[16].mxu1 }
 0x3c1   : > { %v2642_v18 = vpop.f32.mrb[13].mxu0  ;;  %v2670_v32 = vpop.f32.mrb[17].mxu1 }
 0x3c2   : > { %v2643_v22 = vadd.f32 %v2642_v18, %v2641_v15  ;;  %v2671_v21 = vadd.f32 %v2670_v32, %v2669_v16  ;;  %v2644_v23 = vpop.f32.mrb[14].mxu0  ;;  %v2672_v30 = vpop.f32.mrb[18].mxu1 }
 0x3c3   : > { %v2645_v35 = vpop.f32.mrb[15].mxu0  ;;  %v2673_v26 = vpop.f32.mrb[19].mxu1 }
 0x3c4   : > { %v1580_v33 = vadd.f32 %v2643_v22, %v2504_v56  ;;  %v2646_v34 = vadd.f32 %v2645_v35, %v2644_v23  ;;  %v2674_v41 = vadd.f32 %v2673_v26, %v2672_v30 }
 0x3c6   : > { %v1629_v36 = vadd.f32 %v2671_v21, %v1580_v33  ;;  %v1583_v8 = vadd.f32 %v2646_v34, %v2504_v56 }
 0x3c8   : > { %v1632_v39 = vadd.f32 %v2674_v41, %v1583_v8 }
 0x3d8   : > { %v2691_v47 = vpop.f32.mrb[16].mxu0  ;;  %v2719_v38 = vpop.f32.mrb[20].mxu1 }
 0x3d9   : > { %v2692_v28 = vpop.f32.mrb[17].mxu0  ;;  %v2720_v0 = vpop.f32.mrb[21].mxu1 }
 0x3da   : > { %v2693_v1 = vadd.f32 %v2692_v28, %v2691_v47  ;;  %v2721_v37 = vadd.f32 %v2720_v0, %v2719_v38  ;;  %v2694_v43 = vpop.f32.mrb[18].mxu0  ;;  %v2722_v7 = vpop.f32.mrb[22].mxu1  ;;  %v3406_v28 = vld [vmem:[#allocation14 + $0x8] sm:$0xff]   ;;  %v3408_v0 = vld [vmem:[#allocation14 + $0x18] sm:$0xff]  }
 0x3db   : > { %v2695_v9 = vpop.f32.mrb[19].mxu0  ;;  %v2723_v46 = vpop.f32.mrb[23].mxu1 }
 0x3dc   : > { %v1670_v2 = vadd.f32 %v2693_v1, %v1621_v63  ;;  %v2696_v40 = vadd.f32 %v2695_v9, %v2694_v43  ;;  %v2724_v48 = vadd.f32 %v2723_v46, %v2722_v7  ;;  %v3409_v1 = vld [vmem:[#allocation14 + $0x20] sm:$0xff]  }
 0x3de   : > { %v1719_v50 = vadd.f32 %v2721_v37, %v1670_v2  ;;  %v1673_v51 = vadd.f32 %v2696_v40, %v1624_v6 }
 0x3e0   : > { %v1722_v54 = vadd.f32 %v2724_v48, %v1673_v51  ;;  %v2697_v55 = vpop.f32.mrb[20].mxu0  ;;  %v2725_v57 = vpop.f32.mrb[24].mxu1 }
 0x3e1   : > { %v2698_v56 = vpop.f32.mrb[21].mxu0  ;;  %v2726_v58 = vpop.f32.mrb[25].mxu1 }
 0x3e2   : > { %v2699_v60 = vadd.f32 %v2698_v56, %v2697_v55  ;;  %v2727_v61 = vadd.f32 %v2726_v58, %v2725_v57  ;;  %v2700_v24 = vpop.f32.mrb[22].mxu0  ;;  %v2728_v25 = vpop.f32.mrb[26].mxu1  ;;  %v3410_v57 = vld [vmem:[#allocation14 + $0x28] sm:$0xff]   ;;  %v3411_v56 = vld [vmem:[#allocation14 + $0x30] sm:$0xff]   ;;  %v3412_v58 = vld [vmem:[#allocation14 + $0x38] sm:$0xff]  }
 0x3e3   : > { %v2701_v59 = vpop.f32.mrb[23].mxu0  ;;  %v2729_v10 = vpop.f32.mrb[27].mxu1 }
 0x3e4   : > { %v1678_v11 = vadd.f32 %v2699_v60, %v1629_v36  ;;  %v2702_v17 = vadd.f32 %v2701_v59, %v2700_v24  ;;  %v2730_v62 = vadd.f32 %v2729_v10, %v2728_v25 }
 0x3e6   : > { %v1727_v5 = vadd.f32 %v2727_v61, %v1678_v11  ;;  %v1681_v63 = vadd.f32 %v2702_v17, %v1632_v39 }
 0x3e8   : > { %v1730_v15 = vadd.f32 %v2730_v62, %v1681_v63  ;;  %v2585_v63 = vld [vmem:[#allocation16] ss:$0 sm:$0xff] }
 0x3f9   : > { %v2747_v16 = vpop.f32.mrb[24].mxu0 }
 0x3fa   : > { %v2748_v18 = vpop.f32.mrb[25].mxu0 }
 0x3fb   : > { %v2749_v6 = vadd.f32 %v2748_v18, %v2747_v16  ;;  %v2750_v32 = vpop.f32.mrb[26].mxu0 }
 0x3fc   : > { %v2751_v22 = vpop.f32.mrb[27].mxu0 }
 0x3fd   : > { %v1768_v21 = vadd.f32 %v2749_v6, %v1719_v50  ;;  %v2752_v23 = vadd.f32 %v2751_v22, %v2750_v32 }
 0x3ff   : > { %v1771_v30 = vadd.f32 %v2752_v23, %v1722_v54  ;;  %2915 = vmatprep.mubr.f32.mxu1 %v1768_v21 }
 0x401   : > { %v2753_v35 = vpop.f32.mrb[28].mxu0  ;;  %2916 = vmatmul.mubr.f32.vlgmr.msra.gmra.mrb[28].mxu1 %v1771_v30 }
 0x402   : > { %v2754_v26 = vpop.f32.mrb[29].mxu0  ;;  %3122 = vmatpush3.bf16.msra.mxu1 %v4399_v53 }
 0x403   : > { %v2755_v33 = vadd.f32 %v2754_v26, %v2753_v35  ;;  %v2756_v34 = vpop.f32.mrb[30].mxu0  ;;  %3124 = vmatprep.subr.bf16.mxu1 %v4403_v19 }
 0x404   : > { %v2757_v41 = vpop.f32.mrb[31].mxu0 }
 0x405   : > { %v1776_v36 = vadd.f32 %v2755_v33, %v1727_v5  ;;  %v2758_v8 = vadd.f32 %v2757_v41, %v2756_v34 }
 0x406   : > { %3126 = vmatpush3.bf16.msra.mxu1 %v4403_v19 }
 0x407   : > { %v1779_v39 = vadd.f32 %v2758_v8, %v1730_v15  ;;  %2918 = vmatprep.mubr.f32.mxu1 %v1776_v36  ;;  %3128 = vmatprep.subr.bf16.mxu1 %v4405_v12 }
 0x409   : > { %2919 = vmatmul.mubr.f32.gmra.mrb[30].mxu1 %v1779_v39 }
 0x40a   : > { %3130 = vmatpush3.bf16.msra.mxu1 %v4405_v12 }
 0x40b   : > { %3132 = vmatprep.subr.bf16.mxu1 %v4410_v27 }
 0x40e   : > { %3134 = vmatpush3.bf16.msra.mxu1 %v4410_v27 }
 0x40f   : > { %3136 = vmatprep.subr.bf16.mxu1 %v4414_v20 }
 0x412   : > { %3138 = vmatpush3.bf16.msra.mxu1 %v4414_v20 }
 0x413   : > { %3140 = vmatprep.subr.bf16.mxu1 %v4418_v14 }
 0x416   : > { %3142 = vmatpush3.bf16.msra.mxu1 %v4418_v14 }
 0x417   : > { %3144 = vmatprep.subr.bf16.mxu1 %v4422_v4 }
 0x41a   : > { %3146 = vmatpush3.bf16.msra.mxu1 %v4422_v4 }
 0x41b   : > { %3148 = vmatprep.subr.bf16.mxu1 %v4427_v45 }
 0x41e   : > { %3150 = vmatpush3.bf16.msra.mxu1 %v4427_v45 }
 0x4d4   : > { %v2917_v53 = vpop.f32.mrb[28].mxu1 }
 0x4d5   : > { %v1864_v19 = vpop.f32.mrb[29].mxu1 }
 0x4d6   : > { %2953 = vmatprep.mubr.f32.mxu0 %v1864_v19 }
 0x4d7   : > { %2954 = vmatmul.mubr.f32.vlgmr.msra.gmra.mrb[32].mxu0 %v2917_v53 }
 0x4d8   : > { %3154 = vmatpush3.bf16.msra.mxu0 %v4432_v31 }
 0x4d9   : > { %3156 = vmatprep.subr.bf16.mxu0 %v4434_v29 }
 0x4dc   : > { %v2920_v12 = vpop.f32.mrb[30].mxu1  ;;  %3158 = vmatpush3.bf16.msra.mxu0 %v4434_v29 }
 0x4dd   : > { %v1874_v27 = vpop.f32.mrb[31].mxu1  ;;  %3160 = vmatprep.subr.bf16.mxu0 %v4439_v3 }
 0x4de   : > { %2956 = vmatprep.mubr.f32.mxu0 %v1874_v27 }
 0x4df   : > { %2957 = vmatmul.mubr.f32.gmra.mrb[34].mxu0 %v2920_v12 }
 0x4e0   : > { %3162 = vmatpush3.bf16.msra.mxu0 %v4439_v3 }
 0x4e1   : > { %3164 = vmatprep.subr.bf16.mxu0 %v4443_v44 }
 0x4e4   : > { %3166 = vmatpush3.bf16.msra.mxu0 %v4443_v44 }
 0x4e5   : > { %3168 = vmatprep.subr.bf16.mxu0 %v4447_v42 }
 0x4e8   : > { %3170 = vmatpush3.bf16.msra.mxu0 %v4447_v42 }
 0x4e9   : > { %3172 = vmatprep.subr.bf16.mxu0 %v4451_v13 }
 0x4ec   : > { %3174 = vmatpush3.bf16.msra.mxu0 %v4451_v13 }
 0x4ed   : > { %3176 = vmatprep.subr.bf16.mxu0 %v4455_v49 }
 0x4f0   : > { %3178 = vmatpush3.bf16.msra.mxu0 %v4455_v49  ;;  %v3405_v49 = vld [vmem:[#allocation14] sm:$0xff]  }
 0x4f1   : > { %3180 = vmatprep.subr.bf16.mxu0 %v4459_v52  ;;  %3035 = vmatprep.subr.bf16.mxu1 %v3405_v49 }
 0x4f4   : > { %3182 = vmatpush3.bf16.msra.mxu0 %v4459_v52  ;;  %v3407_v52 = vld [vmem:[#allocation14 + $0x10] sm:$0xff]  }
 0x5aa   : > { %v2955_v20 = vpop.f32.mrb[32].mxu0 }
 0x5ab   : > { %v1985_v14 = vsub.f32 %v1771_v30, %v2955_v20  ;;  %v1965_v4 = vpop.f32.mrb[33].mxu0 }
 0x5ac   : > { %v1984_v45 = vsub.f32 %v1768_v21, %v1965_v4 }
 0x5ad   : > { %v1989_v29 = vmul.f32 %v1985_v14, %v1985_v14 }
 0x5ae   : > { %v1988_v31 = vmul.f32 %v1984_v45, %v1984_v45 }
 0x5b0   : > { %2991 = vmatprep.mubr.f32.mxu1 %v1988_v31 }
 0x5b1   : > { %2992 = vmatmul.mubr.f32.vlgmr.msra.gmra.mrb[32].mxu1 %v1989_v29 }
 0x5b2   : > { %v2958_v3 = vpop.f32.mrb[34].mxu0  ;;  %3036 = vmatpush3.bf16.msra.mxu1 %v3405_v49 }
 0x5b3   : > { %v1987_v44 = vsub.f32 %v1779_v39, %v2958_v3  ;;  %v1975_v42 = vpop.f32.mrb[35].mxu0  ;;  %3037 = vmatprep.subr.bf16.mxu1 %v3406_v28 }
 0x5b4   : > { %v1986_v13 = vsub.f32 %v1776_v36, %v1975_v42 }
 0x5b5   : > { %v1991_v38 = vmul.f32 %v1987_v44, %v1987_v44 }
 0x5b6   : > { %v1990_v47 = vmul.f32 %v1986_v13, %v1986_v13  ;;  %3038 = vmatpush3.bf16.msra.mxu1 %v3406_v28 }
 0x5b7   : > { %3039 = vmatprep.subr.bf16.mxu1 %v3407_v52 }
 0x5b8   : > { %2994 = vmatprep.mubr.f32.mxu1 %v1990_v47 }
 0x5b9   : > { %2995 = vmatmul.mubr.f32.gmra.mrb[34].mxu1 %v1991_v38 }
 0x5ba   : > { %3040 = vmatpush3.bf16.msra.mxu1 %v3407_v52 }
 0x5bb   : > { %3041 = vmatprep.subr.bf16.mxu1 %v3408_v0 }
 0x5be   : > { %3042 = vmatpush3.bf16.msra.mxu1 %v3408_v0 }
 0x5bf   : > { %3043 = vmatprep.subr.bf16.mxu1 %v3409_v1 }
 0x5c2   : > { %3044 = vmatpush3.bf16.msra.mxu1 %v3409_v1 }
 0x5c3   : > { %3045 = vmatprep.subr.bf16.mxu1 %v3410_v57 }
 0x5c6   : > { %3046 = vmatpush3.bf16.msra.mxu1 %v3410_v57 }
 0x5c7   : > { %3047 = vmatprep.subr.bf16.mxu1 %v3411_v56 }
 0x5ca   : > { %3048 = vmatpush3.bf16.msra.mxu1 %v3411_v56 }
 0x5cb   : > { %3049 = vmatprep.subr.bf16.mxu1 %v3412_v58 }
 0x5ce   : > { %3050 = vmatpush3.bf16.msra.mxu1 %v3412_v58 }
 0x684   : > { %v2993_v37 = vpop.f32.mrb[32].mxu1 }
 0x685   : > { %v2064_v43 = vadd.f32 1e-05, %v2993_v37  ;;  %v2058_v7 = vpop.f32.mrb[33].mxu1 }
 0x686   : > { %v2059_v9 = vadd.f32 1e-05, %v2058_v7 }
 0x688   : > { %3413 = vrsqrt.f32 %v2059_v9 }
 0x689   : > { %3415 = vrsqrt.f32 %v2064_v43 }
 0x68c   : > { %v2996_v46 = vpop.f32.mrb[34].mxu1 }
 0x68d   : > { %v2074_v2 = vadd.f32 1e-05, %v2996_v46  ;;  %v2068_v40 = vpop.f32.mrb[35].mxu1 }
 0x68e   : > { %v2069_v48 = vadd.f32 1e-05, %v2068_v40 }
 0x690   : > { %3417 = vrsqrt.f32 %v2069_v48 }
 0x691   : > { %3419 = vrsqrt.f32 %v2074_v2 }
 0x692   : > { %v3414_v50 = vpop.eup %3413 }
 0x693   : > { %v3416_v51 = vpop.eup %3415  ;;  %3029 = vmatprep.mubr.f32.mxu0 %v3414_v50 }
 0x694   : > { %3030 = vmatmul.mubr.f32.vlgmr.msra.gmra.mrb[36].mxu0 %v3416_v51 }
 0x69a   : > { %v3418_v54 = vpop.eup %3417 }
 0x69b   : > { %v3420_v55 = vpop.eup %3419  ;;  %3032 = vmatprep.mubr.f32.mxu0 %v3418_v54 }
 0x69c   : > { %3033 = vmatmul.mubr.f32.gmra.mrb[38].mxu0 %v3420_v55 }
 0x767   : > { %v3031_v60 = vpop.f32.mrb[36].mxu0 }
 0x768   : > { %v2167_v61 = vmul.f32 %v3031_v60, %v1985_v14  ;;  %v2147_v24 = vpop.f32.mrb[37].mxu0 }
 0x769   : > { %v2166_v25 = vmul.f32 %v2147_v24, %v1984_v45 }
 0x76b   : > { %v2170_v59 = vpack.c.bf16 %v2167_v61, %v2166_v25 }
 0x76d   : > { %3051 = vmatprep.mubr.bf16.mxu1 %v2170_v59 }
 0x76f   : > { %v3034_v10 = vpop.f32.mrb[38].mxu0 }
 0x770   : > { %v2169_v11 = vmul.f32 %v3034_v10, %v1987_v44  ;;  %v2157_v17 = vpop.f32.mrb[39].mxu0 }
 0x771   : > { %v2168_v62 = vmul.f32 %v2157_v17, %v1986_v13 }
 0x773   : > { %v2171_v5 = vpack.c.bf16 %v2169_v11, %v2168_v62 }
 0x775   : > { %3052 = vmatmul.mubr.bf16.vlgmr.msra.gmra.mrb[36].mxu1 %v2171_v5 }
 0x848   : > { %v3053_v15 = vpop.f32.mrb[36].mxu1 }
 0x849   : > { %v2286_v16 = vadd.f32 %v3053_v15, %v2585_v63  ;;  %v2277_v18 = vpop.f32.mrb[37].mxu1 }
 0x84a   : > { %v2278_v6 = vadd.f32 %v2585_v63, %v2277_v18  ;;  %v3054_v32 = vpop.f32.mrb[38].mxu1 }
 0x84b   : > { %2294 = vst.msk [vmem:[%s463_s9 + $0x10] sm:$0xff] %vm503_vm0, %v2286_v16  ;;  %v2289_v22 = vadd.f32 %v3054_v32, %v2585_v63  ;;  %v2280_v21 = vpop.f32.mrb[39].mxu1 }
 0x84c   : > { %2292 = vst.msk [vmem:[%s463_s9] sm:$0xff] %vm503_vm0, %v2278_v6  ;;  %v2281_v23 = vadd.f32 %v2585_v63, %v2280_v21 }
 0x84d   : > { %2295 = vst.msk [vmem:[%s463_s9 + $0x18] sm:$0xff] %vm503_vm0, %v2289_v22 }
 0x84e   : > { %2293 = vst.msk [vmem:[%s463_s9 + $0x8] sm:$0xff] %vm503_vm0, %v2281_v23 }
 0x84f   : > { %3688 = shalt.err (!%p3685_p10)
}
 0x850   : > { %s3689_s25 = scalar_lea.hbm %s4503_s17, 512  ;;  %s3693_s9 = scalar_lea.hbm %s4596_s28, 1024 }
 0x851   : > { %p3690_p11 = scmp.ne.s32.totalorder %s4503_s17, %s3689_s25  ;;  %p3694_p7 = scmp.lt.u32.totalorder %s4503_s17, %s4596_s28 }
 0x852   : > { %p3695_p6 = scmp.lt.u32.totalorder %s3693_s9, %s3689_s25  ;;  %p3697_p12 = scmp.lt.u32.totalorder %s3689_s25, %s4503_s17 }
 0x853   : > { %p3691_p3 = pnand %p3690_p11, %p4597_p1 }
 0x854   : > { %p3696_p9 = por %p3695_p6, %p3694_p7 }
 0x855   : > { %p3692_p5 = pneg %p3691_p3 }
 0x856   : > { %p3698_p13 = por %p3697_p12, %p3696_p9 }
 0x858   : > { %p3699_p0 = pnand %p3698_p13, %p3692_p5 }
 0x85a   : > { %3702 = shalt.err (!%p3699_p0)
}
 0x85b   : > { %s3773_s27 = smov 128   ;;  %s3774_s29 = smov 8  }
 0x85c   : > { %3217 = dma.vmem_to_hbm [thread:$0]  (%p4597_p1), %s4497_s22, 512, %s4503_s17, %s2297_s15, %s3773_s27, %s3773_s27, %s3774_s29  }
 0x85d PF: > { %s2325_s13 = sand.u32 1, %s3745_s30   ;;  %p4598_p2 = scmp.ne.s32.totalorder %s4585_s26, 0 }
 0x85e   : > { %p4599_p8 = scmp.ge.s32.totalorder %s3757_s12, 2  ;;  %s2326_s18 = scalar_lea.sflag [#allocation4], %s2325_s13 }
 0x860   : > { %p3249_p4 = pnand %p4599_p8, %p4598_p2 }
 0x862   : > { %3740 = dma.done.wait (!%p3249_p4), %s2326_s18, 512  }
 0x863   : > { %3742 = vsyncadd (!%p3249_p4), %s2326_s18, 4294966784  ;;  %p26_p10 = scmp.ge.s32.totalorder %s4055_s19, 4   ;;  %s4600_s30 = smov %s3749_s10 }
 0x864   : > { %s4601_s10 = smov %s3753_s11  ;;  %s4602_s11 = smov %s4066_s1 }
 0x865   : > { %s4603_s12 = smov %s4055_s19  ;;  %28 = sbr.rel (!%p26_p10) target bundleno = 13 (0xd), region = 133 }
 0x86c   :  { %2331 = vsyncpa [#allocation3], 1 }
 0x86d   :  { %2333 = vsyncpa [#allocation3 + $0x1], 1 }
 0x86e   :  { %2334 = vsyncpa [#allocation6], 1 }
 0x86f   :  { %2335 = vsyncpa [#allocation9], 1 }
 0x870   :  { %2336 = vsyncpa [#allocation12], 1 }
 0x871   :  { %2337 = vsyncpa [#allocation15], 1 }
 0x872   :  { %2338 = vsyncpa [#allocation4], 1 }
 0x873   :  { %2340 = vsyncpa [#allocation4 + $0x1], 1 }

</bundles_post_ra>
